<compile_context>
chip_gen: v7x
topology: tpu7x:2x2x1
jax: 0.10.0
libtpu: 0.0.40
codegen_flags: <defaults>
</compile_context>

<pallas_src>
import functools

import jax
import jax.numpy as jnp
from jax.experimental import pallas as pl
from jax.experimental.pallas import tpu as pltpu

D_IN = 28 * 28        # 784  (x.view(-1, 28*28)); 16-aligned -> no K padding
H = 1000              # self.max
N_CLASSES = 10

H_PAD = 1024          # 8 * 128  (= 4 * 256 for v6e/v7x MXU), N-pad only
OUT_PAD = 128         # lane-dense output store


def _round_up(n, m):
    return (n + m - 1) // m * m


def _pick_batch_tile(b):
    """Batch tile: >=2 grid steps for mid batches (v7x megacore), 512 for huge."""
    if b >= 2048:
        return 512                       # amortize per-step overhead (v6e/v7x)
    if b >= 512:
        return 256
    if b >= 32:
        # split the batch into (at least) two tiles so the "parallel" grid
        # axis can shard across both v7x TensorCores
        return _round_up(pl.cdiv(b, 2), 16)
    return _round_up(b, 16)              # bf16 (16,128) sublane rule


def _forward_kernel(scal_ref, x_ref, w1_ref, w2_ref, w3_ref, o_ref, *, soft):
    """One batch tile: fc1 -> relu -> mask1 -> fc2 -> relu -> mask2 -> fc3."""
    border1 = scal_ref[0]
    border2 = scal_ref[1]
    sharp = scal_ref[2]

    # Column index row-vector (f32 math on purpose: v5e has no bf16 VPU/EUP).
    idx = jax.lax.broadcasted_iota(jnp.int32, (1, H_PAD), 1).astype(jnp.float32)

    def shorten_mask(border):
        if soft:
            m = (idx - border * H) * sharp
            return 1.0 - jax.nn.sigmoid(m)
        # hard mask: zero columns > ceil(border*max); all-zero if border < 0.
        limit = jnp.ceil(border * H)
        keep = (idx <= limit).astype(jnp.float32)
        return jnp.where(border < 0.0, jnp.zeros_like(keep), keep)

    # Columns 1000..1023 of h1/h3 are exactly zero because the weight pad
    # regions are zero (prepare_weights invariant), so masking over H_PAD is
    # harmless.
    y1 = shorten_mask(border1)
    y2 = shorten_mask(border2)

    x = x_ref[...]                                        # already bf16
    # x1 = relu(fc1(x))
    h1 = jnp.maximum(
        jnp.dot(x, w1_ref[...], preferred_element_type=jnp.float32), 0.0)
    # x2 = shorten(x1, max, w1, sharpness)
    h2 = (h1 * y1).astype(jnp.bfloat16)
    # x3 = relu(fc2(x2))
    h3 = jnp.maximum(
        jnp.dot(h2, w2_ref[...], preferred_element_type=jnp.float32), 0.0)
    # x4 = shorten(x3, max, w2, sharpness)
    h4 = (h3 * y2).astype(jnp.bfloat16)
    # x5 = fc3(x4)
    o_ref[...] = jnp.dot(h4, w3_ref[...], preferred_element_type=jnp.float32)


def prepare_weights(w1_fc, w2_fc, w3_fc):
    """Zero-pad output dims to MXU-friendly sizes and cast to bf16 (one-time).

    Weights are stored pre-transposed as [in, out].  No K padding: fc1's
    contraction dim stays at 784.  Pad regions MUST stay zero (see kernel).
    """
    w1p = jnp.zeros((D_IN, H_PAD), jnp.float32).at[:, :H].set(w1_fc)
    w2p = jnp.zeros((H_PAD, H_PAD), jnp.float32).at[:H, :H].set(w2_fc)
    w3p = jnp.zeros((H_PAD, OUT_PAD), jnp.float32).at[:H, :N_CLASSES].set(w3_fc)
    return (w1p.astype(jnp.bfloat16),
            w2p.astype(jnp.bfloat16),
            w3p.astype(jnp.bfloat16))


def simple_nn_forward(x, prepared_weights, w1, w2, sharpness=None):
    """x: [B, 1, 28, 28]; prepared_weights: output of prepare_weights."""
    w1p, w2p, w3p = prepared_weights
    b = x.shape[0]

    # bf16 input stream (kernel matmuls are bf16 x bf16 -> f32 accumulate).
    x2d = x.reshape(b, D_IN).astype(jnp.bfloat16)

    tb = _pick_batch_tile(b)
    b_pad = _round_up(b, tb)
    if b_pad != b:
        # Only the batch dim is ever padded, and only when ragged (cheap bf16
        # pad of x alone; no feature-column padding, no f32 materialization).
        x2d = jnp.pad(x2d, ((0, b_pad - b), (0, 0)))

    soft = sharpness is not None
    scalars = jnp.stack([
        jnp.asarray(w1, jnp.float32),
        jnp.asarray(w2, jnp.float32),
        jnp.asarray(sharpness if soft else 0.0, jnp.float32),
    ])

    # Weights: constant block index -> resident across grid steps; single
    # buffer (they are never re-fetched, so a second buffer is wasted VMEM).
    def weight_spec(shape):
        return pl.BlockSpec(shape, lambda i: (0, 0),
                            pipeline_mode=pl.Buffered(1))

    grid = (b_pad // tb,)
    out = pl.pallas_call(
        functools.partial(_forward_kernel, soft=soft),
        out_shape=jax.ShapeDtypeStruct((b_pad, OUT_PAD), jnp.float32),
        grid=grid,
        in_specs=[
            # scalar borders / sharpness, whole array in SMEM
            pl.BlockSpec(memory_space=pltpu.MemorySpace.SMEM),
            # x: tiled over batch rows, full (unpadded) 784 feature columns
            pl.BlockSpec((tb, D_IN), lambda i: (i, 0)),
            weight_spec((D_IN, H_PAD)),
            weight_spec((H_PAD, H_PAD)),
            weight_spec((H_PAD, OUT_PAD)),
        ],
        out_specs=pl.BlockSpec((tb, OUT_PAD), lambda i: (i, 0)),
        compiler_params=pltpu.CompilerParams(
            dimension_semantics=("parallel",),
            vmem_limit_bytes=32 * 1024 * 1024,
        ),
    )(scalars, x2d, w1p, w2p, w3p)

    return out[:b, :N_CLASSES]


# ----------------------------- reference ------------------------------------

def _shorten_mask(border, max_, sharpness):
    idx = jnp.arange(max_, dtype=jnp.float32)
    if sharpness is None:
        limit = jnp.ceil(border * max_)
        keep = (idx <= limit).astype(jnp.float32)
        mask = jnp.where(border < 0, jnp.zeros_like(keep), keep)
    else:
        m = (idx - border * max_) * jnp.float32(sharpness)
        mask = 1.0 - jax.nn.sigmoid(m)
    return mask[None, :]


def _ref_forward(x, params, sharpness=None):
    """Plain-JAX reference mirroring the kernel's bf16-weight numerics."""
    w1_fc, w2_fc, w3_fc, w1, w2 = params
    x2d = x.reshape(x.shape[0], D_IN).astype(jnp.float32)

    def mm(a, w):
        return jnp.dot(a.astype(jnp.bfloat16), w.astype(jnp.bfloat16),
                       preferred_element_type=jnp.float32)

    x1 = jnp.maximum(mm(x2d, w1_fc), 0.0)
    x2 = x1 * _shorten_mask(w1, H, sharpness)
    x3 = jnp.maximum(mm(x2, w2_fc), 0.0)
    x4 = x3 * _shorten_mask(w2, H, sharpness)
    return mm(x4, w3_fc)


# ------------------------------- main ----------------------------------------

if __name__ == "__main__":
    key = jax.random.PRNGKey(0)
    k1, k2, k3, kx = jax.random.split(key, 4)

    # PyTorch nn.Linear(bias=False) default init U(-1/sqrt(fan_in), +1/sqrt(fan_in)),
    # weights stored pre-transposed as [in, out].
    b1 = 1.0 / float(D_IN) ** 0.5
    b2 = 1.0 / float(H) ** 0.5
    w1_fc = jax.random.uniform(k1, (D_IN, H), jnp.float32, -b1, b1)
    w2_fc = jax.random.uniform(k2, (H, H), jnp.float32, -b2, b2)
    w3_fc = jax.random.uniform(k3, (H, N_CLASSES), jnp.float32, -b2, b2)
    w1 = jnp.float32(0.3)      # nn.Parameter(torch.tensor(0.3))
    w2 = jnp.float32(0.1)      # nn.Parameter(torch.tensor(0.1))

    prepared = prepare_weights(w1_fc, w2_fc, w3_fc)
    ref_params = (w1_fc, w2_fc, w3_fc, w1, w2)

    # MNIST-shaped input (NCHW), small batch.
    B = 2
    x = jax.random.normal(kx, (B, 1, 28, 28), jnp.float32)

    # Soft-mask path (training: sharpness = 0.01 * epoch**1.5).
    out_soft = simple_nn_forward(x, prepared, w1, w2, sharpness=0.01)
    jax.block_until_ready(out_soft)
    ref_soft = _ref_forward(x, ref_params, sharpness=0.01)
    assert out_soft.shape == (B, N_CLASSES)
    assert jnp.allclose(out_soft, ref_soft, atol=5e-3, rtol=5e-3)

    # Hard-mask path (sharpness=None, as in get_accuracy / default forward).
    out_hard = simple_nn_forward(x, prepared, w1, w2, sharpness=None)
    jax.block_until_ready(out_hard)
    ref_hard = _ref_forward(x, ref_params, sharpness=None)
    assert jnp.allclose(out_hard, ref_hard, atol=5e-3, rtol=5e-3)

    # Larger batch exercises the multi-tile grid (resident weights, 2 steps).
    B2 = 512
    x_big = jax.random.normal(kx, (B2, 1, 28, 28), jnp.float32)
    out_big = simple_nn_forward(x_big, prepared, w1, w2, sharpness=0.01)
    jax.block_until_ready(out_big)
    ref_big = _ref_forward(x_big, ref_params, sharpness=0.01)
    assert out_big.shape == (B2, N_CLASSES)
    assert jnp.allclose(out_big, ref_big, atol=5e-3, rtol=5e-3)

    print("KERNEL_OK")
</pallas_src>

<mosaic_0001>
module attributes {stable_mosaic.version = 11 : i64} {
  func.func @_forward_kernel(%arg0: i32, %arg1: memref<3xf32, #tpu.memory_space<smem>>, %arg2: memref<16x784xbf16, #tpu.memory_space<vmem>>, %arg3: memref<784x1024xbf16, #tpu.memory_space<vmem>>, %arg4: memref<1024x1024xbf16, #tpu.memory_space<vmem>>, %arg5: memref<1024x128xbf16, #tpu.memory_space<vmem>>, %arg6: memref<16x128xf32, #tpu.memory_space<vmem>>) attributes {dimension_semantics = [#tpu.dimension_semantics<parallel>], iteration_bounds = array<i64: 1>, scalar_prefetch = 0 : i64, scratch_operands = 0 : i64, tpu.core_type = #tpu.core_type<tc>, window_params = [{transform_indices = @transform_0, window_bounds = array<i64: 3>}, {transform_indices = @transform_1, window_bounds = array<i64: 16, 784>}, {pipeline_mode = #tpu.pipeline_mode<synchronous>, transform_indices = @transform_2, window_bounds = array<i64: 784, 1024>}, {pipeline_mode = #tpu.pipeline_mode<synchronous>, transform_indices = @transform_3, window_bounds = array<i64: 1024, 1024>}, {pipeline_mode = #tpu.pipeline_mode<synchronous>, transform_indices = @transform_4, window_bounds = array<i64: 1024, 128>}, {transform_indices = @transform_5, window_bounds = array<i64: 16, 128>}]} {
    %c0 = arith.constant 0 : index
    %0 = memref.load %arg1[%c0] : memref<3xf32, #tpu.memory_space<smem>>
    %c1 = arith.constant 1 : index
    %1 = memref.load %arg1[%c1] : memref<3xf32, #tpu.memory_space<smem>>
    %c2 = arith.constant 2 : index
    %2 = memref.load %arg1[%c2] : memref<3xf32, #tpu.memory_space<smem>>
    %3 = tpu.iota {dimensions = array<i32: 1>} : vector<1x1024xi32>
    %4 = arith.sitofp %3 : vector<1x1024xi32> to vector<1x1024xf32>
    %cst = arith.constant 1.000000e+03 : f32
    %5 = arith.mulf %0, %cst : f32
    %6 = vector.broadcast %5 : f32 to vector<1x1024xf32>
    %7 = arith.subf %4, %6 : vector<1x1024xf32>
    %8 = vector.broadcast %2 : f32 to vector<1x1024xf32>
    %9 = arith.mulf %7, %8 : vector<1x1024xf32>
    %10 = arith.negf %9 : vector<1x1024xf32>
    %11 = math.exp %10 : vector<1x1024xf32>
    %cst_0 = arith.constant 1.000000e+00 : f32
    %12 = vector.broadcast %cst_0 : f32 to vector<1x1024xf32>
    %13 = arith.addf %12, %11 : vector<1x1024xf32>
    %14 = arith.divf %12, %13 : vector<1x1024xf32>
    %cst_1 = arith.constant 1.000000e+00 : f32
    %15 = vector.broadcast %cst_1 : f32 to vector<1x1024xf32>
    %16 = arith.subf %15, %14 : vector<1x1024xf32>
    %cst_2 = arith.constant 1.000000e+03 : f32
    %17 = arith.mulf %1, %cst_2 : f32
    %18 = vector.broadcast %17 : f32 to vector<1x1024xf32>
    %19 = arith.subf %4, %18 : vector<1x1024xf32>
    %20 = vector.broadcast %2 : f32 to vector<1x1024xf32>
    %21 = arith.mulf %19, %20 : vector<1x1024xf32>
    %22 = arith.negf %21 : vector<1x1024xf32>
    %23 = math.exp %22 : vector<1x1024xf32>
    %cst_3 = arith.constant 1.000000e+00 : f32
    %24 = vector.broadcast %cst_3 : f32 to vector<1x1024xf32>
    %25 = arith.addf %24, %23 : vector<1x1024xf32>
    %26 = arith.divf %24, %25 : vector<1x1024xf32>
    %cst_4 = arith.constant 1.000000e+00 : f32
    %27 = vector.broadcast %cst_4 : f32 to vector<1x1024xf32>
    %28 = arith.subf %27, %26 : vector<1x1024xf32>
    %c0_5 = arith.constant 0 : index
    %c0_6 = arith.constant 0 : index
    %29 = vector.load %arg2[%c0_5, %c0_6] : memref<16x784xbf16, #tpu.memory_space<vmem>>, vector<16x784xbf16>
    %c0_7 = arith.constant 0 : index
    %c0_8 = arith.constant 0 : index
    %30 = vector.load %arg3[%c0_7, %c0_8] : memref<784x1024xbf16, #tpu.memory_space<vmem>>, vector<784x1024xbf16>
    %cst_9 = arith.constant dense<0.000000e+00> : vector<16x1024xf32>
    %31 = tpu.matmul %29, %30, %cst_9 {dimension_numbers = #tpu.dot_dimension_numbers<[1], [0], [0], [1], [0, 0, 1, 1], [], []>} : vector<16x784xbf16>, vector<784x1024xbf16>, vector<16x1024xf32> -> vector<16x1024xf32>
    %cst_10 = arith.constant 0.000000e+00 : f32
    %32 = vector.broadcast %cst_10 : f32 to vector<16x1024xf32>
    %33 = arith.maximumf %31, %32 : vector<16x1024xf32>
    %34 = vector.broadcast %16 : vector<1x1024xf32> to vector<16x1024xf32>
    %35 = arith.mulf %33, %34 : vector<16x1024xf32>
    %36 = arith.truncf %35 : vector<16x1024xf32> to vector<16x1024xbf16>
    %c0_11 = arith.constant 0 : index
    %c0_12 = arith.constant 0 : index
    %37 = vector.load %arg4[%c0_11, %c0_12] : memref<1024x1024xbf16, #tpu.memory_space<vmem>>, vector<1024x1024xbf16>
    %cst_13 = arith.constant dense<0.000000e+00> : vector<16x1024xf32>
    %38 = tpu.matmul %36, %37, %cst_13 {dimension_numbers = #tpu.dot_dimension_numbers<[1], [0], [0], [1], [0, 0, 1, 1], [], []>} : vector<16x1024xbf16>, vector<1024x1024xbf16>, vector<16x1024xf32> -> vector<16x1024xf32>
    %cst_14 = arith.constant 0.000000e+00 : f32
    %39 = vector.broadcast %cst_14 : f32 to vector<16x1024xf32>
    %40 = arith.maximumf %38, %39 : vector<16x1024xf32>
    %41 = vector.broadcast %28 : vector<1x1024xf32> to vector<16x1024xf32>
    %42 = arith.mulf %40, %41 : vector<16x1024xf32>
    %43 = arith.truncf %42 : vector<16x1024xf32> to vector<16x1024xbf16>
    %c0_15 = arith.constant 0 : index
    %c0_16 = arith.constant 0 : index
    %44 = vector.load %arg5[%c0_15, %c0_16] : memref<1024x128xbf16, #tpu.memory_space<vmem>>, vector<1024x128xbf16>
    %cst_17 = arith.constant dense<0.000000e+00> : vector<16x128xf32>
    %45 = tpu.matmul %43, %44, %cst_17 {dimension_numbers = #tpu.dot_dimension_numbers<[1], [0], [0], [1], [0, 0, 1, 1], [], []>} : vector<16x1024xbf16>, vector<1024x128xbf16>, vector<16x128xf32> -> vector<16x128xf32>
    %c0_18 = arith.constant 0 : index
    %c0_19 = arith.constant 0 : index
    %46 = vector.load %arg6[%c0_18, %c0_19] : memref<16x128xf32, #tpu.memory_space<vmem>>, vector<16x128xf32>
    tpu.vector_store %arg6[%c0_18, %c0_19], %45 {strides = array<i32>} : memref<16x128xf32, #tpu.memory_space<vmem>>, vector<16x128xf32>,
    return
  }
  func.func @transform_0(%arg0: i32) -> i32 {
    %c0_i32 = arith.constant 0 : i32
    %c0_i32_0 = arith.constant 0 : i32
    return %c0_i32 : i32
  }
  func.func @transform_1(%arg0: i32) -> (i32, i32) {
    %c0_i32 = arith.constant 0 : i32
    %c0_i32_0 = arith.constant 0 : i32
    return %arg0, %c0_i32 : i32, i32
  }
  func.func @transform_2(%arg0: i32) -> (i32, i32) {
    %c0_i32 = arith.constant 0 : i32
    %c0_i32_0 = arith.constant 0 : i32
    %c0_i32_1 = arith.constant 0 : i32
    return %c0_i32, %c0_i32_0 : i32, i32
  }
  func.func @transform_3(%arg0: i32) -> (i32, i32) {
    %c0_i32 = arith.constant 0 : i32
    %c0_i32_0 = arith.constant 0 : i32
    %c0_i32_1 = arith.constant 0 : i32
    return %c0_i32, %c0_i32_0 : i32, i32
  }
  func.func @transform_4(%arg0: i32) -> (i32, i32) {
    %c0_i32 = arith.constant 0 : i32
    %c0_i32_0 = arith.constant 0 : i32
    %c0_i32_1 = arith.constant 0 : i32
    return %c0_i32, %c0_i32_0 : i32, i32
  }
  func.func @transform_5(%arg0: i32) -> (i32, i32) {
    %c0_i32 = arith.constant 0 : i32
    %c0_i32_0 = arith.constant 0 : i32
    return %arg0, %c0_i32 : i32, i32
  }
}

</mosaic_0001>

<bundles_post_ra>
// kernel: tpu_custom_call.1
= control target key start
LH: loop header
LB: loop body
LE: loop exit
PB: predicated region body
PF: predicated region fallthrough
CT: control target
= control target key end

     0   :  { %10 = vsyncpa [#allocation5], 0  ;;  %s9697_s0 = inlined_call_operand.hbm [shape: f32[3], index: 0, kind: input, shape index: {}]   ;;  %s9698_s1 = inlined_call_operand.hbm [shape: bf16[16,784], index: 1, kind: input, shape index: {}]   ;;  %s9699_s2 = inlined_call_operand.hbm [shape: bf16[784,1024], index: 2, kind: input, shape index: {}]   ;;  %s9700_s3 = inlined_call_operand.hbm [shape: bf16[1024,1024], index: 3, kind: input, shape index: {}]   ;;  %s9701_s4 = inlined_call_operand.hbm [shape: bf16[1024,128], index: 4, kind: input, shape index: {}]   ;;  %s9702_s5 = inlined_call_operand.hbm [shape: f32[16,128], index: 5, kind: output, shape index: {}]  }
   0x1   :  { %11 = vsyncpa [#allocation3], 0 }
   0x2   :  { %12 = vsyncpa [#allocation8], 0 }
   0x3   :  { %13 = vsyncpa [#allocation11], 0 }
   0x4   :  { %14 = vsyncpa [#allocation4], 0  ;;  %s9353_s18 = smov [#allocation7]   ;;  %s9223_s22 = scalar_lea.hbm %s9699_s2, 50176 }
   0x5   :  { %s40_s19 = sshll.u32 %s9353_s18, 4  ;;  %p9224_p0 = scmp.ne.s32.totalorder %s9699_s2, %s9223_s22  ;;  %s41_s19 = int_to_ptr.vmem [resolvable:$true] %s40_s19 }
   0x6   :  { %p9227_p1 = scmp.lt.u32.totalorder %s9223_s22, %s9699_s2 }
   0x8   :  { %p9229_p2 = pnand %p9227_p1, %p9224_p0 }
   0xa   :  { %9232 = shalt.err (!%p9229_p2)
}
   0xb   :  { %s9233_s27 = scalar_lea.vmem %s41_s19, 50176  ;;  %p9238_p4 = scmp.lt.s32.totalorder %s41_s19, %s41_s19 }
   0xc   :  { %p9234_p3 = scmp.ne.s32.totalorder %s41_s19, %s9233_s27  ;;  %p9239_p5 = scmp.lt.s32.totalorder %s9233_s27, %s9233_s27 }
   0xe   :  { %p9240_p6 = por %p9239_p5, %p9238_p4 }
  0x10   :  { %p9241_p7 = pnand %p9240_p6, %p9234_p3 }
  0x12   :  { %9244 = shalt.err (!%p9241_p7)
}
  0x13   :  { %s9354_s28 = smov 512   ;;  %s9355_s29 = smov 32  }
  0x14   :  { %46 = dma.hbm_to_vmem [thread:$0]  %s9699_s2, 50176, %s41_s19, [#allocation8], %s9354_s28, %s9354_s28, %s9355_s29  }
  0x15   :  { %s9245_s9 = scalar_lea.hbm %s9697_s0, 16 }
  0x16   :  { %p9246_p8 = scmp.ne.s32.totalorder %s9697_s0, %s9245_s9  ;;  %p9249_p9 = scmp.lt.u32.totalorder %s9245_s9, %s9697_s0 }
  0x18   :  { %p9251_p10 = pnand %p9249_p9, %p9246_p8 }
  0x1a   :  { %9254 = shalt.err (!%p9251_p10)
}
  0x1b   :  { %s9356_s14 = smov [#allocation2]   ;;  %s9357_s2 = smov [#allocation6]  }
  0x1c   :  { %22 = dma.hbm_to_smem %s9697_s0, 16, %s9356_s14, [#allocation5]  }
  0x1d   :  { %s28_s17 = sshll.u32 %s9357_s2, 4  ;;  %s9255_s20 = scalar_lea.hbm %s9698_s1, 896  ;;  %s29_s17 = int_to_ptr.vmem [resolvable:$true] %s28_s17 }
  0x1e   :  { %p9256_p11 = scmp.ne.s32.totalorder %s9698_s1, %s9255_s20  ;;  %p9259_p12 = scmp.lt.u32.totalorder %s9255_s20, %s9698_s1 }
  0x20   :  { %p9261_p13 = pnand %p9259_p12, %p9256_p11 }
  0x22   :  { %9264 = shalt.err (!%p9261_p13)
}
  0x23   :  { %s9265_s25 = scalar_lea.vmem %s29_s17, 896  ;;  %p9270_p1 = scmp.lt.s32.totalorder %s29_s17, %s29_s17 }
  0x24   :  { %p9266_p0 = scmp.ne.s32.totalorder %s29_s17, %s9265_s25  ;;  %p9271_p2 = scmp.lt.s32.totalorder %s9265_s25, %s9265_s25 }
  0x26   :  { %p9272_p3 = por %p9271_p2, %p9270_p1 }
  0x28   :  { %p9273_p4 = pnand %p9272_p3, %p9266_p0 }
  0x2a   :  { %9276 = shalt.err (!%p9273_p4)
}
  0x2b   :  { %s9358_s0 = smov 448   ;;  %s9359_s26 = smov 28  }
  0x2c   :  { %34 = dma.hbm_to_vmem [thread:$0]  %s9698_s1, 896, %s29_s17, [#allocation3], %s9358_s0, %s9358_s0, %s9359_s26  }
  0x2d   :  { %s9360_s6 = smov [#allocation9]   ;;  %s9361_s8 = smov [#allocation10]  }
  0x2e   :  { %s52_s7 = sshll.u32 %s9360_s6, 4  ;;  %s64_s9 = sshll.u32 %s9361_s8, 4  ;;  %s53_s7 = int_to_ptr.vmem [resolvable:$true] %s52_s7  ;;  %s65_s9 = int_to_ptr.vmem [resolvable:$true] %s64_s9 }
  0x2f   :  { %s9277_s12 = scalar_lea.hbm %s9700_s3, 65536 }
  0x30   :  { %p9278_p5 = scmp.ne.s32.totalorder %s9700_s3, %s9277_s12  ;;  %p9281_p6 = scmp.lt.u32.totalorder %s9277_s12, %s9700_s3 }
  0x32   :  { %p9283_p7 = pnand %p9281_p6, %p9278_p5 }
  0x34   :  { %9286 = shalt.err (!%p9283_p7)
}
  0x35   :  { %s9287_s1 = scalar_lea.vmem %s53_s7, 65536  ;;  %p9292_p9 = scmp.lt.s32.totalorder %s53_s7, %s53_s7 }
  0x36   :  { %p9288_p8 = scmp.ne.s32.totalorder %s53_s7, %s9287_s1  ;;  %p9293_p10 = scmp.lt.s32.totalorder %s9287_s1, %s9287_s1 }
  0x38   :  { %p9294_p11 = por %p9293_p10, %p9292_p9 }
  0x3a   :  { %p9295_p12 = pnand %p9294_p11, %p9288_p8 }
  0x3c   :  { %9298 = shalt.err (!%p9295_p12)
}
  0x3d   :  { %58 = dma.hbm_to_vmem [thread:$0]  %s9700_s3, 65536, %s53_s7, [#allocation8], %s9354_s28, %s9354_s28, %s9355_s29  }
  0x3e   :  { %s9299_s20 = scalar_lea.hbm %s9701_s4, 8192 }
  0x3f   :  { %p9300_p13 = scmp.ne.s32.totalorder %s9701_s4, %s9299_s20  ;;  %p9303_p0 = scmp.lt.u32.totalorder %s9299_s20, %s9701_s4 }
  0x41   :  { %p9305_p1 = pnand %p9303_p0, %p9300_p13 }
  0x43   :  { %9308 = shalt.err (!%p9305_p1)
}
  0x44   :  { %s9309_s25 = scalar_lea.vmem %s65_s9, 8192  ;;  %p9314_p3 = scmp.lt.s32.totalorder %s65_s9, %s65_s9 }
  0x45   :  { %p9310_p2 = scmp.ne.s32.totalorder %s65_s9, %s9309_s25  ;;  %p9315_p4 = scmp.lt.s32.totalorder %s9309_s25, %s9309_s25 }
  0x47   :  { %p9316_p5 = por %p9315_p4, %p9314_p3 }
  0x49   :  { %p9317_p6 = pnand %p9316_p5, %p9310_p2 }
  0x4b   :  { %9320 = shalt.err (!%p9317_p6)
}
  0x4c   :  { %s9362_s3 = smov 64   ;;  %s9363_s28 = smov 4  }
  0x4d   :  { %70 = dma.hbm_to_vmem [thread:$0]  %s9701_s4, 8192, %s65_s9, [#allocation11], %s9362_s3, %s9362_s3, %s9363_s28  }
  0x4e   :  { %9343 = dma.done.wait [#allocation5], 16  }
  0x4f   :  { %9344 = vsyncadd [#allocation5], 4294967280 }
  0x50   :  { %9345 = dma.done.wait [#allocation3], 896  }
  0x51   :  { %9346 = vsyncadd [#allocation3], 4294966400 }
  0x52   :  { %9347 = dma.done.wait [#allocation8], 115712  }
  0x53   :  { %9348 = vsyncadd [#allocation8], 4294851584 }
  0x54   :  { %9349 = dma.done.wait [#allocation11], 8192  }
  0x55   :  { %9350 = vsyncadd [#allocation11], 4294959104 }
  0x56   :  { %86 = sfence }
  0x57   :  { %v265_v0 = vld [vmem:[#allocation7] sm:$0xff]  ;;  %v266_v2 = vld [vmem:[#allocation7 + $0x8] sm:$0xff]  ;;  %vm2652_vm0 = vcmask 130048   ;;  %s9468_s4 = sld [smem:[#allocation2]]  ;;  %s9472_s26 = sld [smem:[#allocation2 + $0x2]] }
  0x58   :  { %v269_v1 = vld [vmem:[#allocation7 + $0x20] sm:$0xff]  ;;  %v270_v4 = vld [vmem:[#allocation7 + $0x28] sm:$0xff]  ;;  %s9603_s30 = sld [smem:[#allocation2 + $0x1]]  ;;  %s9365_s7 = smov [#allocation12]  }
  0x59   :  { %v7908_v3 = vcombine.high %v265_v0, %v269_v1  ;;  %v7907_v5 = vcombine.low %v265_v0, %v269_v1  ;;  %v273_v6 = vld [vmem:[#allocation7 + $0x40] sm:$0xff]  ;;  %v7910_v8 = vcombine.high %v266_v2, %v270_v4  ;;  %v7909_v9 = vcombine.low %v266_v2, %v270_v4  ;;  %v274_v11 = vld [vmem:[#allocation7 + $0x48] sm:$0xff]  ;;  %s7867_s8 = sshll.u32 %s9365_s7, 4  ;;  %s7868_s8 = int_to_ptr.vmem [resolvable:$true] %s7867_s8 }
  0x5a   :  { %v277_v7 = vld [vmem:[#allocation7 + $0x60] sm:$0xff]  ;;  %v278_v12 = vld [vmem:[#allocation7 + $0x68] sm:$0xff]  ;;  %s9321_s9 = scalar_lea.vmem %s7868_s8, 256  ;;  %p9326_p8 = scmp.lt.s32.totalorder %s7868_s8, %s7868_s8 }
  0x5b   :  { %v7916_v10 = vcombine.high %v273_v6, %v277_v7  ;;  %v281_v13 = vld [vmem:[#allocation7 + $0x80] sm:$0xff]  ;;  %2656 = vmatprep.subr.bf16.mxu0 %v7908_v3  ;;  %v7918_v14 = vcombine.high %v274_v11, %v278_v12  ;;  %v282_v16 = vld [vmem:[#allocation7 + $0x88] sm:$0xff]  ;;  %2828 = vmatprep.subr.bf16.mxu1 %v7910_v8  ;;  %v7915_v18 = vcombine.low %v273_v6, %v277_v7  ;;  %p9322_p7 = scmp.ne.s32.totalorder %s7868_s8, %s9321_s9  ;;  %p9327_p9 = scmp.lt.s32.totalorder %s9321_s9, %s9321_s9 }
  0x5c   :  { %v285_v15 = vld [vmem:[#allocation7 + $0xa0] sm:$0xff]  ;;  %v286_v17 = vld [vmem:[#allocation7 + $0xa8] sm:$0xff]  ;;  %2657 = vmatpush1.bf16.msra.mxu0 %v7907_v5  ;;  %2829 = vmatpush1.bf16.msra.mxu1 %v7909_v9  ;;  %v7917_v19 = vcombine.low %v274_v11, %v278_v12 }
  0x5d   :  { %2658 = vmatprep.subr.bf16.mxu0 %v7916_v10  ;;  %v7924_v20 = vcombine.high %v281_v13, %v285_v15  ;;  %2830 = vmatprep.subr.bf16.mxu1 %v7918_v14  ;;  %v7926_v21 = vcombine.high %v282_v16, %v286_v17  ;;  %v289_v22 = vld [vmem:[#allocation7 + $0xc0] sm:$0xff]  ;;  %v290_v24 = vld [vmem:[#allocation7 + $0xc8] sm:$0xff]  ;;  %v7923_v26 = vcombine.low %v281_v13, %v285_v15  ;;  %s108_s27 = smul.f32 1000.0, %s9468_s4  ;;  %p9328_p10 = por %p9327_p9, %p9326_p8 }
  0x5e   :  { %v293_v23 = vld [vmem:[#allocation7 + $0xe0] sm:$0xff]  ;;  %v294_v25 = vld [vmem:[#allocation7 + $0xe8] sm:$0xff]  ;;  %v7925_v27 = vcombine.low %v282_v16, %v286_v17  ;;  %s183_s6 = smul.f32 1000.0, %s9603_s30 }
  0x5f   :  { %v7932_v28 = vcombine.high %v289_v22, %v293_v23  ;;  %v7934_v29 = vcombine.high %v290_v24, %v294_v25  ;;  %v297_v30 = vld [vmem:[#allocation7 + $0x100] sm:$0xff]  ;;  %v298_v32 = vld [vmem:[#allocation7 + $0x108] sm:$0xff]  ;;  %v7931_v34 = vcombine.low %v289_v22, %v293_v23  ;;  %v7933_v35 = vcombine.low %v290_v24, %v294_v25  ;;  %p9329_p11 = pnand %p9328_p10, %p9322_p7 }
  0x60   :  { %2659 = vmatpush1.bf16.msra.mxu0 %v7915_v18  ;;  %2831 = vmatpush1.bf16.msra.mxu1 %v7917_v19  ;;  %v301_v31 = vld [vmem:[#allocation7 + $0x120] sm:$0xff]  ;;  %v302_v33 = vld [vmem:[#allocation7 + $0x128] sm:$0xff] }
  0x61   :  { %2660 = vmatprep.subr.bf16.mxu0 %v7924_v20  ;;  %2832 = vmatprep.subr.bf16.mxu1 %v7926_v21  ;;  %v7940_v36 = vcombine.high %v297_v30, %v301_v31  ;;  %v7942_v37 = vcombine.high %v298_v32, %v302_v33  ;;  %v305_v38 = vld [vmem:[#allocation7 + $0x140] sm:$0xff]  ;;  %v306_v40 = vld [vmem:[#allocation7 + $0x148] sm:$0xff]  ;;  %v7939_v42 = vcombine.low %v297_v30, %v301_v31 }
  0x62   :  { %v309_v39 = vld [vmem:[#allocation7 + $0x160] sm:$0xff]  ;;  %v310_v41 = vld [vmem:[#allocation7 + $0x168] sm:$0xff]  ;;  %v7941_v43 = vcombine.low %v298_v32, %v302_v33 }
  0x63   :  { %v7948_v44 = vcombine.high %v305_v38, %v309_v39  ;;  %v7950_v45 = vcombine.high %v306_v40, %v310_v41  ;;  %v313_v46 = vld [vmem:[#allocation7 + $0x180] sm:$0xff]  ;;  %v314_v48 = vld [vmem:[#allocation7 + $0x188] sm:$0xff]  ;;  %v7947_v50 = vcombine.low %v305_v38, %v309_v39  ;;  %v7949_v51 = vcombine.low %v306_v40, %v310_v41 }
  0x64   :  { %2661 = vmatpush1.bf16.msra.mxu0 %v7923_v26  ;;  %2833 = vmatpush1.bf16.msra.mxu1 %v7925_v27  ;;  %v317_v47 = vld [vmem:[#allocation7 + $0x1a0] sm:$0xff]  ;;  %v318_v49 = vld [vmem:[#allocation7 + $0x1a8] sm:$0xff] }
  0x65   :  { %2662 = vmatprep.subr.bf16.mxu0 %v7932_v28  ;;  %2834 = vmatprep.subr.bf16.mxu1 %v7934_v29  ;;  %v7956_v52 = vcombine.high %v313_v46, %v317_v47  ;;  %v7958_v53 = vcombine.high %v314_v48, %v318_v49  ;;  %v321_v54 = vld [vmem:[#allocation7 + $0x1c0] sm:$0xff]  ;;  %v9078_v56 = vld [vmem:[#allocation6 + $0x4] ss:$28 sps:$4 sm:$0xff]   ;;  %v7955_v59 = vcombine.low %v313_v46, %v317_v47 }
  0x66   :  { %v325_v55 = vld [vmem:[#allocation7 + $0x1e0] sm:$0xff]  ;;  %v322_v57 = vld [vmem:[#allocation7 + $0x1c8] sm:$0xff]  ;;  %2688 = vmatprep.mubr.bf16.mxu0 %v9078_v56  ;;  %v7957_v60 = vcombine.low %v314_v48, %v318_v49  ;;  %2860 = vmatprep.mubr.bf16.mxu1 %v9078_v56 }
  0x67   :  { %v326_v58 = vld [vmem:[#allocation7 + $0x1e8] sm:$0xff]  ;;  %v7964_v61 = vcombine.high %v321_v54, %v325_v55  ;;  %v329_v63 = vld [vmem:[#allocation7 + $0x200] sm:$0xff]  ;;  %v7963_v3 = vcombine.low %v321_v54, %v325_v55 }
  0x68   :  { %2663 = vmatpush1.bf16.msra.mxu0 %v7931_v34  ;;  %2835 = vmatpush1.bf16.msra.mxu1 %v7933_v35  ;;  %v7966_v62 = vcombine.high %v322_v57, %v326_v58  ;;  %v333_v0 = vld [vmem:[#allocation7 + $0x220] sm:$0xff]  ;;  %v330_v1 = vld [vmem:[#allocation7 + $0x208] sm:$0xff]  ;;  %v7965_v4 = vcombine.low %v322_v57, %v326_v58 }
  0x69   :  { %2664 = vmatprep.subr.bf16.mxu0 %v7940_v36  ;;  %2836 = vmatprep.subr.bf16.mxu1 %v7942_v37  ;;  %v334_v2 = vld [vmem:[#allocation7 + $0x228] sm:$0xff]  ;;  %v7972_v5 = vcombine.high %v329_v63, %v333_v0  ;;  %v337_v7 = vld [vmem:[#allocation7 + $0x240] sm:$0xff]  ;;  %v7971_v11 = vcombine.low %v329_v63, %v333_v0 }
  0x6a   :  { %v7974_v6 = vcombine.high %v330_v1, %v334_v2  ;;  %v341_v8 = vld [vmem:[#allocation7 + $0x260] sm:$0xff]  ;;  %v338_v9 = vld [vmem:[#allocation7 + $0x248] sm:$0xff]  ;;  %v7973_v12 = vcombine.low %v330_v1, %v334_v2 }
  0x6b   :  { %v342_v10 = vld [vmem:[#allocation7 + $0x268] sm:$0xff]  ;;  %v7980_v13 = vcombine.high %v337_v7, %v341_v8  ;;  %v345_v15 = vld [vmem:[#allocation7 + $0x280] sm:$0xff]  ;;  %v7979_v19 = vcombine.low %v337_v7, %v341_v8 }
  0x6c   :  { %2665 = vmatpush1.bf16.msra.mxu0 %v7939_v42  ;;  %2837 = vmatpush1.bf16.msra.mxu1 %v7941_v43  ;;  %v7982_v14 = vcombine.high %v338_v9, %v342_v10  ;;  %v349_v16 = vld [vmem:[#allocation7 + $0x2a0] sm:$0xff]  ;;  %v346_v17 = vld [vmem:[#allocation7 + $0x288] sm:$0xff]  ;;  %v7981_v20 = vcombine.low %v338_v9, %v342_v10 }
  0x6d   :  { %2666 = vmatprep.subr.bf16.mxu0 %v7948_v44  ;;  %2838 = vmatprep.subr.bf16.mxu1 %v7950_v45  ;;  %v350_v18 = vld [vmem:[#allocation7 + $0x2a8] sm:$0xff]  ;;  %v7988_v21 = vcombine.high %v345_v15, %v349_v16  ;;  %v353_v23 = vld [vmem:[#allocation7 + $0x2c0] sm:$0xff]  ;;  %v7987_v27 = vcombine.low %v345_v15, %v349_v16 }
  0x6e   :  { %v7990_v22 = vcombine.high %v346_v17, %v350_v18  ;;  %v357_v24 = vld [vmem:[#allocation7 + $0x2e0] sm:$0xff]  ;;  %v354_v25 = vld [vmem:[#allocation7 + $0x2c8] sm:$0xff]  ;;  %v7989_v28 = vcombine.low %v346_v17, %v350_v18  ;;  %v9081_v18 = vld [vmem:[#allocation6 + $0xc] ss:$28 sps:$4 sm:$0xff]  }
  0x6f   :  { %v358_v26 = vld [vmem:[#allocation7 + $0x2e8] sm:$0xff]  ;;  %v7996_v29 = vcombine.high %v353_v23, %v357_v24  ;;  %v361_v31 = vld [vmem:[#allocation7 + $0x300] sm:$0xff]  ;;  %v7995_v35 = vcombine.low %v353_v23, %v357_v24 }
  0x70   :  { %2667 = vmatpush1.bf16.msra.mxu0 %v7947_v50  ;;  %2839 = vmatpush1.bf16.msra.mxu1 %v7949_v51  ;;  %v7998_v30 = vcombine.high %v354_v25, %v358_v26  ;;  %v365_v32 = vld [vmem:[#allocation7 + $0x320] sm:$0xff]  ;;  %v362_v33 = vld [vmem:[#allocation7 + $0x308] sm:$0xff]  ;;  %v7997_v36 = vcombine.low %v354_v25, %v358_v26 }
  0x71   :  { %2668 = vmatprep.subr.bf16.mxu0 %v7956_v52  ;;  %2840 = vmatprep.subr.bf16.mxu1 %v7958_v53  ;;  %v366_v34 = vld [vmem:[#allocation7 + $0x328] sm:$0xff]  ;;  %v8004_v37 = vcombine.high %v361_v31, %v365_v32  ;;  %v369_v39 = vld [vmem:[#allocation7 + $0x340] sm:$0xff]  ;;  %v8003_v43 = vcombine.low %v361_v31, %v365_v32 }
  0x72   :  { %v8006_v38 = vcombine.high %v362_v33, %v366_v34  ;;  %v373_v40 = vld [vmem:[#allocation7 + $0x360] sm:$0xff]  ;;  %v370_v41 = vld [vmem:[#allocation7 + $0x348] sm:$0xff]  ;;  %v8005_v44 = vcombine.low %v362_v33, %v366_v34 }
  0x73   :  { %v374_v42 = vld [vmem:[#allocation7 + $0x368] sm:$0xff]  ;;  %v8012_v45 = vcombine.high %v369_v39, %v373_v40  ;;  %v377_v47 = vld [vmem:[#allocation7 + $0x380] sm:$0xff]  ;;  %v8011_v51 = vcombine.low %v369_v39, %v373_v40 }
  0x74   :  { %2669 = vmatpush1.bf16.msra.mxu0 %v7955_v59  ;;  %2841 = vmatpush1.bf16.msra.mxu1 %v7957_v60  ;;  %v8014_v46 = vcombine.high %v370_v41, %v374_v42  ;;  %v381_v48 = vld [vmem:[#allocation7 + $0x3a0] sm:$0xff]  ;;  %v378_v49 = vld [vmem:[#allocation7 + $0x388] sm:$0xff]  ;;  %v8013_v52 = vcombine.low %v370_v41, %v374_v42 }
  0x75   :  { %2670 = vmatprep.subr.bf16.mxu0 %v7964_v61  ;;  %2842 = vmatprep.subr.bf16.mxu1 %v7966_v62  ;;  %v382_v50 = vld [vmem:[#allocation7 + $0x3a8] sm:$0xff]  ;;  %v8020_v53 = vcombine.high %v377_v47, %v381_v48  ;;  %v385_v55 = vld [vmem:[#allocation7 + $0x3c0] sm:$0xff]  ;;  %v8019_v59 = vcombine.low %v377_v47, %v381_v48 }
  0x76   :  { %v8022_v54 = vcombine.high %v378_v49, %v382_v50  ;;  %v389_v56 = vld [vmem:[#allocation7 + $0x3e0] sm:$0xff]  ;;  %v386_v57 = vld [vmem:[#allocation7 + $0x3c8] sm:$0xff]  ;;  %v8021_v60 = vcombine.low %v378_v49, %v382_v50 }
  0x77   :  { %v390_v58 = vld [vmem:[#allocation7 + $0x3e8] sm:$0xff]  ;;  %v8028_v61 = vcombine.high %v385_v55, %v389_v56  ;;  %v393_v63 = vld [vmem:[#allocation7 + $0x400] sm:$0xff] }
  0x78   :  { %2671 = vmatpush1.bf16.msra.mxu0 %v7963_v3  ;;  %2843 = vmatpush1.bf16.msra.mxu1 %v7965_v4  ;;  %v8030_v62 = vcombine.high %v386_v57, %v390_v58  ;;  %v397_v0 = vld [vmem:[#allocation7 + $0x420] sm:$0xff]  ;;  %v394_v1 = vld [vmem:[#allocation7 + $0x408] sm:$0xff]  ;;  %v8027_v3 = vcombine.low %v385_v55, %v389_v56  ;;  %v8029_v4 = vcombine.low %v386_v57, %v390_v58 }
  0x79   :  { %2672 = vmatprep.subr.bf16.mxu0 %v7972_v5  ;;  %2844 = vmatprep.subr.bf16.mxu1 %v7974_v6  ;;  %v398_v2 = vld [vmem:[#allocation7 + $0x428] sm:$0xff]  ;;  %v8036_v5 = vcombine.high %v393_v63, %v397_v0  ;;  %v401_v7 = vld [vmem:[#allocation7 + $0x440] sm:$0xff] }
  0x7a   :  { %v8038_v6 = vcombine.high %v394_v1, %v398_v2  ;;  %v405_v8 = vld [vmem:[#allocation7 + $0x460] sm:$0xff]  ;;  %v402_v10 = vld [vmem:[#allocation7 + $0x448] sm:$0xff] }
  0x7b   :  { %v9080_v9 = vld [vmem:[#allocation6] ss:$28 sps:$4 sm:$0xff]  }
  0x7c   :  { %2673 = vmatpush1.bf16.msra.mxu0 %v7971_v11  ;;  %2845 = vmatpush1.bf16.msra.mxu1 %v7973_v12  ;;  %v406_v11 = vld [vmem:[#allocation7 + $0x468] sm:$0xff]  ;;  %v8035_v12 = vcombine.low %v393_v63, %v397_v0  ;;  %v409_v15 = vld [vmem:[#allocation7 + $0x480] sm:$0xff] }
  0x7d   :  { %2674 = vmatprep.subr.bf16.mxu0 %v7980_v13  ;;  %2846 = vmatprep.subr.bf16.mxu1 %v7982_v14  ;;  %v8037_v13 = vcombine.low %v394_v1, %v398_v2  ;;  %v8044_v14 = vcombine.high %v401_v7, %v405_v8  ;;  %v8046_v16 = vcombine.high %v402_v10, %v406_v11  ;;  %v413_v17 = vld [vmem:[#allocation7 + $0x4a0] sm:$0xff]  ;;  %v426_v34 = vld [vmem:[#allocation7 + $0x508] sm:$0xff] }
  0x7e   :  { %v8052_v23 = vcombine.high %v409_v15, %v413_v17  ;;  %v417_v25 = vld [vmem:[#allocation7 + $0x4c0] sm:$0xff]  ;;  %v434_v42 = vld [vmem:[#allocation7 + $0x548] sm:$0xff] }
  0x7f   :  { %v421_v26 = vld [vmem:[#allocation7 + $0x4e0] sm:$0xff]  ;;  %v442_v50 = vld [vmem:[#allocation7 + $0x588] sm:$0xff] }
  0x80   :  { %2675 = vmatpush1.bf16.msra.mxu0 %v7979_v19  ;;  %2847 = vmatpush1.bf16.msra.mxu1 %v7981_v20  ;;  %v410_v19 = vld [vmem:[#allocation7 + $0x488] sm:$0xff]  ;;  %v429_v31 = vld [vmem:[#allocation7 + $0x520] sm:$0xff]  ;;  %v8060_v33 = vcombine.high %v417_v25, %v421_v26 }
  0x81   :  { %2676 = vmatprep.subr.bf16.mxu0 %v7988_v21  ;;  %2848 = vmatprep.subr.bf16.mxu1 %v7990_v22  ;;  %v414_v20 = vld [vmem:[#allocation7 + $0x4a8] sm:$0xff]  ;;  %v8043_v21 = vcombine.low %v401_v7, %v405_v8  ;;  %v8045_v22 = vcombine.low %v402_v10, %v406_v11  ;;  %v437_v39 = vld [vmem:[#allocation7 + $0x560] sm:$0xff] }
  0x82   :  { %v8054_v24 = vcombine.high %v410_v19, %v414_v20  ;;  %v8053_v32 = vcombine.low %v410_v19, %v414_v20  ;;  %v441_v48 = vld [vmem:[#allocation7 + $0x580] sm:$0xff]  ;;  %v450_v58 = vld [vmem:[#allocation7 + $0x5c8] sm:$0xff] }
  0x83   :  { %v445_v49 = vld [vmem:[#allocation7 + $0x5a0] sm:$0xff]  ;;  %v458_v2 = vld [vmem:[#allocation7 + $0x608] sm:$0xff] }
  0x84   :  { %2677 = vmatpush1.bf16.msra.mxu0 %v7987_v27  ;;  %2849 = vmatpush1.bf16.msra.mxu1 %v7989_v28  ;;  %v418_v27 = vld [vmem:[#allocation7 + $0x4c8] sm:$0xff]  ;;  %v8084_v55 = vcombine.high %v441_v48, %v445_v49  ;;  %v449_v56 = vld [vmem:[#allocation7 + $0x5c0] sm:$0xff] }
  0x85   :  { %2678 = vmatprep.subr.bf16.mxu0 %v7996_v29  ;;  %2850 = vmatprep.subr.bf16.mxu1 %v7998_v30  ;;  %v422_v28 = vld [vmem:[#allocation7 + $0x4e8] sm:$0xff]  ;;  %v8051_v29 = vcombine.low %v409_v15, %v413_v17  ;;  %v425_v30 = vld [vmem:[#allocation7 + $0x500] sm:$0xff] }
  0x86   :  { %v8061_v40 = vcombine.low %v418_v27, %v422_v28  ;;  %v8068_v41 = vcombine.high %v425_v30, %v429_v31  ;;  %v453_v57 = vld [vmem:[#allocation7 + $0x5e0] sm:$0xff]  ;;  %v466_v10 = vld [vmem:[#allocation7 + $0x648] sm:$0xff] }
  0x87   :  { %v8092_v63 = vcombine.high %v449_v56, %v453_v57  ;;  %v457_v0 = vld [vmem:[#allocation7 + $0x600] sm:$0xff]  ;;  %v478_v20 = vld [vmem:[#allocation7 + $0x6a8] sm:$0xff] }
  0x88   :  { %2679 = vmatpush1.bf16.msra.mxu0 %v7995_v35  ;;  %2851 = vmatpush1.bf16.msra.mxu1 %v7997_v36  ;;  %v430_v35 = vld [vmem:[#allocation7 + $0x528] sm:$0xff]  ;;  %v8062_v36 = vcombine.high %v418_v27, %v422_v28  ;;  %v461_v1 = vld [vmem:[#allocation7 + $0x620] sm:$0xff] }
  0x89   :  { %2680 = vmatprep.subr.bf16.mxu0 %v8004_v37  ;;  %2852 = vmatprep.subr.bf16.mxu1 %v8006_v38  ;;  %v8059_v37 = vcombine.low %v417_v25, %v421_v26  ;;  %v433_v38 = vld [vmem:[#allocation7 + $0x540] sm:$0xff]  ;;  %v8100_v7 = vcombine.high %v457_v0, %v461_v1  ;;  %v482_v26 = vld [vmem:[#allocation7 + $0x6c8] sm:$0xff] }
  0x8a   :  { %v8076_v47 = vcombine.high %v433_v38, %v437_v39  ;;  %v465_v8 = vld [vmem:[#allocation7 + $0x640] sm:$0xff]  ;;  %v486_v28 = vld [vmem:[#allocation7 + $0x6e8] sm:$0xff] }
  0x8b   :  { %v477_v17 = vld [vmem:[#allocation7 + $0x6a0] sm:$0xff] }
  0x8c   :  { %2681 = vmatpush1.bf16.msra.mxu0 %v8003_v43  ;;  %2853 = vmatpush1.bf16.msra.mxu1 %v8005_v44  ;;  %v438_v43 = vld [vmem:[#allocation7 + $0x568] sm:$0xff]  ;;  %v8070_v44 = vcombine.high %v426_v34, %v430_v35  ;;  %v485_v25 = vld [vmem:[#allocation7 + $0x6e0] sm:$0xff] }
  0x8d   :  { %2682 = vmatprep.subr.bf16.mxu0 %v8012_v45  ;;  %2854 = vmatprep.subr.bf16.mxu1 %v8014_v46  ;;  %v8067_v45 = vcombine.low %v425_v30, %v429_v31  ;;  %v8069_v46 = vcombine.low %v426_v34, %v430_v35  ;;  %v490_v34 = vld [vmem:[#allocation7 + $0x708] sm:$0xff]  ;;  %v8126_v35 = vcombine.high %v482_v26, %v486_v28 }
  0x90   :  { %2683 = vmatpush1.bf16.msra.mxu0 %v8011_v51  ;;  %2855 = vmatpush1.bf16.msra.mxu1 %v8013_v52  ;;  %v8078_v51 = vcombine.high %v434_v42, %v438_v43  ;;  %v446_v52 = vld [vmem:[#allocation7 + $0x5a8] sm:$0xff] }
  0x91   :  { %2684 = vmatprep.subr.bf16.mxu0 %v8020_v53  ;;  %2856 = vmatprep.subr.bf16.mxu1 %v8022_v54  ;;  %v8075_v53 = vcombine.low %v433_v38, %v437_v39  ;;  %v8077_v54 = vcombine.low %v434_v42, %v438_v43  ;;  %v8125_v38 = vcombine.low %v482_v26, %v486_v28  ;;  %v498_v42 = vld [vmem:[#allocation7 + $0x748] sm:$0xff]  ;;  %v549_v28 = vld [vmem:[#allocation7 + $0x8e0] sm:$0xff] }
  0x94   :  { %2685 = vmatpush1.bf16.msra.mxu0 %v8019_v59  ;;  %2857 = vmatpush1.bf16.msra.mxu1 %v8021_v60  ;;  %v8086_v59 = vcombine.high %v442_v50, %v446_v52  ;;  %v454_v60 = vld [vmem:[#allocation7 + $0x5e8] sm:$0xff] }
  0x95   :  { %2686 = vmatprep.subr.bf16.mxu0 %v8028_v61  ;;  %2858 = vmatprep.subr.bf16.mxu1 %v8030_v62  ;;  %v8083_v61 = vcombine.low %v441_v48, %v445_v49  ;;  %v8085_v62 = vcombine.low %v442_v50, %v446_v52  ;;  %v505_v48 = vld [vmem:[#allocation7 + $0x780] sm:$0xff]  ;;  %v506_v50 = vld [vmem:[#allocation7 + $0x788] sm:$0xff] }
  0x96   :  { %v509_v49 = vld [vmem:[#allocation7 + $0x7a0] sm:$0xff]  ;;  %v510_v52 = vld [vmem:[#allocation7 + $0x7a8] sm:$0xff] }
  0x98   :  { %2687 = vmatpush1.bf16.msra.mxu0 %v8027_v3  ;;  %2859 = vmatpush1.bf16.msra.mxu1 %v8029_v4  ;;  %v8094_v3 = vcombine.high %v450_v58, %v454_v60  ;;  %v462_v4 = vld [vmem:[#allocation7 + $0x628] sm:$0xff] }
  0x99   :  { %2699 = vmatprep.subr.bf16.mxu0 %v8036_v5  ;;  %2871 = vmatprep.subr.bf16.mxu1 %v8038_v6  ;;  %v8091_v5 = vcombine.low %v449_v56, %v453_v57  ;;  %v8093_v6 = vcombine.low %v450_v58, %v454_v60  ;;  %v8102_v11 = vcombine.high %v458_v2, %v462_v4  ;;  %v513_v56 = vld [vmem:[#allocation7 + $0x7c0] sm:$0xff]  ;;  %v514_v58 = vld [vmem:[#allocation7 + $0x7c8] sm:$0xff] }
  0x9a   :  { %v517_v57 = vld [vmem:[#allocation7 + $0x7e0] sm:$0xff]  ;;  %v518_v60 = vld [vmem:[#allocation7 + $0x7e8] sm:$0xff] }
  0x9b   :  { %2689 = vmatmul.mubr.bf16.vlgmr.msra.gmra.mrb[0].mxu0 %v9080_v9  ;;  %2861 = vmatmul.mubr.bf16.vlgmr.msra.gmra.mrb[0].mxu1 %v9080_v9  ;;  %v469_v9 = vld [vmem:[#allocation7 + $0x660] sm:$0xff] }
  0x9c   :  { %2700 = vmatpush1.bf16.msra.mxu0 %v8035_v12  ;;  %2872 = vmatpush1.bf16.msra.mxu1 %v8037_v13  ;;  %v470_v12 = vld [vmem:[#allocation7 + $0x668] sm:$0xff]  ;;  %v8099_v13 = vcombine.low %v457_v0, %v461_v1  ;;  %v8108_v15 = vcombine.high %v465_v8, %v469_v9  ;;  %v521_v0 = vld [vmem:[#allocation7 + $0x800] sm:$0xff] }
  0x9d   :  { %2701 = vmatprep.subr.bf16.mxu0 %v8044_v14  ;;  %2873 = vmatprep.subr.bf16.mxu1 %v8046_v16  ;;  %v8101_v14 = vcombine.low %v458_v2, %v462_v4  ;;  %v473_v16 = vld [vmem:[#allocation7 + $0x680] sm:$0xff]  ;;  %v8110_v19 = vcombine.high %v466_v10, %v470_v12  ;;  %v522_v2 = vld [vmem:[#allocation7 + $0x808] sm:$0xff] }
  0x9e   :  { %2731 = vmatprep.mubr.bf16.mxu0 %v9081_v18  ;;  %2903 = vmatprep.mubr.bf16.mxu1 %v9081_v18  ;;  %v474_v18 = vld [vmem:[#allocation7 + $0x688] sm:$0xff]  ;;  %v525_v1 = vld [vmem:[#allocation7 + $0x820] sm:$0xff] }
  0x9f   :  { %v8118_v27 = vcombine.high %v474_v18, %v478_v20  ;;  %v8117_v30 = vcombine.low %v474_v18, %v478_v20  ;;  %v526_v4 = vld [vmem:[#allocation7 + $0x828] sm:$0xff]  ;;  %v541_v18 = vld [vmem:[#allocation7 + $0x8a0] sm:$0xff] }
  0xa0   :  { %2702 = vmatpush1.bf16.msra.mxu0 %v8043_v21  ;;  %2874 = vmatpush1.bf16.msra.mxu1 %v8045_v22  ;;  %v8107_v21 = vcombine.low %v465_v8, %v469_v9  ;;  %v8109_v22 = vcombine.low %v466_v10, %v470_v12  ;;  %v9083_v8 = vld [vmem:[#allocation6 + $0x8] ss:$28 sps:$4 sm:$0xff]   ;;  %v529_v9 = vld [vmem:[#allocation7 + $0x840] sm:$0xff]  ;;  %v8166_v12 = vcombine.high %v522_v2, %v526_v4 }
  0xa1   :  { %2703 = vmatprep.subr.bf16.mxu0 %v8052_v23  ;;  %2875 = vmatprep.subr.bf16.mxu1 %v8054_v24  ;;  %v8116_v23 = vcombine.high %v473_v16, %v477_v17  ;;  %v481_v24 = vld [vmem:[#allocation7 + $0x6c0] sm:$0xff] }
  0xa2   :  { %v8124_v31 = vcombine.high %v481_v24, %v485_v25  ;;  %v533_v10 = vld [vmem:[#allocation7 + $0x860] sm:$0xff] }
  0xa4   :  { %2704 = vmatpush1.bf16.msra.mxu0 %v8051_v29  ;;  %2876 = vmatpush1.bf16.msra.mxu1 %v8053_v32  ;;  %v8115_v29 = vcombine.low %v473_v16, %v477_v17  ;;  %v489_v32 = vld [vmem:[#allocation7 + $0x700] sm:$0xff]  ;;  %v8172_v16 = vcombine.high %v529_v9, %v533_v10 }
  0xa5   :  { %2705 = vmatprep.subr.bf16.mxu0 %v8060_v33  ;;  %2877 = vmatprep.subr.bf16.mxu1 %v8062_v36  ;;  %v493_v33 = vld [vmem:[#allocation7 + $0x720] sm:$0xff]  ;;  %v494_v36 = vld [vmem:[#allocation7 + $0x728] sm:$0xff] }
  0xa6   :  { %v8132_v39 = vcombine.high %v489_v32, %v493_v33  ;;  %v8134_v43 = vcombine.high %v490_v34, %v494_v36  ;;  %v537_v17 = vld [vmem:[#allocation7 + $0x880] sm:$0xff] }
  0xa8   :  { %2706 = vmatpush1.bf16.msra.mxu0 %v8059_v37  ;;  %2878 = vmatpush1.bf16.msra.mxu1 %v8061_v40  ;;  %v8123_v37 = vcombine.low %v481_v24, %v485_v25  ;;  %v497_v40 = vld [vmem:[#allocation7 + $0x740] sm:$0xff]  ;;  %v8180_v25 = vcombine.high %v537_v17, %v541_v18 }
  0xa9   :  { %2707 = vmatprep.subr.bf16.mxu0 %v8068_v41  ;;  %2879 = vmatprep.subr.bf16.mxu1 %v8070_v44  ;;  %v501_v41 = vld [vmem:[#allocation7 + $0x760] sm:$0xff]  ;;  %v502_v44 = vld [vmem:[#allocation7 + $0x768] sm:$0xff] }
  0xac   :  { %2708 = vmatpush1.bf16.msra.mxu0 %v8067_v45  ;;  %2880 = vmatpush1.bf16.msra.mxu1 %v8069_v46  ;;  %v8131_v45 = vcombine.low %v489_v32, %v493_v33  ;;  %v8133_v46 = vcombine.low %v490_v34, %v494_v36  ;;  %v557_v36 = vld [vmem:[#allocation7 + $0x920] sm:$0xff] }
  0xad   :  { %2709 = vmatprep.subr.bf16.mxu0 %v8076_v47  ;;  %2881 = vmatprep.subr.bf16.mxu1 %v8078_v51  ;;  %v8140_v47 = vcombine.high %v497_v40, %v501_v41  ;;  %v8142_v51 = vcombine.high %v498_v42, %v502_v44 }
  0xb0   :  { %2710 = vmatpush1.bf16.msra.mxu0 %v8075_v53  ;;  %2882 = vmatpush1.bf16.msra.mxu1 %v8077_v54  ;;  %v8139_v53 = vcombine.low %v497_v40, %v501_v41  ;;  %v8141_v54 = vcombine.low %v498_v42, %v502_v44  ;;  %v565_v44 = vld [vmem:[#allocation7 + $0x960] sm:$0xff] }
  0xb1   :  { %2711 = vmatprep.subr.bf16.mxu0 %v8084_v55  ;;  %2883 = vmatprep.subr.bf16.mxu1 %v8086_v59  ;;  %v8148_v55 = vcombine.high %v505_v48, %v509_v49  ;;  %v8150_v59 = vcombine.high %v506_v50, %v510_v52 }
  0xb4   :  { %2712 = vmatpush1.bf16.msra.mxu0 %v8083_v61  ;;  %2884 = vmatpush1.bf16.msra.mxu1 %v8085_v62  ;;  %v8147_v61 = vcombine.low %v505_v48, %v509_v49  ;;  %v8149_v62 = vcombine.low %v506_v50, %v510_v52  ;;  %v573_v52 = vld [vmem:[#allocation7 + $0x9a0] sm:$0xff] }
  0xb5   :  { %2713 = vmatprep.subr.bf16.mxu0 %v8092_v63  ;;  %2885 = vmatprep.subr.bf16.mxu1 %v8094_v3  ;;  %v8156_v63 = vcombine.high %v513_v56, %v517_v57  ;;  %v8158_v3 = vcombine.high %v514_v58, %v518_v60 }
  0xb8   :  { %2714 = vmatpush1.bf16.msra.mxu0 %v8091_v5  ;;  %2886 = vmatpush1.bf16.msra.mxu1 %v8093_v6  ;;  %v8155_v5 = vcombine.low %v513_v56, %v517_v57  ;;  %v8157_v6 = vcombine.low %v514_v58, %v518_v60  ;;  %v581_v60 = vld [vmem:[#allocation7 + $0x9e0] sm:$0xff] }
  0xb9   :  { %2715 = vmatprep.subr.bf16.mxu0 %v8100_v7  ;;  %2887 = vmatprep.subr.bf16.mxu1 %v8102_v11  ;;  %v8164_v7 = vcombine.high %v521_v0, %v525_v1  ;;  %v530_v11 = vld [vmem:[#allocation7 + $0x848] sm:$0xff] }
  0xbc   :  { %2716 = vmatpush1.bf16.msra.mxu0 %v8099_v13  ;;  %2888 = vmatpush1.bf16.msra.mxu1 %v8101_v14  ;;  %v534_v13 = vld [vmem:[#allocation7 + $0x868] sm:$0xff]  ;;  %v8163_v14 = vcombine.low %v521_v0, %v525_v1 }
  0xbd   :  { %2717 = vmatprep.subr.bf16.mxu0 %v8108_v15  ;;  %2889 = vmatprep.subr.bf16.mxu1 %v8110_v19  ;;  %v8165_v15 = vcombine.low %v522_v2, %v526_v4  ;;  %v538_v19 = vld [vmem:[#allocation7 + $0x888] sm:$0xff]  ;;  %v8174_v20 = vcombine.high %v530_v11, %v534_v13  ;;  %v8173_v24 = vcombine.low %v530_v11, %v534_v13  ;;  %v589_v4 = vld [vmem:[#allocation7 + $0xa20] sm:$0xff] }
  0xbe   :  { %v593_v11 = vld [vmem:[#allocation7 + $0xa40] sm:$0xff]  ;;  %v594_v13 = vld [vmem:[#allocation7 + $0xa48] sm:$0xff] }
  0xc0   :  { %2718 = vmatpush1.bf16.msra.mxu0 %v8107_v21  ;;  %2890 = vmatpush1.bf16.msra.mxu1 %v8109_v22  ;;  %v9084_v21 = vld [vmem:[#allocation6 + $0x14] ss:$28 sps:$4 sm:$0xff]   ;;  %v542_v22 = vld [vmem:[#allocation7 + $0x8a8] sm:$0xff] }
  0xc1   :  { %2719 = vmatprep.subr.bf16.mxu0 %v8116_v23  ;;  %2891 = vmatprep.subr.bf16.mxu1 %v8118_v27  ;;  %v8171_v23 = vcombine.low %v529_v9, %v533_v10  ;;  %v8182_v26 = vcombine.high %v538_v19, %v542_v22  ;;  %v545_v27 = vld [vmem:[#allocation7 + $0x8c0] sm:$0xff]  ;;  %v8181_v32 = vcombine.low %v538_v19, %v542_v22  ;;  %v606_v22 = vld [vmem:[#allocation7 + $0xaa8] sm:$0xff] }
  0xc2   :  { %v8188_v33 = vcombine.high %v545_v27, %v549_v28  ;;  %v601_v19 = vld [vmem:[#allocation7 + $0xa80] sm:$0xff] }
  0xc4   :  { %2720 = vmatpush1.bf16.msra.mxu0 %v8115_v29  ;;  %2892 = vmatpush1.bf16.msra.mxu1 %v8117_v30  ;;  %v546_v29 = vld [vmem:[#allocation7 + $0x8c8] sm:$0xff] }
  0xc5   :  { %2721 = vmatprep.subr.bf16.mxu0 %v8124_v31  ;;  %2893 = vmatprep.subr.bf16.mxu1 %v8126_v35  ;;  %v550_v30 = vld [vmem:[#allocation7 + $0x8e8] sm:$0xff]  ;;  %v8179_v31 = vcombine.low %v537_v17, %v541_v18  ;;  %v553_v35 = vld [vmem:[#allocation7 + $0x900] sm:$0xff] }
  0xc6   :  { %v8190_v34 = vcombine.high %v546_v29, %v550_v30  ;;  %v8189_v40 = vcombine.low %v546_v29, %v550_v30  ;;  %v8196_v41 = vcombine.high %v553_v35, %v557_v36  ;;  %v610_v29 = vld [vmem:[#allocation7 + $0xac8] sm:$0xff] }
  0xc7   :  { %v614_v30 = vld [vmem:[#allocation7 + $0xae8] sm:$0xff] }
  0xc8   :  { %2722 = vmatpush1.bf16.msra.mxu0 %v8123_v37  ;;  %2894 = vmatpush1.bf16.msra.mxu1 %v8125_v38  ;;  %v554_v37 = vld [vmem:[#allocation7 + $0x908] sm:$0xff] }
  0xc9   :  { %2723 = vmatprep.subr.bf16.mxu0 %v8132_v39  ;;  %2895 = vmatprep.subr.bf16.mxu1 %v8134_v43  ;;  %v558_v38 = vld [vmem:[#allocation7 + $0x928] sm:$0xff]  ;;  %v8187_v39 = vcombine.low %v545_v27, %v549_v28  ;;  %v561_v43 = vld [vmem:[#allocation7 + $0x940] sm:$0xff] }
  0xca   :  { %v8198_v42 = vcombine.high %v554_v37, %v558_v38  ;;  %v8197_v48 = vcombine.low %v554_v37, %v558_v38  ;;  %v8204_v49 = vcombine.high %v561_v43, %v565_v44  ;;  %v609_v27 = vld [vmem:[#allocation7 + $0xac0] sm:$0xff]  ;;  %v618_v37 = vld [vmem:[#allocation7 + $0xb08] sm:$0xff] }
  0xcb   :  { %v613_v28 = vld [vmem:[#allocation7 + $0xae0] sm:$0xff]  ;;  %v622_v38 = vld [vmem:[#allocation7 + $0xb28] sm:$0xff] }
  0xcc   :  { %2724 = vmatpush1.bf16.msra.mxu0 %v8131_v45  ;;  %2896 = vmatpush1.bf16.msra.mxu1 %v8133_v46  ;;  %v562_v45 = vld [vmem:[#allocation7 + $0x948] sm:$0xff] }
  0xcd   :  { %2725 = vmatprep.subr.bf16.mxu0 %v8140_v47  ;;  %2897 = vmatprep.subr.bf16.mxu1 %v8142_v51  ;;  %v566_v46 = vld [vmem:[#allocation7 + $0x968] sm:$0xff]  ;;  %v8195_v47 = vcombine.low %v553_v35, %v557_v36  ;;  %v569_v51 = vld [vmem:[#allocation7 + $0x980] sm:$0xff] }
  0xce   :  { %v8206_v50 = vcombine.high %v562_v45, %v566_v46  ;;  %v8205_v56 = vcombine.low %v562_v45, %v566_v46  ;;  %v8212_v57 = vcombine.high %v569_v51, %v573_v52  ;;  %v617_v35 = vld [vmem:[#allocation7 + $0xb00] sm:$0xff]  ;;  %v626_v45 = vld [vmem:[#allocation7 + $0xb48] sm:$0xff] }
  0xcf   :  { %v621_v36 = vld [vmem:[#allocation7 + $0xb20] sm:$0xff]  ;;  %v630_v46 = vld [vmem:[#allocation7 + $0xb68] sm:$0xff] }
  0xd0   :  { %2726 = vmatpush1.bf16.msra.mxu0 %v8139_v53  ;;  %2898 = vmatpush1.bf16.msra.mxu1 %v8141_v54  ;;  %v570_v53 = vld [vmem:[#allocation7 + $0x988] sm:$0xff] }
  0xd1   :  { %2727 = vmatprep.subr.bf16.mxu0 %v8148_v55  ;;  %2899 = vmatprep.subr.bf16.mxu1 %v8150_v59  ;;  %v574_v54 = vld [vmem:[#allocation7 + $0x9a8] sm:$0xff]  ;;  %v8203_v55 = vcombine.low %v561_v43, %v565_v44  ;;  %v577_v59 = vld [vmem:[#allocation7 + $0x9c0] sm:$0xff] }
  0xd2   :  { %v8214_v58 = vcombine.high %v570_v53, %v574_v54  ;;  %v8213_v0 = vcombine.low %v570_v53, %v574_v54  ;;  %v8220_v1 = vcombine.high %v577_v59, %v581_v60  ;;  %v625_v43 = vld [vmem:[#allocation7 + $0xb40] sm:$0xff]  ;;  %v634_v53 = vld [vmem:[#allocation7 + $0xb88] sm:$0xff] }
  0xd3   :  { %v629_v44 = vld [vmem:[#allocation7 + $0xb60] sm:$0xff]  ;;  %v638_v54 = vld [vmem:[#allocation7 + $0xba8] sm:$0xff] }
  0xd4   :  { %2728 = vmatpush1.bf16.msra.mxu0 %v8147_v61  ;;  %2900 = vmatpush1.bf16.msra.mxu1 %v8149_v62  ;;  %v578_v61 = vld [vmem:[#allocation7 + $0x9c8] sm:$0xff] }
  0xd5   :  { %2729 = vmatprep.subr.bf16.mxu0 %v8156_v63  ;;  %2901 = vmatprep.subr.bf16.mxu1 %v8158_v3  ;;  %v582_v62 = vld [vmem:[#allocation7 + $0x9e8] sm:$0xff]  ;;  %v8211_v63 = vcombine.low %v569_v51, %v573_v52  ;;  %v585_v3 = vld [vmem:[#allocation7 + $0xa00] sm:$0xff] }
  0xd6   :  { %v8222_v2 = vcombine.high %v578_v61, %v582_v62  ;;  %v8228_v9 = vcombine.high %v585_v3, %v589_v4  ;;  %v633_v51 = vld [vmem:[#allocation7 + $0xb80] sm:$0xff] }
  0xd7   :  { %v637_v52 = vld [vmem:[#allocation7 + $0xba0] sm:$0xff] }
  0xd8   :  { %2730 = vmatpush1.bf16.msra.mxu0 %v8155_v5  ;;  %2902 = vmatpush1.bf16.msra.mxu1 %v8157_v6  ;;  %v586_v5 = vld [vmem:[#allocation7 + $0xa08] sm:$0xff] }
  0xd9   :  { %2742 = vmatprep.subr.bf16.mxu0 %v8164_v7  ;;  %2914 = vmatprep.subr.bf16.mxu1 %v8166_v12  ;;  %v590_v6 = vld [vmem:[#allocation7 + $0xa28] sm:$0xff]  ;;  %v8219_v7 = vcombine.low %v577_v59, %v581_v60  ;;  %v597_v12 = vld [vmem:[#allocation7 + $0xa60] sm:$0xff] }
  0xda   :  { %v8230_v10 = vcombine.high %v586_v5, %v590_v6  ;;  %v8236_v17 = vcombine.high %v593_v11, %v597_v12  ;;  %v641_v59 = vld [vmem:[#allocation7 + $0xbc0] sm:$0xff] }
  0xdb   :  { %2732 = vmatmul.mubr.bf16.vlgmr.msra.gmra.mrb[0].mxu0 %v9083_v8  ;;  %2904 = vmatmul.mubr.bf16.vlgmr.msra.gmra.mrb[0].mxu1 %v9083_v8  ;;  %v8221_v8 = vcombine.low %v578_v61, %v582_v62  ;;  %v645_v60 = vld [vmem:[#allocation7 + $0xbe0] sm:$0xff]  ;;  %v642_v61 = vld [vmem:[#allocation7 + $0xbc8] sm:$0xff] }
  0xdc   :  { %2743 = vmatpush1.bf16.msra.mxu0 %v8163_v14  ;;  %2915 = vmatpush1.bf16.msra.mxu1 %v8165_v15  ;;  %v598_v14 = vld [vmem:[#allocation7 + $0xa68] sm:$0xff]  ;;  %v8227_v15 = vcombine.low %v585_v3, %v589_v4  ;;  %v649_v3 = vld [vmem:[#allocation7 + $0xc00] sm:$0xff] }
  0xdd   :  { %2744 = vmatprep.subr.bf16.mxu0 %v8172_v16  ;;  %2916 = vmatprep.subr.bf16.mxu1 %v8174_v20  ;;  %v8229_v16 = vcombine.low %v586_v5, %v590_v6  ;;  %v8238_v18 = vcombine.high %v594_v13, %v598_v14  ;;  %v605_v20 = vld [vmem:[#allocation7 + $0xaa0] sm:$0xff]  ;;  %v646_v62 = vld [vmem:[#allocation7 + $0xbe8] sm:$0xff] }
  0xde   :  { %2774 = vmatprep.mubr.bf16.mxu0 %v9084_v21  ;;  %2946 = vmatprep.mubr.bf16.mxu1 %v9084_v21  ;;  %v602_v21 = vld [vmem:[#allocation7 + $0xa88] sm:$0xff]  ;;  %v653_v4 = vld [vmem:[#allocation7 + $0xc20] sm:$0xff] }
  0xdf   :  { %v650_v5 = vld [vmem:[#allocation7 + $0xc08] sm:$0xff] }
  0xe0   :  { %2745 = vmatpush1.bf16.msra.mxu0 %v8171_v23  ;;  %2917 = vmatpush1.bf16.msra.mxu1 %v8173_v24  ;;  %v8235_v23 = vcombine.low %v593_v11, %v597_v12  ;;  %v8237_v24 = vcombine.low %v594_v13, %v598_v14  ;;  %v654_v6 = vld [vmem:[#allocation7 + $0xc28] sm:$0xff]  ;;  %v9086_v11 = vld [vmem:[#allocation6 + $0x10] ss:$28 sps:$4 sm:$0xff]   ;;  %v8291_v14 = vcombine.low %v649_v3, %v653_v4 }
  0xe1   :  { %2746 = vmatprep.subr.bf16.mxu0 %v8180_v25  ;;  %2918 = vmatprep.subr.bf16.mxu1 %v8182_v26  ;;  %v8244_v25 = vcombine.high %v601_v19, %v605_v20  ;;  %v8246_v26 = vcombine.high %v602_v21, %v606_v22  ;;  %v267_v12 = vld [vmem:[#allocation7 + $0x10] sm:$0xff] }
  0xe2   :  { %v271_v13 = vld [vmem:[#allocation7 + $0x30] sm:$0xff] }
  0xe4   :  { %2747 = vmatpush1.bf16.msra.mxu0 %v8179_v31  ;;  %2919 = vmatpush1.bf16.msra.mxu1 %v8181_v32  ;;  %v8243_v31 = vcombine.low %v601_v19, %v605_v20  ;;  %v8245_v32 = vcombine.low %v602_v21, %v606_v22  ;;  %v9364_v20 = vmov 0   ;;  %v275_v21 = vld [vmem:[#allocation7 + $0x50] sm:$0xff] }
  0xe5   :  { %2748 = vmatprep.subr.bf16.mxu0 %v8188_v33  ;;  %2920 = vmatprep.subr.bf16.mxu1 %v8190_v34  ;;  %v8252_v33 = vcombine.high %v609_v27, %v613_v28  ;;  %v8254_v34 = vcombine.high %v610_v29, %v614_v30  ;;  %v279_v22 = vld [vmem:[#allocation7 + $0x70] sm:$0xff] }
  0xe8   :  { %2749 = vmatpush1.bf16.msra.mxu0 %v8187_v39  ;;  %2921 = vmatpush1.bf16.msra.mxu1 %v8189_v40  ;;  %v8251_v39 = vcombine.low %v609_v27, %v613_v28  ;;  %v8253_v40 = vcombine.low %v610_v29, %v614_v30  ;;  %v7920_v28 = vcombine.high %v275_v21, %v279_v22  ;;  %v283_v30 = vld [vmem:[#allocation7 + $0x90] sm:$0xff] }
  0xe9   :  { %2750 = vmatprep.subr.bf16.mxu0 %v8196_v41  ;;  %2922 = vmatprep.subr.bf16.mxu1 %v8198_v42  ;;  %v8260_v41 = vcombine.high %v617_v35, %v621_v36  ;;  %v8262_v42 = vcombine.high %v618_v37, %v622_v38 }
  0xec   :  { %2751 = vmatpush1.bf16.msra.mxu0 %v8195_v47  ;;  %2923 = vmatpush1.bf16.msra.mxu1 %v8197_v48  ;;  %v8259_v47 = vcombine.low %v617_v35, %v621_v36  ;;  %v8261_v48 = vcombine.low %v618_v37, %v622_v38  ;;  %v291_v38 = vld [vmem:[#allocation7 + $0xd0] sm:$0xff] }
  0xed   :  { %2752 = vmatprep.subr.bf16.mxu0 %v8204_v49  ;;  %2924 = vmatprep.subr.bf16.mxu1 %v8206_v50  ;;  %v8268_v49 = vcombine.high %v625_v43, %v629_v44  ;;  %v8270_v50 = vcombine.high %v626_v45, %v630_v46 }
  0xf0   :  { %2753 = vmatpush1.bf16.msra.mxu0 %v8203_v55  ;;  %2925 = vmatpush1.bf16.msra.mxu1 %v8205_v56  ;;  %v8267_v55 = vcombine.low %v625_v43, %v629_v44  ;;  %v8269_v56 = vcombine.low %v626_v45, %v630_v46 }
  0xf1   :  { %2754 = vmatprep.subr.bf16.mxu0 %v8212_v57  ;;  %2926 = vmatprep.subr.bf16.mxu1 %v8214_v58  ;;  %v8276_v57 = vcombine.high %v633_v51, %v637_v52  ;;  %v8278_v58 = vcombine.high %v634_v53, %v638_v54 }
  0xf4   :  { %2755 = vmatpush1.bf16.msra.mxu0 %v8211_v63  ;;  %2927 = vmatpush1.bf16.msra.mxu1 %v8213_v0  ;;  %v8275_v63 = vcombine.low %v633_v51, %v637_v52  ;;  %v8277_v0 = vcombine.low %v634_v53, %v638_v54 }
  0xf5   :  { %2756 = vmatprep.subr.bf16.mxu0 %v8220_v1  ;;  %2928 = vmatprep.subr.bf16.mxu1 %v8222_v2  ;;  %v8284_v1 = vcombine.high %v641_v59, %v645_v60  ;;  %v8286_v2 = vcombine.high %v642_v61, %v646_v62 }
  0xf8   :  { %2757 = vmatpush1.bf16.msra.mxu0 %v8219_v7  ;;  %2929 = vmatpush1.bf16.msra.mxu1 %v8221_v8  ;;  %v8283_v7 = vcombine.low %v641_v59, %v645_v60  ;;  %v8285_v8 = vcombine.low %v642_v61, %v646_v62 }
  0xf9   :  { %2758 = vmatprep.subr.bf16.mxu0 %v8228_v9  ;;  %2930 = vmatprep.subr.bf16.mxu1 %v8230_v10  ;;  %v8292_v9 = vcombine.high %v649_v3, %v653_v4  ;;  %v8294_v10 = vcombine.high %v650_v5, %v654_v6 }
  0xfc   :  { %2759 = vmatpush1.bf16.msra.mxu0 %v8227_v15  ;;  %2931 = vmatpush1.bf16.msra.mxu1 %v8229_v16  ;;  %v268_v15 = vld [vmem:[#allocation7 + $0x18] sm:$0xff] }
  0xfd   :  { %2760 = vmatprep.subr.bf16.mxu0 %v8236_v17  ;;  %2932 = vmatprep.subr.bf16.mxu1 %v8238_v18  ;;  %v272_v16 = vld [vmem:[#allocation7 + $0x38] sm:$0xff]  ;;  %v8293_v17 = vcombine.low %v650_v5, %v654_v6  ;;  %v7912_v18 = vcombine.high %v267_v12, %v271_v13 }
  0xfe   :  { %v7914_v19 = vcombine.high %v268_v15, %v272_v16  ;;  %v7913_v27 = vcombine.low %v268_v15, %v272_v16  ;;  %v331_v15 = vld [vmem:[#allocation7 + $0x210] sm:$0xff] }
  0xff   :  { %v335_v16 = vld [vmem:[#allocation7 + $0x230] sm:$0xff] }
 0x100   :  { %2761 = vmatpush1.bf16.msra.mxu0 %v8235_v23  ;;  %2933 = vmatpush1.bf16.msra.mxu1 %v8237_v24  ;;  %v9087_v23 = vld [vmem:[#allocation6 + $0x18] ss:$28 sps:$4 sm:$0xff]  }
 0x101   :  { %2762 = vmatprep.subr.bf16.mxu0 %v8244_v25  ;;  %2934 = vmatprep.subr.bf16.mxu1 %v8246_v26  ;;  %v276_v24 = vld [vmem:[#allocation7 + $0x58] sm:$0xff]  ;;  %v7911_v26 = vcombine.low %v267_v12, %v271_v13 }
 0x102   :  { %v280_v25 = vld [vmem:[#allocation7 + $0x78] sm:$0xff] }
 0x103   :  { %v7922_v29 = vcombine.high %v276_v24, %v280_v25  ;;  %v7921_v35 = vcombine.low %v276_v24, %v280_v25  ;;  %v339_v24 = vld [vmem:[#allocation7 + $0x250] sm:$0xff] }
 0x104   :  { %2763 = vmatpush1.bf16.msra.mxu0 %v8243_v31  ;;  %2935 = vmatpush1.bf16.msra.mxu1 %v8245_v32  ;;  %v287_v31 = vld [vmem:[#allocation7 + $0xb0] sm:$0xff]  ;;  %v284_v32 = vld [vmem:[#allocation7 + $0x98] sm:$0xff] }
 0x105   :  { %2764 = vmatprep.subr.bf16.mxu0 %v8252_v33  ;;  %2936 = vmatprep.subr.bf16.mxu1 %v8254_v34  ;;  %v288_v33 = vld [vmem:[#allocation7 + $0xb8] sm:$0xff]  ;;  %v7919_v34 = vcombine.low %v275_v21, %v279_v22  ;;  %v7928_v36 = vcombine.high %v283_v30, %v287_v31  ;;  %v7927_v43 = vcombine.low %v283_v30, %v287_v31  ;;  %v343_v25 = vld [vmem:[#allocation7 + $0x270] sm:$0xff] }
 0x106   :  { %v7930_v37 = vcombine.high %v284_v32, %v288_v33  ;;  %v7929_v44 = vcombine.low %v284_v32, %v288_v33  ;;  %v7976_v22 = vcombine.high %v331_v15, %v335_v16  ;;  %v7984_v30 = vcombine.high %v339_v24, %v343_v25  ;;  %v347_v32 = vld [vmem:[#allocation7 + $0x290] sm:$0xff] }
 0x107   :  { %v351_v33 = vld [vmem:[#allocation7 + $0x2b0] sm:$0xff] }
 0x108   :  { %2765 = vmatpush1.bf16.msra.mxu0 %v8251_v39  ;;  %2937 = vmatpush1.bf16.msra.mxu1 %v8253_v40  ;;  %v295_v39 = vld [vmem:[#allocation7 + $0xf0] sm:$0xff]  ;;  %v9216_v40 = vld [vmem:[#allocation6 + $0x4] ss:$28 sps:$4 sm:$0xff]  }
 0x109   :  { %2766 = vmatprep.subr.bf16.mxu0 %v8260_v41  ;;  %2938 = vmatprep.subr.bf16.mxu1 %v8262_v42  ;;  %v292_v41 = vld [vmem:[#allocation7 + $0xd8] sm:$0xff]  ;;  %v7936_v45 = vcombine.high %v291_v38, %v295_v39  ;;  %v7935_v51 = vcombine.low %v291_v38, %v295_v39  ;;  %v7992_v38 = vcombine.high %v347_v32, %v351_v33 }
 0x10a   :  { %v296_v42 = vld [vmem:[#allocation7 + $0xf8] sm:$0xff] }
 0x10b   :  { %v7938_v46 = vcombine.high %v292_v41, %v296_v42  ;;  %v7937_v52 = vcombine.low %v292_v41, %v296_v42  ;;  %v359_v41 = vld [vmem:[#allocation7 + $0x2f0] sm:$0xff]  ;;  %v356_v42 = vld [vmem:[#allocation7 + $0x2d8] sm:$0xff] }
 0x10c   :  { %2767 = vmatpush1.bf16.msra.mxu0 %v8259_v47  ;;  %2939 = vmatpush1.bf16.msra.mxu1 %v8261_v48  ;;  %v299_v47 = vld [vmem:[#allocation7 + $0x110] sm:$0xff] }
 0x10d   :  { %2768 = vmatprep.subr.bf16.mxu0 %v8268_v49  ;;  %2940 = vmatprep.subr.bf16.mxu1 %v8270_v50  ;;  %v303_v48 = vld [vmem:[#allocation7 + $0x130] sm:$0xff]  ;;  %v300_v49 = vld [vmem:[#allocation7 + $0x118] sm:$0xff] }
 0x10e   :  { %v304_v50 = vld [vmem:[#allocation7 + $0x138] sm:$0xff]  ;;  %v7944_v53 = vcombine.high %v299_v47, %v303_v48  ;;  %v7943_v59 = vcombine.low %v299_v47, %v303_v48  ;;  %v363_v48 = vld [vmem:[#allocation7 + $0x310] sm:$0xff] }
 0x10f   :  { %v7946_v54 = vcombine.high %v300_v49, %v304_v50  ;;  %v7945_v60 = vcombine.low %v300_v49, %v304_v50  ;;  %v367_v49 = vld [vmem:[#allocation7 + $0x330] sm:$0xff]  ;;  %v364_v50 = vld [vmem:[#allocation7 + $0x318] sm:$0xff] }
 0x110   :  { %2769 = vmatpush1.bf16.msra.mxu0 %v8267_v55  ;;  %2941 = vmatpush1.bf16.msra.mxu1 %v8269_v56  ;;  %v307_v55 = vld [vmem:[#allocation7 + $0x150] sm:$0xff] }
 0x111   :  { %2770 = vmatprep.subr.bf16.mxu0 %v8276_v57  ;;  %2942 = vmatprep.subr.bf16.mxu1 %v8278_v58  ;;  %v311_v56 = vld [vmem:[#allocation7 + $0x170] sm:$0xff]  ;;  %v308_v57 = vld [vmem:[#allocation7 + $0x158] sm:$0xff] }
 0x112   :  { %v312_v58 = vld [vmem:[#allocation7 + $0x178] sm:$0xff]  ;;  %v7952_v61 = vcombine.high %v307_v55, %v311_v56  ;;  %v7951_v3 = vcombine.low %v307_v55, %v311_v56  ;;  %v371_v56 = vld [vmem:[#allocation7 + $0x350] sm:$0xff] }
 0x113   :  { %v7954_v62 = vcombine.high %v308_v57, %v312_v58  ;;  %v7953_v4 = vcombine.low %v308_v57, %v312_v58  ;;  %v375_v57 = vld [vmem:[#allocation7 + $0x370] sm:$0xff]  ;;  %v372_v58 = vld [vmem:[#allocation7 + $0x358] sm:$0xff] }
 0x114   :  { %2771 = vmatpush1.bf16.msra.mxu0 %v8275_v63  ;;  %2943 = vmatpush1.bf16.msra.mxu1 %v8277_v0  ;;  %v315_v63 = vld [vmem:[#allocation7 + $0x190] sm:$0xff] }
 0x115   :  { %2772 = vmatprep.subr.bf16.mxu0 %v8284_v1  ;;  %2944 = vmatprep.subr.bf16.mxu1 %v8286_v2  ;;  %v319_v0 = vld [vmem:[#allocation7 + $0x1b0] sm:$0xff]  ;;  %v316_v1 = vld [vmem:[#allocation7 + $0x198] sm:$0xff] }
 0x116   :  { %v320_v2 = vld [vmem:[#allocation7 + $0x1b8] sm:$0xff]  ;;  %v7960_v5 = vcombine.high %v315_v63, %v319_v0 }
 0x117   :  { %v7962_v6 = vcombine.high %v316_v1, %v320_v2  ;;  %v7961_v12 = vcombine.low %v316_v1, %v320_v2  ;;  %v383_v1 = vld [vmem:[#allocation7 + $0x3b0] sm:$0xff]  ;;  %v380_v2 = vld [vmem:[#allocation7 + $0x398] sm:$0xff] }
 0x118   :  { %2773 = vmatpush1.bf16.msra.mxu0 %v8283_v7  ;;  %2945 = vmatpush1.bf16.msra.mxu1 %v8285_v8  ;;  %v323_v7 = vld [vmem:[#allocation7 + $0x1d0] sm:$0xff] }
 0x119   :  { %2785 = vmatprep.subr.bf16.mxu0 %v8292_v9  ;;  %2957 = vmatprep.subr.bf16.mxu1 %v8294_v10  ;;  %v327_v8 = vld [vmem:[#allocation7 + $0x1f0] sm:$0xff]  ;;  %v324_v9 = vld [vmem:[#allocation7 + $0x1d8] sm:$0xff] }
 0x11a   :  { %v328_v10 = vld [vmem:[#allocation7 + $0x1f8] sm:$0xff]  ;;  %v7968_v13 = vcombine.high %v323_v7, %v327_v8 }
 0x11b   :  { %2775 = vmatmul.mubr.bf16.vlgmr.msra.gmra.mrb[0].mxu0 %v9086_v11  ;;  %2947 = vmatmul.mubr.bf16.vlgmr.msra.gmra.mrb[0].mxu1 %v9086_v11  ;;  %v7959_v11 = vcombine.low %v315_v63, %v319_v0  ;;  %v7969_v21 = vcombine.low %v324_v9, %v328_v10  ;;  %v379_v0 = vld [vmem:[#allocation7 + $0x390] sm:$0xff] }
 0x11c   :  { %2786 = vmatpush1.bf16.msra.mxu0 %v8291_v14  ;;  %2958 = vmatpush1.bf16.msra.mxu1 %v8293_v17  ;;  %v7970_v14 = vcombine.high %v324_v9, %v328_v10  ;;  %v332_v17 = vld [vmem:[#allocation7 + $0x218] sm:$0xff]  ;;  %v391_v9 = vld [vmem:[#allocation7 + $0x3f0] sm:$0xff] }
 0x11d   :  { %2817 = vmatprep.mubr.bf16.mxu0 %v9364_v20  ;;  %2989 = vmatprep.mubr.bf16.mxu1 %v9364_v20  ;;  %v388_v10 = vld [vmem:[#allocation7 + $0x3d8] sm:$0xff] }
 0x11e   :  { %3000 = vmatprep.subr.bf16.mxu0 %v7912_v18  ;;  %3172 = vmatprep.subr.bf16.mxu1 %v7914_v19  ;;  %v336_v18 = vld [vmem:[#allocation7 + $0x238] sm:$0xff]  ;;  %v7967_v19 = vcombine.low %v323_v7, %v327_v8  ;;  %v387_v8 = vld [vmem:[#allocation7 + $0x3d0] sm:$0xff] }
 0x127   :  { %8299 = vmatmul.mubr.msk.bf16.vlgmr.msra.gmra.mrb[0].mxu0 %vm2652_vm0, %v9087_v23  ;;  %8300 = vmatmul.mubr.msk.bf16.vlgmr.msra.gmra.mrb[0].mxu1 %vm2652_vm0, %v9087_v23  ;;  %v7978_v23 = vcombine.high %v332_v17, %v336_v18 }
 0x128   :  { %3001 = vmatpush1.bf16.msra.mxu0 %v7911_v26  ;;  %3173 = vmatpush1.bf16.msra.mxu1 %v7913_v27  ;;  %v340_v26 = vld [vmem:[#allocation7 + $0x258] sm:$0xff] }
 0x129   :  { %3002 = vmatprep.subr.bf16.mxu0 %v7920_v28  ;;  %3174 = vmatprep.subr.bf16.mxu1 %v7922_v29  ;;  %v344_v27 = vld [vmem:[#allocation7 + $0x278] sm:$0xff]  ;;  %v7975_v28 = vcombine.low %v331_v15, %v335_v16  ;;  %v7977_v29 = vcombine.low %v332_v17, %v336_v18  ;;  %v395_v16 = vld [vmem:[#allocation7 + $0x410] sm:$0xff] }
 0x12a   :  { %3032 = vmatprep.mubr.bf16.mxu0 %v9216_v40  ;;  %3204 = vmatprep.mubr.bf16.mxu1 %v9216_v40  ;;  %v7986_v31 = vcombine.high %v340_v26, %v344_v27  ;;  %v355_v40 = vld [vmem:[#allocation7 + $0x2d0] sm:$0xff]  ;;  %v396_v18 = vld [vmem:[#allocation7 + $0x418] sm:$0xff] }
 0x12b   :  { %v399_v17 = vld [vmem:[#allocation7 + $0x430] sm:$0xff] }
 0x12c   :  { %3003 = vmatpush1.bf16.msra.mxu0 %v7919_v34  ;;  %3175 = vmatpush1.bf16.msra.mxu1 %v7921_v35  ;;  %v348_v34 = vld [vmem:[#allocation7 + $0x298] sm:$0xff] }
 0x12d   :  { %3004 = vmatprep.subr.bf16.mxu0 %v7928_v36  ;;  %3176 = vmatprep.subr.bf16.mxu1 %v7930_v37  ;;  %v352_v35 = vld [vmem:[#allocation7 + $0x2b8] sm:$0xff]  ;;  %v7983_v36 = vcombine.low %v339_v24, %v343_v25  ;;  %v7985_v37 = vcombine.low %v340_v26, %v344_v27  ;;  %v403_v25 = vld [vmem:[#allocation7 + $0x450] sm:$0xff] }
 0x12e   :  { %v7994_v39 = vcombine.high %v348_v34, %v352_v35  ;;  %v407_v26 = vld [vmem:[#allocation7 + $0x470] sm:$0xff]  ;;  %v404_v27 = vld [vmem:[#allocation7 + $0x458] sm:$0xff] }
 0x130   :  { %3005 = vmatpush1.bf16.msra.mxu0 %v7927_v43  ;;  %3177 = vmatpush1.bf16.msra.mxu1 %v7929_v44  ;;  %v360_v43 = vld [vmem:[#allocation7 + $0x2f8] sm:$0xff]  ;;  %v7991_v44 = vcombine.low %v347_v32, %v351_v33  ;;  %v411_v33 = vld [vmem:[#allocation7 + $0x490] sm:$0xff] }
 0x131   :  { %3006 = vmatprep.subr.bf16.mxu0 %v7936_v45  ;;  %3178 = vmatprep.subr.bf16.mxu1 %v7938_v46  ;;  %v7993_v45 = vcombine.low %v348_v34, %v352_v35  ;;  %v8000_v46 = vcombine.high %v355_v40, %v359_v41  ;;  %v8002_v47 = vcombine.high %v356_v42, %v360_v43  ;;  %v415_v34 = vld [vmem:[#allocation7 + $0x4b0] sm:$0xff]  ;;  %v9217_v35 = vld [vmem:[#allocation6] ss:$28 sps:$4 sm:$0xff]  }
 0x134   :  { %3007 = vmatpush1.bf16.msra.mxu0 %v7935_v51  ;;  %3179 = vmatpush1.bf16.msra.mxu1 %v7937_v52  ;;  %v368_v51 = vld [vmem:[#allocation7 + $0x338] sm:$0xff]  ;;  %v7999_v52 = vcombine.low %v355_v40, %v359_v41  ;;  %v8056_v40 = vcombine.high %v411_v33, %v415_v34 }
 0x135   :  { %3008 = vmatprep.subr.bf16.mxu0 %v7944_v53  ;;  %3180 = vmatprep.subr.bf16.mxu1 %v7946_v54  ;;  %v8001_v53 = vcombine.low %v356_v42, %v360_v43  ;;  %v8008_v54 = vcombine.high %v363_v48, %v367_v49  ;;  %v8010_v55 = vcombine.high %v364_v50, %v368_v51  ;;  %v419_v42 = vld [vmem:[#allocation7 + $0x4d0] sm:$0xff] }
 0x136   :  { %v423_v43 = vld [vmem:[#allocation7 + $0x4f0] sm:$0xff] }
 0x138   :  { %3009 = vmatpush1.bf16.msra.mxu0 %v7943_v59  ;;  %3181 = vmatpush1.bf16.msra.mxu1 %v7945_v60  ;;  %v376_v59 = vld [vmem:[#allocation7 + $0x378] sm:$0xff]  ;;  %v8007_v60 = vcombine.low %v363_v48, %v367_v49  ;;  %v8064_v49 = vcombine.high %v419_v42, %v423_v43 }
 0x139   :  { %3010 = vmatprep.subr.bf16.mxu0 %v7952_v61  ;;  %3182 = vmatprep.subr.bf16.mxu1 %v7954_v62  ;;  %v8009_v61 = vcombine.low %v364_v50, %v368_v51  ;;  %v8016_v62 = vcombine.high %v371_v56, %v375_v57  ;;  %v8018_v63 = vcombine.high %v372_v58, %v376_v59  ;;  %v427_v51 = vld [vmem:[#allocation7 + $0x510] sm:$0xff] }
 0x13c   :  { %3011 = vmatpush1.bf16.msra.mxu0 %v7951_v3  ;;  %3183 = vmatpush1.bf16.msra.mxu1 %v7953_v4  ;;  %v384_v3 = vld [vmem:[#allocation7 + $0x3b8] sm:$0xff]  ;;  %v8015_v4 = vcombine.low %v371_v56, %v375_v57 }
 0x13d   :  { %3012 = vmatprep.subr.bf16.mxu0 %v7960_v5  ;;  %3184 = vmatprep.subr.bf16.mxu1 %v7962_v6  ;;  %v8017_v5 = vcombine.low %v372_v58, %v376_v59  ;;  %v8024_v6 = vcombine.high %v379_v0, %v383_v1  ;;  %v8026_v7 = vcombine.high %v380_v2, %v384_v3  ;;  %v435_v59 = vld [vmem:[#allocation7 + $0x550] sm:$0xff] }
 0x140   :  { %3013 = vmatpush1.bf16.msra.mxu0 %v7959_v11  ;;  %3185 = vmatpush1.bf16.msra.mxu1 %v7961_v12  ;;  %v392_v11 = vld [vmem:[#allocation7 + $0x3f8] sm:$0xff]  ;;  %v8023_v12 = vcombine.low %v379_v0, %v383_v1 }
 0x141   :  { %3014 = vmatprep.subr.bf16.mxu0 %v7968_v13  ;;  %3186 = vmatprep.subr.bf16.mxu1 %v7970_v14  ;;  %v8025_v13 = vcombine.low %v380_v2, %v384_v3  ;;  %v8032_v14 = vcombine.high %v387_v8, %v391_v9  ;;  %v8034_v15 = vcombine.high %v388_v10, %v392_v11  ;;  %v443_v3 = vld [vmem:[#allocation7 + $0x590] sm:$0xff] }
 0x144   :  { %3015 = vmatpush1.bf16.msra.mxu0 %v7967_v19  ;;  %3187 = vmatpush1.bf16.msra.mxu1 %v7969_v21  ;;  %v400_v19 = vld [vmem:[#allocation7 + $0x438] sm:$0xff]  ;;  %v8031_v21 = vcombine.low %v387_v8, %v391_v9 }
 0x145   :  { %3016 = vmatprep.subr.bf16.mxu0 %v7976_v22  ;;  %3188 = vmatprep.subr.bf16.mxu1 %v7978_v23  ;;  %v8033_v22 = vcombine.low %v388_v10, %v392_v11  ;;  %v8040_v23 = vcombine.high %v395_v16, %v399_v17  ;;  %v8042_v24 = vcombine.high %v396_v18, %v400_v19  ;;  %v451_v11 = vld [vmem:[#allocation7 + $0x5d0] sm:$0xff] }
 0x148   :  { %3017 = vmatpush1.bf16.msra.mxu0 %v7975_v28  ;;  %3189 = vmatpush1.bf16.msra.mxu1 %v7977_v29  ;;  %v408_v28 = vld [vmem:[#allocation7 + $0x478] sm:$0xff]  ;;  %v8039_v29 = vcombine.low %v395_v16, %v399_v17 }
 0x149   :  { %3018 = vmatprep.subr.bf16.mxu0 %v7984_v30  ;;  %3190 = vmatprep.subr.bf16.mxu1 %v7986_v31  ;;  %v8041_v30 = vcombine.low %v396_v18, %v400_v19  ;;  %v8048_v31 = vcombine.high %v403_v25, %v407_v26  ;;  %v8050_v32 = vcombine.high %v404_v27, %v408_v28  ;;  %v459_v19 = vld [vmem:[#allocation7 + $0x610] sm:$0xff] }
 0x14c   :  { %3019 = vmatpush1.bf16.msra.mxu0 %v7983_v36  ;;  %3191 = vmatpush1.bf16.msra.mxu1 %v7985_v37  ;;  %v412_v36 = vld [vmem:[#allocation7 + $0x498] sm:$0xff] }
 0x14d   :  { %3020 = vmatprep.subr.bf16.mxu0 %v7992_v38  ;;  %3192 = vmatprep.subr.bf16.mxu1 %v7994_v39  ;;  %v416_v37 = vld [vmem:[#allocation7 + $0x4b8] sm:$0xff]  ;;  %v8047_v38 = vcombine.low %v403_v25, %v407_v26  ;;  %v8049_v39 = vcombine.low %v404_v27, %v408_v28  ;;  %v467_v28 = vld [vmem:[#allocation7 + $0x650] sm:$0xff] }
 0x14e   :  { %v8058_v41 = vcombine.high %v412_v36, %v416_v37  ;;  %v8057_v48 = vcombine.low %v412_v36, %v416_v37  ;;  %v475_v36 = vld [vmem:[#allocation7 + $0x690] sm:$0xff] }
 0x14f   :  { %v479_v37 = vld [vmem:[#allocation7 + $0x6b0] sm:$0xff] }
 0x150   :  { %3021 = vmatpush1.bf16.msra.mxu0 %v7991_v44  ;;  %3193 = vmatpush1.bf16.msra.mxu1 %v7993_v45  ;;  %v9218_v44 = vld [vmem:[#allocation6 + $0xc] ss:$28 sps:$4 sm:$0xff]   ;;  %v420_v45 = vld [vmem:[#allocation7 + $0x4d8] sm:$0xff] }
 0x151   :  { %3022 = vmatprep.subr.bf16.mxu0 %v8000_v46  ;;  %3194 = vmatprep.subr.bf16.mxu1 %v8002_v47  ;;  %v424_v46 = vld [vmem:[#allocation7 + $0x4f8] sm:$0xff]  ;;  %v8055_v47 = vcombine.low %v411_v33, %v415_v34 }
 0x152   :  { %v8066_v50 = vcombine.high %v420_v45, %v424_v46  ;;  %v8065_v56 = vcombine.low %v420_v45, %v424_v46  ;;  %v487_v45 = vld [vmem:[#allocation7 + $0x6f0] sm:$0xff]  ;;  %v484_v46 = vld [vmem:[#allocation7 + $0x6d8] sm:$0xff] }
 0x154   :  { %3023 = vmatpush1.bf16.msra.mxu0 %v7999_v52  ;;  %3195 = vmatpush1.bf16.msra.mxu1 %v8001_v53  ;;  %v431_v52 = vld [vmem:[#allocation7 + $0x530] sm:$0xff]  ;;  %v428_v53 = vld [vmem:[#allocation7 + $0x518] sm:$0xff] }
 0x155   :  { %3024 = vmatprep.subr.bf16.mxu0 %v8008_v54  ;;  %3196 = vmatprep.subr.bf16.mxu1 %v8010_v55  ;;  %v432_v54 = vld [vmem:[#allocation7 + $0x538] sm:$0xff]  ;;  %v8063_v55 = vcombine.low %v419_v42, %v423_v43  ;;  %v8072_v57 = vcombine.high %v427_v51, %v431_v52  ;;  %v8120_v42 = vcombine.high %v475_v36, %v479_v37 }
 0x156   :  { %v8074_v58 = vcombine.high %v428_v53, %v432_v54  ;;  %v8073_v0 = vcombine.low %v428_v53, %v432_v54  ;;  %v495_v53 = vld [vmem:[#allocation7 + $0x730] sm:$0xff]  ;;  %v492_v54 = vld [vmem:[#allocation7 + $0x718] sm:$0xff] }
 0x158   :  { %3025 = vmatpush1.bf16.msra.mxu0 %v8007_v60  ;;  %3197 = vmatpush1.bf16.msra.mxu1 %v8009_v61  ;;  %v439_v60 = vld [vmem:[#allocation7 + $0x570] sm:$0xff]  ;;  %v436_v61 = vld [vmem:[#allocation7 + $0x558] sm:$0xff] }
 0x159   :  { %3026 = vmatprep.subr.bf16.mxu0 %v8016_v62  ;;  %3198 = vmatprep.subr.bf16.mxu1 %v8018_v63  ;;  %v440_v62 = vld [vmem:[#allocation7 + $0x578] sm:$0xff]  ;;  %v8071_v63 = vcombine.low %v427_v51, %v431_v52  ;;  %v8080_v1 = vcombine.high %v435_v59, %v439_v60  ;;  %v491_v52 = vld [vmem:[#allocation7 + $0x710] sm:$0xff] }
 0x15a   :  { %v8082_v2 = vcombine.high %v436_v61, %v440_v62  ;;  %v8081_v8 = vcombine.low %v436_v61, %v440_v62  ;;  %v503_v61 = vld [vmem:[#allocation7 + $0x770] sm:$0xff]  ;;  %v500_v62 = vld [vmem:[#allocation7 + $0x758] sm:$0xff] }
 0x15c   :  { %3027 = vmatpush1.bf16.msra.mxu0 %v8015_v4  ;;  %3199 = vmatpush1.bf16.msra.mxu1 %v8017_v5  ;;  %v447_v4 = vld [vmem:[#allocation7 + $0x5b0] sm:$0xff]  ;;  %v444_v5 = vld [vmem:[#allocation7 + $0x598] sm:$0xff] }
 0x15d   :  { %3028 = vmatprep.subr.bf16.mxu0 %v8024_v6  ;;  %3200 = vmatprep.subr.bf16.mxu1 %v8026_v7  ;;  %v448_v6 = vld [vmem:[#allocation7 + $0x5b8] sm:$0xff]  ;;  %v8079_v7 = vcombine.low %v435_v59, %v439_v60  ;;  %v8088_v9 = vcombine.high %v443_v3, %v447_v4  ;;  %v499_v60 = vld [vmem:[#allocation7 + $0x750] sm:$0xff] }
 0x15e   :  { %v8090_v10 = vcombine.high %v444_v5, %v448_v6  ;;  %v8089_v16 = vcombine.low %v444_v5, %v448_v6  ;;  %v511_v5 = vld [vmem:[#allocation7 + $0x7b0] sm:$0xff]  ;;  %v508_v6 = vld [vmem:[#allocation7 + $0x798] sm:$0xff] }
 0x160   :  { %3029 = vmatpush1.bf16.msra.mxu0 %v8023_v12  ;;  %3201 = vmatpush1.bf16.msra.mxu1 %v8025_v13  ;;  %v455_v12 = vld [vmem:[#allocation7 + $0x5f0] sm:$0xff]  ;;  %v452_v13 = vld [vmem:[#allocation7 + $0x5d8] sm:$0xff] }
 0x161   :  { %3030 = vmatprep.subr.bf16.mxu0 %v8032_v14  ;;  %3202 = vmatprep.subr.bf16.mxu1 %v8034_v15  ;;  %v456_v14 = vld [vmem:[#allocation7 + $0x5f8] sm:$0xff]  ;;  %v8087_v15 = vcombine.low %v443_v3, %v447_v4  ;;  %v8096_v17 = vcombine.high %v451_v11, %v455_v12  ;;  %v507_v4 = vld [vmem:[#allocation7 + $0x790] sm:$0xff] }
 0x162   :  { %v8098_v18 = vcombine.high %v452_v13, %v456_v14  ;;  %v8097_v25 = vcombine.low %v452_v13, %v456_v14  ;;  %v519_v13 = vld [vmem:[#allocation7 + $0x7f0] sm:$0xff]  ;;  %v516_v14 = vld [vmem:[#allocation7 + $0x7d8] sm:$0xff] }
 0x164   :  { %3031 = vmatpush1.bf16.msra.mxu0 %v8031_v21  ;;  %3203 = vmatpush1.bf16.msra.mxu1 %v8033_v22  ;;  %v463_v21 = vld [vmem:[#allocation7 + $0x630] sm:$0xff]  ;;  %v460_v22 = vld [vmem:[#allocation7 + $0x618] sm:$0xff] }
 0x165   :  { %3043 = vmatprep.subr.bf16.mxu0 %v8040_v23  ;;  %3215 = vmatprep.subr.bf16.mxu1 %v8042_v24  ;;  %v464_v23 = vld [vmem:[#allocation7 + $0x638] sm:$0xff]  ;;  %v8095_v24 = vcombine.low %v451_v11, %v455_v12  ;;  %v8104_v26 = vcombine.high %v459_v19, %v463_v21  ;;  %v515_v12 = vld [vmem:[#allocation7 + $0x7d0] sm:$0xff] }
 0x166   :  { %v8106_v27 = vcombine.high %v460_v22, %v464_v23  ;;  %v8105_v33 = vcombine.low %v460_v22, %v464_v23  ;;  %v527_v22 = vld [vmem:[#allocation7 + $0x830] sm:$0xff]  ;;  %v524_v23 = vld [vmem:[#allocation7 + $0x818] sm:$0xff] }
 0x167   :  { %3033 = vmatmul.mubr.bf16.vlgmr.msra.gmra.mrb[4].mxu0 %v9217_v35  ;;  %3205 = vmatmul.mubr.bf16.vlgmr.msra.gmra.mrb[4].mxu1 %v9217_v35 }
 0x168   :  { %3044 = vmatpush1.bf16.msra.mxu0 %v8039_v29  ;;  %3216 = vmatpush1.bf16.msra.mxu1 %v8041_v30  ;;  %v471_v29 = vld [vmem:[#allocation7 + $0x670] sm:$0xff]  ;;  %v468_v30 = vld [vmem:[#allocation7 + $0x658] sm:$0xff] }
 0x169   :  { %3045 = vmatprep.subr.bf16.mxu0 %v8048_v31  ;;  %3217 = vmatprep.subr.bf16.mxu1 %v8050_v32  ;;  %v472_v31 = vld [vmem:[#allocation7 + $0x678] sm:$0xff]  ;;  %v8103_v32 = vcombine.low %v459_v19, %v463_v21  ;;  %v8112_v34 = vcombine.high %v467_v28, %v471_v29  ;;  %v523_v21 = vld [vmem:[#allocation7 + $0x810] sm:$0xff] }
 0x16a   :  { %3075 = vmatprep.mubr.bf16.mxu0 %v9218_v44  ;;  %3247 = vmatprep.mubr.bf16.mxu1 %v9218_v44  ;;  %v8114_v35 = vcombine.high %v468_v30, %v472_v31  ;;  %v483_v44 = vld [vmem:[#allocation7 + $0x6d0] sm:$0xff] }
 0x16c   :  { %3046 = vmatpush1.bf16.msra.mxu0 %v8047_v38  ;;  %3218 = vmatpush1.bf16.msra.mxu1 %v8049_v39  ;;  %v476_v38 = vld [vmem:[#allocation7 + $0x698] sm:$0xff] }
 0x16d   :  { %3047 = vmatprep.subr.bf16.mxu0 %v8056_v40  ;;  %3219 = vmatprep.subr.bf16.mxu1 %v8058_v41  ;;  %v480_v39 = vld [vmem:[#allocation7 + $0x6b8] sm:$0xff]  ;;  %v8111_v40 = vcombine.low %v467_v28, %v471_v29  ;;  %v8113_v41 = vcombine.low %v468_v30, %v472_v31  ;;  %v531_v29 = vld [vmem:[#allocation7 + $0x850] sm:$0xff] }
 0x16e   :  { %v8122_v43 = vcombine.high %v476_v38, %v480_v39  ;;  %v535_v30 = vld [vmem:[#allocation7 + $0x870] sm:$0xff]  ;;  %v532_v31 = vld [vmem:[#allocation7 + $0x858] sm:$0xff] }
 0x170   :  { %3048 = vmatpush1.bf16.msra.mxu0 %v8055_v47  ;;  %3220 = vmatpush1.bf16.msra.mxu1 %v8057_v48  ;;  %v488_v47 = vld [vmem:[#allocation7 + $0x6f8] sm:$0xff]  ;;  %v8119_v48 = vcombine.low %v475_v36, %v479_v37  ;;  %v539_v37 = vld [vmem:[#allocation7 + $0x890] sm:$0xff] }
 0x171   :  { %3049 = vmatprep.subr.bf16.mxu0 %v8064_v49  ;;  %3221 = vmatprep.subr.bf16.mxu1 %v8066_v50  ;;  %v8121_v49 = vcombine.low %v476_v38, %v480_v39  ;;  %v8128_v50 = vcombine.high %v483_v44, %v487_v45  ;;  %v8130_v51 = vcombine.high %v484_v46, %v488_v47  ;;  %v543_v38 = vld [vmem:[#allocation7 + $0x8b0] sm:$0xff] }
 0x172   :  { %v9219_v39 = vld [vmem:[#allocation6 + $0x8] ss:$28 sps:$4 sm:$0xff]  }
 0x174   :  { %3050 = vmatpush1.bf16.msra.mxu0 %v8063_v55  ;;  %3222 = vmatpush1.bf16.msra.mxu1 %v8065_v56  ;;  %v496_v55 = vld [vmem:[#allocation7 + $0x738] sm:$0xff]  ;;  %v8127_v56 = vcombine.low %v483_v44, %v487_v45  ;;  %v8184_v44 = vcombine.high %v539_v37, %v543_v38 }
 0x175   :  { %3051 = vmatprep.subr.bf16.mxu0 %v8072_v57  ;;  %3223 = vmatprep.subr.bf16.mxu1 %v8074_v58  ;;  %v8129_v57 = vcombine.low %v484_v46, %v488_v47  ;;  %v8136_v58 = vcombine.high %v491_v52, %v495_v53  ;;  %v8138_v59 = vcombine.high %v492_v54, %v496_v55  ;;  %v547_v46 = vld [vmem:[#allocation7 + $0x8d0] sm:$0xff] }
 0x176   :  { %v551_v47 = vld [vmem:[#allocation7 + $0x8f0] sm:$0xff] }
 0x178   :  { %3052 = vmatpush1.bf16.msra.mxu0 %v8071_v63  ;;  %3224 = vmatpush1.bf16.msra.mxu1 %v8073_v0  ;;  %v504_v63 = vld [vmem:[#allocation7 + $0x778] sm:$0xff]  ;;  %v8135_v0 = vcombine.low %v491_v52, %v495_v53  ;;  %v8192_v53 = vcombine.high %v547_v46, %v551_v47 }
 0x179   :  { %3053 = vmatprep.subr.bf16.mxu0 %v8080_v1  ;;  %3225 = vmatprep.subr.bf16.mxu1 %v8082_v2  ;;  %v8137_v1 = vcombine.low %v492_v54, %v496_v55  ;;  %v8144_v2 = vcombine.high %v499_v60, %v503_v61  ;;  %v8146_v3 = vcombine.high %v500_v62, %v504_v63  ;;  %v555_v55 = vld [vmem:[#allocation7 + $0x910] sm:$0xff] }
 0x17c   :  { %3054 = vmatpush1.bf16.msra.mxu0 %v8079_v7  ;;  %3226 = vmatpush1.bf16.msra.mxu1 %v8081_v8  ;;  %v512_v7 = vld [vmem:[#allocation7 + $0x7b8] sm:$0xff]  ;;  %v8143_v8 = vcombine.low %v499_v60, %v503_v61 }
 0x17d   :  { %3055 = vmatprep.subr.bf16.mxu0 %v8088_v9  ;;  %3227 = vmatprep.subr.bf16.mxu1 %v8090_v10  ;;  %v8145_v9 = vcombine.low %v500_v62, %v504_v63  ;;  %v8152_v10 = vcombine.high %v507_v4, %v511_v5  ;;  %v8154_v11 = vcombine.high %v508_v6, %v512_v7  ;;  %v563_v63 = vld [vmem:[#allocation7 + $0x950] sm:$0xff] }
 0x180   :  { %3056 = vmatpush1.bf16.msra.mxu0 %v8087_v15  ;;  %3228 = vmatpush1.bf16.msra.mxu1 %v8089_v16  ;;  %v520_v15 = vld [vmem:[#allocation7 + $0x7f8] sm:$0xff]  ;;  %v8151_v16 = vcombine.low %v507_v4, %v511_v5 }
 0x181   :  { %3057 = vmatprep.subr.bf16.mxu0 %v8096_v17  ;;  %3229 = vmatprep.subr.bf16.mxu1 %v8098_v18  ;;  %v8153_v17 = vcombine.low %v508_v6, %v512_v7  ;;  %v8160_v18 = vcombine.high %v515_v12, %v519_v13  ;;  %v8162_v19 = vcombine.high %v516_v14, %v520_v15  ;;  %v571_v7 = vld [vmem:[#allocation7 + $0x990] sm:$0xff] }
 0x184   :  { %3058 = vmatpush1.bf16.msra.mxu0 %v8095_v24  ;;  %3230 = vmatpush1.bf16.msra.mxu1 %v8097_v25  ;;  %v528_v24 = vld [vmem:[#allocation7 + $0x838] sm:$0xff]  ;;  %v8159_v25 = vcombine.low %v515_v12, %v519_v13 }
 0x185   :  { %3059 = vmatprep.subr.bf16.mxu0 %v8104_v26  ;;  %3231 = vmatprep.subr.bf16.mxu1 %v8106_v27  ;;  %v8161_v26 = vcombine.low %v516_v14, %v520_v15  ;;  %v8168_v27 = vcombine.high %v523_v21, %v527_v22  ;;  %v8170_v28 = vcombine.high %v524_v23, %v528_v24  ;;  %v579_v15 = vld [vmem:[#allocation7 + $0x9d0] sm:$0xff] }
 0x188   :  { %3060 = vmatpush1.bf16.msra.mxu0 %v8103_v32  ;;  %3232 = vmatpush1.bf16.msra.mxu1 %v8105_v33  ;;  %v536_v32 = vld [vmem:[#allocation7 + $0x878] sm:$0xff]  ;;  %v8167_v33 = vcombine.low %v523_v21, %v527_v22 }
 0x189   :  { %3061 = vmatprep.subr.bf16.mxu0 %v8112_v34  ;;  %3233 = vmatprep.subr.bf16.mxu1 %v8114_v35  ;;  %v8169_v34 = vcombine.low %v524_v23, %v528_v24  ;;  %v8176_v35 = vcombine.high %v531_v29, %v535_v30  ;;  %v8178_v36 = vcombine.high %v532_v31, %v536_v32  ;;  %v587_v24 = vld [vmem:[#allocation7 + $0xa10] sm:$0xff] }
 0x18c   :  { %3062 = vmatpush1.bf16.msra.mxu0 %v8111_v40  ;;  %3234 = vmatpush1.bf16.msra.mxu1 %v8113_v41  ;;  %v540_v40 = vld [vmem:[#allocation7 + $0x898] sm:$0xff] }
 0x18d   :  { %3063 = vmatprep.subr.bf16.mxu0 %v8120_v42  ;;  %3235 = vmatprep.subr.bf16.mxu1 %v8122_v43  ;;  %v544_v41 = vld [vmem:[#allocation7 + $0x8b8] sm:$0xff]  ;;  %v8175_v42 = vcombine.low %v531_v29, %v535_v30  ;;  %v8177_v43 = vcombine.low %v532_v31, %v536_v32  ;;  %v91_v31 = vlaneseq }
 0x18e   :  { %v8186_v45 = vcombine.high %v540_v40, %v544_v41  ;;  %v8185_v52 = vcombine.low %v540_v40, %v544_v41 }
 0x18f   :  { %v9470_v40 = vand.u32 127, %v91_v31 }
 0x190   :  { %3064 = vmatpush1.bf16.msra.mxu0 %v8119_v48  ;;  %3236 = vmatpush1.bf16.msra.mxu1 %v8121_v49  ;;  %v9220_v48 = vld [vmem:[#allocation6 + $0x14] ss:$28 sps:$4 sm:$0xff]  }
 0x191   :  { %3065 = vmatprep.subr.bf16.mxu0 %v8128_v50  ;;  %3237 = vmatprep.subr.bf16.mxu1 %v8130_v51  ;;  %v548_v49 = vld [vmem:[#allocation7 + $0x8d8] sm:$0xff]  ;;  %v8183_v51 = vcombine.low %v539_v37, %v543_v38 }
 0x192   :  { %v552_v50 = vld [vmem:[#allocation7 + $0x8f8] sm:$0xff] }
 0x193   :  { %v8194_v54 = vcombine.high %v548_v49, %v552_v50  ;;  %v8193_v60 = vcombine.low %v548_v49, %v552_v50  ;;  %v9476_v49 = vadd.s32 256, %v9470_v40 }
 0x194   :  { %3066 = vmatpush1.bf16.msra.mxu0 %v8127_v56  ;;  %3238 = vmatpush1.bf16.msra.mxu1 %v8129_v57  ;;  %v559_v56 = vld [vmem:[#allocation7 + $0x930] sm:$0xff]  ;;  %v556_v57 = vld [vmem:[#allocation7 + $0x918] sm:$0xff] }
 0x195   :  { %3067 = vmatprep.subr.bf16.mxu0 %v8136_v58  ;;  %3239 = vmatprep.subr.bf16.mxu1 %v8138_v59  ;;  %v560_v58 = vld [vmem:[#allocation7 + $0x938] sm:$0xff]  ;;  %v8191_v59 = vcombine.low %v547_v46, %v551_v47  ;;  %v8200_v61 = vcombine.high %v555_v55, %v559_v56 }
 0x196   :  { %v8202_v62 = vcombine.high %v556_v57, %v560_v58  ;;  %v8201_v4 = vcombine.low %v556_v57, %v560_v58  ;;  %v100_v58 = vcvt.s32.f32 %v9470_v40 }
 0x198   :  { %3068 = vmatpush1.bf16.msra.mxu0 %v8135_v0  ;;  %3240 = vmatpush1.bf16.msra.mxu1 %v8137_v1  ;;  %v567_v0 = vld [vmem:[#allocation7 + $0x970] sm:$0xff]  ;;  %v564_v1 = vld [vmem:[#allocation7 + $0x958] sm:$0xff] }
 0x199   :  { %3069 = vmatprep.subr.bf16.mxu0 %v8144_v2  ;;  %3241 = vmatprep.subr.bf16.mxu1 %v8146_v3  ;;  %v568_v2 = vld [vmem:[#allocation7 + $0x978] sm:$0xff]  ;;  %v8199_v3 = vcombine.low %v555_v55, %v559_v56  ;;  %v8208_v5 = vcombine.high %v563_v63, %v567_v0  ;;  %v9482_v56 = vadd.s32 384, %v9470_v40 }
 0x19a   :  { %v8210_v6 = vcombine.high %v564_v1, %v568_v2  ;;  %v8209_v12 = vcombine.low %v564_v1, %v568_v2  ;;  %v616_v55 = vld [vmem:[#allocation7 + $0xaf8] sm:$0xff]  ;;  %v623_v1 = vld [vmem:[#allocation7 + $0xb30] sm:$0xff] }
 0x19c   :  { %3070 = vmatpush1.bf16.msra.mxu0 %v8143_v8  ;;  %3242 = vmatpush1.bf16.msra.mxu1 %v8145_v9  ;;  %v575_v8 = vld [vmem:[#allocation7 + $0x9b0] sm:$0xff]  ;;  %v572_v9 = vld [vmem:[#allocation7 + $0x998] sm:$0xff] }
 0x19d   :  { %3071 = vmatprep.subr.bf16.mxu0 %v8152_v10  ;;  %3243 = vmatprep.subr.bf16.mxu1 %v8154_v11  ;;  %v576_v10 = vld [vmem:[#allocation7 + $0x9b8] sm:$0xff]  ;;  %v8207_v11 = vcombine.low %v563_v63, %v567_v0  ;;  %v8216_v13 = vcombine.high %v571_v7, %v575_v8  ;;  %v619_v0 = vld [vmem:[#allocation7 + $0xb10] sm:$0xff] }
 0x19e   :  { %v8218_v14 = vcombine.high %v572_v9, %v576_v10  ;;  %v8217_v21 = vcombine.low %v572_v9, %v576_v10  ;;  %v8264_v9 = vcombine.high %v619_v0, %v623_v1  ;;  %v9494_v10 = vstv %s9472_s26 }
 0x1a0   :  { %3072 = vmatpush1.bf16.msra.mxu0 %v8151_v16  ;;  %3244 = vmatpush1.bf16.msra.mxu1 %v8153_v17  ;;  %v583_v16 = vld [vmem:[#allocation7 + $0x9f0] sm:$0xff]  ;;  %v580_v17 = vld [vmem:[#allocation7 + $0x9d8] sm:$0xff] }
 0x1a1   :  { %3073 = vmatprep.subr.bf16.mxu0 %v8160_v18  ;;  %3245 = vmatprep.subr.bf16.mxu1 %v8162_v19  ;;  %v584_v18 = vld [vmem:[#allocation7 + $0x9f8] sm:$0xff]  ;;  %v8215_v19 = vcombine.low %v571_v7, %v575_v8  ;;  %v8224_v22 = vcombine.high %v579_v15, %v583_v16 }
 0x1a2   :  { %v8226_v23 = vcombine.high %v580_v17, %v584_v18  ;;  %v8225_v29 = vcombine.low %v580_v17, %v584_v18  ;;  %v632_v17 = vld [vmem:[#allocation7 + $0xb78] sm:$0xff] }
 0x1a4   :  { %3074 = vmatpush1.bf16.msra.mxu0 %v8159_v25  ;;  %3246 = vmatpush1.bf16.msra.mxu1 %v8161_v26  ;;  %v591_v25 = vld [vmem:[#allocation7 + $0xa30] sm:$0xff]  ;;  %v588_v26 = vld [vmem:[#allocation7 + $0xa18] sm:$0xff] }
 0x1a5   :  { %3086 = vmatprep.subr.bf16.mxu0 %v8168_v27  ;;  %3258 = vmatprep.subr.bf16.mxu1 %v8170_v28  ;;  %v592_v27 = vld [vmem:[#allocation7 + $0xa38] sm:$0xff]  ;;  %v8223_v28 = vcombine.low %v579_v15, %v583_v16  ;;  %v8232_v30 = vcombine.high %v587_v24, %v591_v25  ;;  %v8231_v37 = vcombine.low %v587_v24, %v591_v25 }
 0x1a6   :  { %v8234_v32 = vcombine.high %v588_v26, %v592_v27  ;;  %v8233_v38 = vcombine.low %v588_v26, %v592_v27  ;;  %v628_v16 = vld [vmem:[#allocation7 + $0xb58] sm:$0xff]  ;;  %v635_v26 = vld [vmem:[#allocation7 + $0xb90] sm:$0xff] }
 0x1a7   :  { %3076 = vmatmul.mubr.bf16.vlgmr.msra.gmra.mrb[4].mxu0 %v9219_v39  ;;  %3248 = vmatmul.mubr.bf16.vlgmr.msra.gmra.mrb[4].mxu1 %v9219_v39  ;;  %v8274_v25 = vcombine.high %v628_v16, %v632_v17  ;;  %v639_v27 = vld [vmem:[#allocation7 + $0xbb0] sm:$0xff] }
 0x1a8   :  { %3087 = vmatpush1.bf16.msra.mxu0 %v8167_v33  ;;  %3259 = vmatpush1.bf16.msra.mxu1 %v8169_v34  ;;  %v595_v33 = vld [vmem:[#allocation7 + $0xa50] sm:$0xff] }
 0x1a9   :  { %3088 = vmatprep.subr.bf16.mxu0 %v8176_v35  ;;  %3260 = vmatprep.subr.bf16.mxu1 %v8178_v36  ;;  %v599_v34 = vld [vmem:[#allocation7 + $0xa70] sm:$0xff]  ;;  %v596_v35 = vld [vmem:[#allocation7 + $0xa58] sm:$0xff] }
 0x1aa   :  { %3118 = vmatprep.mubr.bf16.mxu0 %v9220_v48  ;;  %3290 = vmatprep.mubr.bf16.mxu1 %v9220_v48  ;;  %v600_v36 = vld [vmem:[#allocation7 + $0xa78] sm:$0xff]  ;;  %v8240_v39 = vcombine.high %v595_v33, %v599_v34  ;;  %v8239_v46 = vcombine.low %v595_v33, %v599_v34  ;;  %v8273_v34 = vcombine.low %v628_v16, %v632_v17 }
 0x1ab   :  { %v8242_v41 = vcombine.high %v596_v35, %v600_v36  ;;  %v8241_v47 = vcombine.low %v596_v35, %v600_v36  ;;  %v8280_v35 = vcombine.high %v635_v26, %v639_v27 }
 0x1ac   :  { %3089 = vmatpush1.bf16.msra.mxu0 %v8175_v42  ;;  %3261 = vmatpush1.bf16.msra.mxu1 %v8177_v43  ;;  %v603_v42 = vld [vmem:[#allocation7 + $0xa90] sm:$0xff] }
 0x1ad   :  { %3090 = vmatprep.subr.bf16.mxu0 %v8184_v44  ;;  %3262 = vmatprep.subr.bf16.mxu1 %v8186_v45  ;;  %v607_v43 = vld [vmem:[#allocation7 + $0xab0] sm:$0xff]  ;;  %v604_v44 = vld [vmem:[#allocation7 + $0xa98] sm:$0xff] }
 0x1ae   :  { %v608_v45 = vld [vmem:[#allocation7 + $0xab8] sm:$0xff]  ;;  %v8248_v48 = vcombine.high %v603_v42, %v607_v43  ;;  %v8247_v57 = vcombine.low %v603_v42, %v607_v43 }
 0x1af   :  { %v8250_v50 = vcombine.high %v604_v44, %v608_v45  ;;  %v644_v42 = vld [vmem:[#allocation7 + $0xbd8] sm:$0xff] }
 0x1b0   :  { %3091 = vmatpush1.bf16.msra.mxu0 %v8183_v51  ;;  %3263 = vmatpush1.bf16.msra.mxu1 %v8185_v52  ;;  %v611_v51 = vld [vmem:[#allocation7 + $0xad0] sm:$0xff]  ;;  %v648_v43 = vld [vmem:[#allocation7 + $0xbf8] sm:$0xff] }
 0x1b1   :  { %3092 = vmatprep.subr.bf16.mxu0 %v8192_v53  ;;  %3264 = vmatprep.subr.bf16.mxu1 %v8194_v54  ;;  %v615_v52 = vld [vmem:[#allocation7 + $0xaf0] sm:$0xff]  ;;  %v9479_v53 = vadd.s32 128, %v9470_v40  ;;  %v612_v54 = vld [vmem:[#allocation7 + $0xad8] sm:$0xff] }
 0x1b2   :  { %v8258_v63 = vcombine.high %v612_v54, %v616_v55  ;;  %v8257_v8 = vcombine.low %v612_v54, %v616_v55  ;;  %v656_v54 = vld [vmem:[#allocation7 + $0xc38] sm:$0xff] }
 0x1b3   :  { %v101_v2 = vcvt.s32.f32 %v9479_v53  ;;  %v3747_v53 = vld [vmem:[#allocation9 + $0xb58] sm:$0xff] }
 0x1b4   :  { %3093 = vmatpush1.bf16.msra.mxu0 %v8191_v59  ;;  %3265 = vmatpush1.bf16.msra.mxu1 %v8193_v60  ;;  %v8249_v59 = vcombine.low %v604_v44, %v608_v45  ;;  %v8256_v60 = vcombine.high %v611_v51, %v615_v52  ;;  %v8279_v45 = vcombine.low %v635_v26, %v639_v27 }
 0x1b5   :  { %3094 = vmatprep.subr.bf16.mxu0 %v8200_v61  ;;  %3266 = vmatprep.subr.bf16.mxu1 %v8202_v62  ;;  %v9485_v61 = vstv %s108_s27  ;;  %v102_v62 = vcvt.s32.f32 %v9476_v49 }
 0x1b6   :  { %v110_v7 = vsub.f32 %v100_v58, %v9485_v61  ;;  %v111_v15 = vsub.f32 %v101_v2, %v9485_v61 }
 0x1b8   :  { %3095 = vmatpush1.bf16.msra.mxu0 %v8199_v3  ;;  %3267 = vmatpush1.bf16.msra.mxu1 %v8201_v4  ;;  %v620_v3 = vld [vmem:[#allocation7 + $0xb18] sm:$0xff] }
 0x1b9   :  { %3096 = vmatprep.subr.bf16.mxu0 %v8208_v5  ;;  %3268 = vmatprep.subr.bf16.mxu1 %v8210_v6  ;;  %v624_v4 = vld [vmem:[#allocation7 + $0xb38] sm:$0xff]  ;;  %v103_v5 = vcvt.s32.f32 %v9482_v56  ;;  %v8255_v6 = vcombine.low %v611_v51, %v615_v52  ;;  %v655_v51 = vld [vmem:[#allocation7 + $0xc30] sm:$0xff] }
 0x1ba   :  { %v652_v52 = vld [vmem:[#allocation7 + $0xc18] sm:$0xff] }
 0x1bb   :  { %v113_v18 = vsub.f32 %v103_v5, %v9485_v61 }
 0x1bc   :  { %3097 = vmatpush1.bf16.msra.mxu0 %v8207_v11  ;;  %3269 = vmatpush1.bf16.msra.mxu1 %v8209_v12  ;;  %v112_v11 = vsub.f32 %v102_v62, %v9485_v61  ;;  %v8266_v12 = vcombine.high %v620_v3, %v624_v4 }
 0x1bd   :  { %3098 = vmatprep.subr.bf16.mxu0 %v8216_v13  ;;  %3270 = vmatprep.subr.bf16.mxu1 %v8218_v14  ;;  %v627_v13 = vld [vmem:[#allocation7 + $0xb50] sm:$0xff]  ;;  %v122_v31 = vmul.f32 %v9494_v10, %v113_v18 }
 0x1be   :  { %v631_v14 = vld [vmem:[#allocation7 + $0xb70] sm:$0xff]  ;;  %v121_v24 = vmul.f32 %v9494_v10, %v112_v11 }
 0x1bf   :  { %v7887_v44 = vmul.f32 -1.442695, %v122_v31  ;;  %v9221_v11 = vld [vmem:[#allocation6 + $0x10] ss:$28 sps:$4 sm:$0xff]   ;;  %v3405_v31 = vld [vmem:[#allocation9 + $0xa8] sm:$0xff] }
 0x1c0   :  { %3099 = vmatpush1.bf16.msra.mxu0 %v8215_v19  ;;  %3271 = vmatpush1.bf16.msra.mxu1 %v8217_v21  ;;  %v8263_v19 = vcombine.low %v619_v0, %v623_v1  ;;  %v119_v21 = vmul.f32 %v9494_v10, %v110_v7  ;;  %v7886_v36 = vmul.f32 -1.442695, %v121_v24  ;;  %v3388_v0 = vld [vmem:[#allocation9 + $0x20] sm:$0xff] }
 0x1c1   :  { %3100 = vmatprep.subr.bf16.mxu0 %v8224_v22  ;;  %3272 = vmatprep.subr.bf16.mxu1 %v8226_v23  ;;  %v8265_v22 = vcombine.low %v620_v3, %v624_v4  ;;  %v8272_v23 = vcombine.high %v627_v13, %v631_v14  ;;  %v3385_v3 = vld [vmem:[#allocation9 + $0x8] sm:$0xff] }
 0x1c2   :  { %v7884_v33 = vmul.f32 -1.442695, %v119_v21  ;;  %v3389_v4 = vld [vmem:[#allocation9 + $0x28] sm:$0xff]  ;;  %v3396_v21 = vld [vmem:[#allocation9 + $0x60] sm:$0xff] }
 0x1c4   :  { %3101 = vmatpush1.bf16.msra.mxu0 %v8223_v28  ;;  %3273 = vmatpush1.bf16.msra.mxu1 %v8225_v29  ;;  %v120_v28 = vmul.f32 %v9494_v10, %v111_v15  ;;  %v636_v29 = vld [vmem:[#allocation7 + $0xb98] sm:$0xff]  ;;  %9152 = vpow2.f32 %v7884_v33 }
 0x1c5   :  { %3102 = vmatprep.subr.bf16.mxu0 %v8232_v30  ;;  %3274 = vmatprep.subr.bf16.mxu1 %v8234_v32  ;;  %v640_v30 = vld [vmem:[#allocation7 + $0xbb8] sm:$0xff]  ;;  %v8271_v32 = vcombine.low %v627_v13, %v631_v14  ;;  %9154 = vpow2.f32 %v7886_v36  ;;  %v3408_v36 = vld [vmem:[#allocation9 + $0xc0] sm:$0xff] }
 0x1c8   :  { %3103 = vmatpush1.bf16.msra.mxu0 %v8231_v37  ;;  %3275 = vmatpush1.bf16.msra.mxu1 %v8233_v38  ;;  %v8282_v37 = vcombine.high %v636_v29, %v640_v30  ;;  %v643_v38 = vld [vmem:[#allocation7 + $0xbd0] sm:$0xff] }
 0x1c9   :  { %3104 = vmatprep.subr.bf16.mxu0 %v8240_v39  ;;  %3276 = vmatprep.subr.bf16.mxu1 %v8242_v41  ;;  %v647_v39 = vld [vmem:[#allocation7 + $0xbf0] sm:$0xff]  ;;  %v7885_v41 = vmul.f32 -1.442695, %v120_v28  ;;  %v3400_v28 = vld [vmem:[#allocation9 + $0x80] sm:$0xff] }
 0x1ca   :  { %v8287_v55 = vcombine.low %v643_v38, %v647_v39 }
 0x1cb   :  { %9156 = vpow2.f32 %v7885_v41  ;;  %v3413_v41 = vld [vmem:[#allocation9 + $0xe8] sm:$0xff] }
 0x1cc   :  { %3105 = vmatpush1.bf16.msra.mxu0 %v8239_v46  ;;  %3277 = vmatpush1.bf16.msra.mxu1 %v8241_v47  ;;  %v8281_v46 = vcombine.low %v636_v29, %v640_v30  ;;  %v8288_v47 = vcombine.high %v643_v38, %v647_v39  ;;  %9158 = vpow2.f32 %v7887_v44  ;;  %v3404_v29 = vld [vmem:[#allocation9 + $0xa0] sm:$0xff]  ;;  %v3401_v30 = vld [vmem:[#allocation9 + $0x88] sm:$0xff] }
 0x1cd   :  { %3106 = vmatprep.subr.bf16.mxu0 %v8248_v48  ;;  %3278 = vmatprep.subr.bf16.mxu1 %v8250_v50  ;;  %v8290_v48 = vcombine.high %v644_v42, %v648_v43  ;;  %v651_v50 = vld [vmem:[#allocation7 + $0xc10] sm:$0xff]  ;;  %v3409_v39 = vld [vmem:[#allocation9 + $0xc8] sm:$0xff] }
 0x1ce   :  { %v8295_v1 = vcombine.low %v651_v50, %v655_v51  ;;  %v9153_v7 = vpop.eup %9152 }
 0x1cf   :  { %v151_v15 = vadd.f32 1.0, %v9153_v7 }
 0x1d0   :  { %3107 = vmatpush1.bf16.msra.mxu0 %v8247_v57  ;;  %3279 = vmatpush1.bf16.msra.mxu1 %v8249_v59  ;;  %v8289_v57 = vcombine.low %v644_v42, %v648_v43  ;;  %v8296_v59 = vcombine.high %v651_v50, %v655_v51  ;;  %v8319_v43 = vcombine.low %v3400_v28, %v3404_v29 }
 0x1d1   :  { %3108 = vmatprep.subr.bf16.mxu0 %v8256_v60  ;;  %3280 = vmatprep.subr.bf16.mxu1 %v8258_v63  ;;  %v8298_v60 = vcombine.high %v652_v52, %v656_v54  ;;  %v3384_v63 = vld [vmem:[#allocation9] sm:$0xff]  ;;  %9160 = vrcp.f32 %v151_v15  ;;  %v8330_v51 = vcombine.high %v3409_v39, %v3413_v41 }
 0x1d2   :  { %v8303_v24 = vcombine.low %v3384_v63, %v3388_v0 }
 0x1d4   :  { %3109 = vmatpush1.bf16.msra.mxu0 %v8255_v6  ;;  %3281 = vmatpush1.bf16.msra.mxu1 %v8257_v8  ;;  %v8297_v6 = vcombine.low %v652_v52, %v656_v54  ;;  %v8304_v8 = vcombine.high %v3384_v63, %v3388_v0  ;;  %v3416_v52 = vld [vmem:[#allocation9 + $0x100] sm:$0xff]  ;;  %v3417_v0 = vld [vmem:[#allocation9 + $0x108] sm:$0xff] }
 0x1d5   :  { %3110 = vmatprep.subr.bf16.mxu0 %v8264_v9  ;;  %3282 = vmatprep.subr.bf16.mxu1 %v8266_v12  ;;  %v9155_v9 = vpop.eup %9154  ;;  %v8306_v12 = vcombine.high %v3385_v3, %v3389_v4  ;;  %v3420_v54 = vld [vmem:[#allocation9 + $0x120] sm:$0xff] }
 0x1d6   :  { %v9157_v13 = vpop.eup %9156  ;;  %v153_v16 = vadd.f32 1.0, %v9155_v9  ;;  %v8329_v9 = vcombine.low %v3409_v39, %v3413_v41 }
 0x1d7   :  { %v9159_v14 = vpop.eup %9158  ;;  %v152_v17 = vadd.f32 1.0, %v9157_v13 }
 0x1d8   :  { %3111 = vmatpush1.bf16.msra.mxu0 %v8263_v19  ;;  %3283 = vmatpush1.bf16.msra.mxu1 %v8265_v22  ;;  %v154_v18 = vadd.f32 1.0, %v9159_v14  ;;  %v3392_v19 = vld [vmem:[#allocation9 + $0x40] sm:$0xff]  ;;  %9162 = vrcp.f32 %v153_v16  ;;  %v3393_v22 = vld [vmem:[#allocation9 + $0x48] sm:$0xff]  ;;  %v8336_v16 = vcombine.high %v3416_v52, %v3420_v54 }
 0x1d9   :  { %3112 = vmatprep.subr.bf16.mxu0 %v8272_v23  ;;  %3284 = vmatprep.subr.bf16.mxu1 %v8274_v25  ;;  %v3397_v23 = vld [vmem:[#allocation9 + $0x68] sm:$0xff]  ;;  %9164 = vrcp.f32 %v152_v17  ;;  %v8305_v25 = vcombine.low %v3385_v3, %v3389_v4  ;;  %v8312_v26 = vcombine.high %v3392_v19, %v3396_v21 }
 0x1da   :  { %9166 = vrcp.f32 %v154_v18  ;;  %v8314_v27 = vcombine.high %v3393_v22, %v3397_v23  ;;  %v8313_v33 = vcombine.low %v3393_v22, %v3397_v23  ;;  %v3424_v23 = vld [vmem:[#allocation9 + $0x140] sm:$0xff] }
 0x1db   :  { %v9161_v38 = vpop.eup %9160 }
 0x1dc   :  { %3113 = vmatpush1.bf16.msra.mxu0 %v8271_v32  ;;  %3285 = vmatpush1.bf16.msra.mxu1 %v8273_v34  ;;  %v8311_v32 = vcombine.low %v3392_v19, %v3396_v21  ;;  %v8320_v34 = vcombine.high %v3400_v28, %v3404_v29  ;;  %v8335_v21 = vcombine.low %v3416_v52, %v3420_v54  ;;  %v3428_v28 = vld [vmem:[#allocation9 + $0x160] sm:$0xff]  ;;  %v3425_v29 = vld [vmem:[#allocation9 + $0x148] sm:$0xff] }
 0x1dd   :  { %3114 = vmatprep.subr.bf16.mxu0 %v8280_v35  ;;  %3286 = vmatprep.subr.bf16.mxu1 %v8282_v37  ;;  %v8322_v35 = vcombine.high %v3401_v30, %v3405_v31  ;;  %v3412_v37 = vld [vmem:[#allocation9 + $0xe0] sm:$0xff]  ;;  %v8344_v39 = vcombine.high %v3424_v23, %v3428_v28 }
 0x1de   :  { %v8327_v63 = vcombine.low %v3408_v36, %v3412_v37  ;;  %v3440_v52 = vld [vmem:[#allocation9 + $0x1c0] sm:$0xff] }
 0x1df   :  { %v3444_v54 = vld [vmem:[#allocation9 + $0x1e0] sm:$0xff] }
 0x1e0   :  { %3115 = vmatpush1.bf16.msra.mxu0 %v8279_v45  ;;  %3287 = vmatpush1.bf16.msra.mxu1 %v8281_v46  ;;  %v8321_v45 = vcombine.low %v3401_v30, %v3405_v31  ;;  %v8328_v46 = vcombine.high %v3408_v36, %v3412_v37 }
 0x1e1   :  { %3116 = vmatprep.subr.bf16.mxu0 %v8288_v47  ;;  %3288 = vmatprep.subr.bf16.mxu1 %v8290_v48  ;;  %v175_v48 = vsub.f32 1.0, %v9161_v38 }
 0x1e2   :  { %v9163_v42 = vpop.eup %9162 }
 0x1e3   :  { %v9165_v44 = vpop.eup %9164 }
 0x1e4   :  { %3117 = vmatpush1.bf16.msra.mxu0 %v8287_v55  ;;  %3289 = vmatpush1.bf16.msra.mxu1 %v8289_v57  ;;  %v9167_v47 = vpop.eup %9166  ;;  %v177_v57 = vsub.f32 1.0, %v9163_v42  ;;  %v176_v4 = vsub.f32 1.0, %v9165_v44  ;;  %v3432_v42 = vld [vmem:[#allocation9 + $0x180] sm:$0xff] }
 0x1e5   :  { %3129 = vmatprep.subr.bf16.mxu0 %v8296_v59  ;;  %3301 = vmatprep.subr.bf16.mxu1 %v8298_v60 }
 0x1e7   :  { %3119 = vmatmul.mubr.bf16.vlgmr.msra.gmra.mrb[4].mxu0 %v9221_v11  ;;  %3291 = vmatmul.mubr.bf16.vlgmr.msra.gmra.mrb[4].mxu1 %v9221_v11  ;;  %v178_v11 = vsub.f32 1.0, %v9167_v47  ;;  %v8343_v47 = vcombine.low %v3424_v23, %v3428_v28  ;;  %v3465_v23 = vld [vmem:[#allocation9 + $0x288] sm:$0xff] }
 0x1e8   :  { %3130 = vmatpush1.bf16.msra.mxu0 %v8295_v1  ;;  %3302 = vmatpush1.bf16.msra.mxu1 %v8297_v6  ;;  %v3421_v1 = vld [vmem:[#allocation9 + $0x128] sm:$0xff] }
 0x1e9   :  { %3161 = vmatprep.mubr.bf16.mxu0 %v9364_v20  ;;  %3333 = vmatprep.mubr.bf16.mxu1 %v9364_v20  ;;  %v9222_v20 = vld [vmem:[#allocation6 + $0x18] ss:$28 sps:$4 sm:$0xff]   ;;  %v8338_v22 = vcombine.high %v3417_v0, %v3421_v1 }
 0x1ea   :  { %6456 = vmatprep.subr.bf16.mxu0 %v8304_v8  ;;  %6628 = vmatprep.subr.bf16.mxu1 %v8306_v12 }
 0x1f3   :  { %8301 = vmatmul.mubr.msk.bf16.vlgmr.msra.gmra.mrb[4].mxu0 %vm2652_vm0, %v9222_v20  ;;  %8302 = vmatmul.mubr.msk.bf16.vlgmr.msra.gmra.mrb[4].mxu1 %vm2652_vm0, %v9222_v20  ;;  %v3429_v20 = vld [vmem:[#allocation9 + $0x168] sm:$0xff] }
 0x1f4   :  { %6457 = vmatpush1.bf16.msra.mxu0 %v8303_v24  ;;  %6629 = vmatpush1.bf16.msra.mxu1 %v8305_v25  ;;  %v8346_v41 = vcombine.high %v3425_v29, %v3429_v20 }
 0x1f5   :  { %6458 = vmatprep.subr.bf16.mxu0 %v8312_v26  ;;  %6630 = vmatprep.subr.bf16.mxu1 %v8314_v27  ;;  %v8337_v27 = vcombine.low %v3417_v0, %v3421_v1  ;;  %v3448_v1 = vld [vmem:[#allocation9 + $0x200] sm:$0xff] }
 0x1f8   :  { %6459 = vmatpush1.bf16.msra.mxu0 %v8311_v32  ;;  %6631 = vmatpush1.bf16.msra.mxu1 %v8313_v33 }
 0x1f9   :  { %6460 = vmatprep.subr.bf16.mxu0 %v8320_v34  ;;  %6632 = vmatprep.subr.bf16.mxu1 %v8322_v35 }
 0x1fa   :  { %v2819_v50 = vpop.f32.mrb[0].mxu0  ;;  %v2991_v59 = vpop.f32.mrb[0].mxu1 }
 0x1fb   :  { %v3344_v55 = vmax.f32 %v2819_v50, 0.0  ;;  %v2821_v60 = vpop.f32.mrb[1].mxu0  ;;  %v3346_v3 = vmax.f32 %v2991_v59, 0.0  ;;  %v2993_v7 = vpop.f32.mrb[1].mxu1 }
 0x1fc   :  { %6461 = vmatpush1.bf16.msra.mxu0 %v8319_v43  ;;  %v3345_v6 = vmax.f32 %v2821_v60, 0.0  ;;  %v2823_v8 = vpop.f32.mrb[2].mxu0  ;;  %6633 = vmatpush1.bf16.msra.mxu1 %v8321_v45  ;;  %v3347_v12 = vmax.f32 %v2993_v7, 0.0  ;;  %v2995_v14 = vpop.f32.mrb[2].mxu1  ;;  %v3436_v43 = vld [vmem:[#allocation9 + $0x1a0] sm:$0xff]  ;;  %v3433_v45 = vld [vmem:[#allocation9 + $0x188] sm:$0xff]  ;;  %v8359_v7 = vcombine.low %v3440_v52, %v3444_v54 }
 0x1fd   :  { %v3352_v13 = vmax.f32 %v2823_v8, 0.0  ;;  %v2825_v15 = vpop.f32.mrb[3].mxu0  ;;  %6462 = vmatprep.subr.bf16.mxu0 %v8328_v46  ;;  %v3354_v17 = vmax.f32 %v2995_v14, 0.0  ;;  %v2997_v19 = vpop.f32.mrb[3].mxu1  ;;  %6634 = vmatprep.subr.bf16.mxu1 %v8330_v51  ;;  %v3360_v24 = vmul.f32 %v3344_v55, %v175_v48  ;;  %v3362_v30 = vmul.f32 %v3346_v3, %v177_v57  ;;  %v3437_v46 = vld [vmem:[#allocation9 + $0x1a8] sm:$0xff]  ;;  %v3452_v3 = vld [vmem:[#allocation9 + $0x220] sm:$0xff] }
 0x1fe   :  { %v3353_v18 = vmax.f32 %v2825_v15, 0.0  ;;  %v3355_v26 = vmax.f32 %v2997_v19, 0.0  ;;  %v3361_v31 = vmul.f32 %v3345_v6, %v176_v4  ;;  %v3363_v34 = vmul.f32 %v3347_v12, %v178_v11  ;;  %v3441_v55 = vld [vmem:[#allocation9 + $0x1c8] sm:$0xff]  ;;  %v3456_v12 = vld [vmem:[#allocation9 + $0x240] sm:$0xff] }
 0x1ff   :  { %v3368_v25 = vmul.f32 %v3352_v13, %v175_v48  ;;  %v3370_v32 = vmul.f32 %v3354_v17, %v177_v57  ;;  %v8345_v48 = vcombine.low %v3425_v29, %v3429_v20  ;;  %v8352_v50 = vcombine.high %v3432_v42, %v3436_v43  ;;  %v3445_v57 = vld [vmem:[#allocation9 + $0x1e8] sm:$0xff]  ;;  %v3460_v13 = vld [vmem:[#allocation9 + $0x260] sm:$0xff] }
 0x200   :  { %v3369_v33 = vmul.f32 %v3353_v18, %v176_v4  ;;  %6463 = vmatpush1.bf16.msra.mxu0 %v8327_v63  ;;  %v3371_v36 = vmul.f32 %v3355_v26, %v178_v11  ;;  %6635 = vmatpush1.bf16.msra.mxu1 %v8329_v9  ;;  %v8354_v51 = vcombine.high %v3433_v45, %v3437_v46  ;;  %v3449_v4 = vld [vmem:[#allocation9 + $0x208] sm:$0xff]  ;;  %v3472_v29 = vld [vmem:[#allocation9 + $0x2c0] sm:$0xff] }
 0x201   :  { %v9513_v35 = vpack.c.bf16 %v3368_v25, %v3360_v24  ;;  %6464 = vmatprep.subr.bf16.mxu0 %v8336_v16  ;;  %v9515_v37 = vpack.c.bf16 %v3370_v32, %v3362_v30  ;;  %6636 = vmatprep.subr.bf16.mxu1 %v8338_v22  ;;  %v8351_v59 = vcombine.low %v3432_v42, %v3436_v43  ;;  %v3453_v6 = vld [vmem:[#allocation9 + $0x228] sm:$0xff]  ;;  %v3468_v22 = vld [vmem:[#allocation9 + $0x2a0] sm:$0xff] }
 0x202   :  { %v9517_v38 = vpack.c.bf16 %v3369_v33, %v3361_v31  ;;  %v9519_v44 = vpack.c.bf16 %v3371_v36, %v3363_v34  ;;  %v8353_v60 = vcombine.low %v3433_v45, %v3437_v46  ;;  %v8360_v63 = vcombine.high %v3440_v52, %v3444_v54  ;;  %v3457_v14 = vld [vmem:[#allocation9 + $0x248] sm:$0xff]  ;;  %v3476_v20 = vld [vmem:[#allocation9 + $0x2e0] sm:$0xff] }
 0x203   :  { %v8362_v0 = vcombine.high %v3441_v55, %v3445_v57  ;;  %v8361_v8 = vcombine.low %v3441_v55, %v3445_v57  ;;  %v8368_v9 = vcombine.high %v3448_v1, %v3452_v3  ;;  %v8370_v11 = vcombine.high %v3449_v4, %v3453_v6  ;;  %v3461_v15 = vld [vmem:[#allocation9 + $0x268] sm:$0xff] }
 0x204   :  { %6465 = vmatpush1.bf16.msra.mxu0 %v8335_v21  ;;  %6488 = vmatprep.mubr.bf16.mxu0 %v9517_v38  ;;  %v8367_v16 = vcombine.low %v3448_v1, %v3452_v3  ;;  %v8369_v17 = vcombine.low %v3449_v4, %v3453_v6  ;;  %v8376_v18 = vcombine.high %v3456_v12, %v3460_v13  ;;  %v3464_v21 = vld [vmem:[#allocation9 + $0x280] sm:$0xff]  ;;  %v3469_v24 = vld [vmem:[#allocation9 + $0x2a8] sm:$0xff] }
 0x205   :  { %6637 = vmatpush1.bf16.msra.mxu1 %v8337_v27  ;;  %6660 = vmatprep.mubr.bf16.mxu1 %v9517_v38  ;;  %v8378_v19 = vcombine.high %v3457_v14, %v3461_v15  ;;  %v8375_v25 = vcombine.low %v3456_v12, %v3460_v13  ;;  %v8377_v26 = vcombine.low %v3457_v14, %v3461_v15  ;;  %v3473_v30 = vld [vmem:[#allocation9 + $0x2c8] sm:$0xff] }
 0x206   :  { %6466 = vmatprep.subr.bf16.mxu0 %v8344_v39  ;;  %6638 = vmatprep.subr.bf16.mxu1 %v8346_v41  ;;  %v8384_v27 = vcombine.high %v3464_v21, %v3468_v22  ;;  %v8386_v28 = vcombine.high %v3465_v23, %v3469_v24  ;;  %v3477_v31 = vld [vmem:[#allocation9 + $0x2e8] sm:$0xff]  ;;  %v8383_v32 = vcombine.low %v3464_v21, %v3468_v22  ;;  %v3480_v39 = vld [vmem:[#allocation9 + $0x300] sm:$0xff] }
 0x207   :  { %v8385_v33 = vcombine.low %v3465_v23, %v3469_v24  ;;  %v8392_v34 = vcombine.high %v3472_v29, %v3476_v20  ;;  %v8394_v36 = vcombine.high %v3473_v30, %v3477_v31  ;;  %v3484_v41 = vld [vmem:[#allocation9 + $0x320] sm:$0xff]  ;;  %v3481_v42 = vld [vmem:[#allocation9 + $0x308] sm:$0xff]  ;;  %v8391_v45 = vcombine.low %v3472_v29, %v3476_v20 }
 0x208   :  { %6467 = vmatpush1.bf16.msra.mxu0 %v8343_v47  ;;  %v3485_v43 = vld [vmem:[#allocation9 + $0x328] sm:$0xff]  ;;  %v8393_v46 = vcombine.low %v3473_v30, %v3477_v31  ;;  %v8400_v47 = vcombine.high %v3480_v39, %v3484_v41  ;;  %v8399_v55 = vcombine.low %v3480_v39, %v3484_v41 }
 0x209   :  { %6639 = vmatpush1.bf16.msra.mxu1 %v8345_v48  ;;  %6468 = vmatprep.subr.bf16.mxu0 %v8352_v50  ;;  %v8402_v48 = vcombine.high %v3481_v42, %v3485_v43  ;;  %v3488_v50 = vld [vmem:[#allocation9 + $0x340] sm:$0xff]  ;;  %v3489_v52 = vld [vmem:[#allocation9 + $0x348] sm:$0xff]  ;;  %v8401_v57 = vcombine.low %v3481_v42, %v3485_v43 }
 0x20a   :  { %6640 = vmatprep.subr.bf16.mxu1 %v8354_v51  ;;  %v3492_v51 = vld [vmem:[#allocation9 + $0x360] sm:$0xff]  ;;  %v3493_v54 = vld [vmem:[#allocation9 + $0x368] sm:$0xff] }
 0x20b   :  { %v3497_v1 = vld [vmem:[#allocation9 + $0x388] sm:$0xff]  ;;  %v8407_v4 = vcombine.low %v3488_v50, %v3492_v51  ;;  %v8409_v6 = vcombine.low %v3489_v52, %v3493_v54 }
 0x20c   :  { %6469 = vmatpush1.bf16.msra.mxu0 %v8351_v59  ;;  %v8408_v59 = vcombine.high %v3488_v50, %v3492_v51  ;;  %v3501_v3 = vld [vmem:[#allocation9 + $0x3a8] sm:$0xff] }
 0x20d   :  { %6641 = vmatpush1.bf16.msra.mxu1 %v8353_v60  ;;  %6470 = vmatprep.subr.bf16.mxu0 %v8360_v63  ;;  %v8410_v60 = vcombine.high %v3489_v52, %v3493_v54  ;;  %v3496_v63 = vld [vmem:[#allocation9 + $0x380] sm:$0xff]  ;;  %v3505_v12 = vld [vmem:[#allocation9 + $0x3c8] sm:$0xff]  ;;  %v8417_v15 = vcombine.low %v3497_v1, %v3501_v3 }
 0x20e   :  { %6642 = vmatprep.subr.bf16.mxu1 %v8362_v0  ;;  %v3500_v0 = vld [vmem:[#allocation9 + $0x3a0] sm:$0xff]  ;;  %v3509_v13 = vld [vmem:[#allocation9 + $0x3e8] sm:$0xff] }
 0x20f   :  { %v8415_v14 = vcombine.low %v3496_v63, %v3500_v0  ;;  %v3513_v21 = vld [vmem:[#allocation9 + $0x408] sm:$0xff]  ;;  %v8425_v24 = vcombine.low %v3505_v12, %v3509_v13 }
 0x210   :  { %6471 = vmatpush1.bf16.msra.mxu0 %v8359_v7  ;;  %v8416_v7 = vcombine.high %v3496_v63, %v3500_v0  ;;  %v3517_v22 = vld [vmem:[#allocation9 + $0x428] sm:$0xff] }
 0x211   :  { %6643 = vmatpush1.bf16.msra.mxu1 %v8361_v8  ;;  %6472 = vmatprep.subr.bf16.mxu0 %v8368_v9  ;;  %v8418_v8 = vcombine.high %v3497_v1, %v3501_v3  ;;  %v3504_v9 = vld [vmem:[#allocation9 + $0x3c0] sm:$0xff]  ;;  %v3521_v20 = vld [vmem:[#allocation9 + $0x448] sm:$0xff]  ;;  %v8433_v31 = vcombine.low %v3513_v21, %v3517_v22 }
 0x212   :  { %6644 = vmatprep.subr.bf16.mxu1 %v8370_v11  ;;  %v3508_v11 = vld [vmem:[#allocation9 + $0x3e0] sm:$0xff]  ;;  %v3525_v30 = vld [vmem:[#allocation9 + $0x468] sm:$0xff] }
 0x213   :  { %v8423_v23 = vcombine.low %v3504_v9, %v3508_v11  ;;  %v3529_v39 = vld [vmem:[#allocation9 + $0x488] sm:$0xff]  ;;  %v8441_v43 = vcombine.low %v3521_v20, %v3525_v30 }
 0x214   :  { %6473 = vmatpush1.bf16.msra.mxu0 %v8367_v16  ;;  %v8424_v16 = vcombine.high %v3504_v9, %v3508_v11  ;;  %v3533_v41 = vld [vmem:[#allocation9 + $0x4a8] sm:$0xff] }
 0x215   :  { %6645 = vmatpush1.bf16.msra.mxu1 %v8369_v17  ;;  %6474 = vmatprep.subr.bf16.mxu0 %v8376_v18  ;;  %v8426_v17 = vcombine.high %v3505_v12, %v3509_v13  ;;  %v3512_v18 = vld [vmem:[#allocation9 + $0x400] sm:$0xff]  ;;  %v3537_v50 = vld [vmem:[#allocation9 + $0x4c8] sm:$0xff]  ;;  %v8449_v54 = vcombine.low %v3529_v39, %v3533_v41 }
 0x216   :  { %6646 = vmatprep.subr.bf16.mxu1 %v8378_v19  ;;  %v3516_v19 = vld [vmem:[#allocation9 + $0x420] sm:$0xff]  ;;  %v3541_v51 = vld [vmem:[#allocation9 + $0x4e8] sm:$0xff] }
 0x217   :  { %v8431_v29 = vcombine.low %v3512_v18, %v3516_v19  ;;  %v3545_v63 = vld [vmem:[#allocation9 + $0x508] sm:$0xff]  ;;  %v8457_v3 = vcombine.low %v3537_v50, %v3541_v51 }
 0x218   :  { %6475 = vmatpush1.bf16.msra.mxu0 %v8375_v25  ;;  %v8432_v25 = vcombine.high %v3512_v18, %v3516_v19  ;;  %v3549_v0 = vld [vmem:[#allocation9 + $0x528] sm:$0xff] }
 0x219   :  { %6647 = vmatpush1.bf16.msra.mxu1 %v8377_v26  ;;  %6476 = vmatprep.subr.bf16.mxu0 %v8384_v27  ;;  %v8434_v26 = vcombine.high %v3513_v21, %v3517_v22  ;;  %v3520_v27 = vld [vmem:[#allocation9 + $0x440] sm:$0xff]  ;;  %v3553_v9 = vld [vmem:[#allocation9 + $0x548] sm:$0xff]  ;;  %v8465_v13 = vcombine.low %v3545_v63, %v3549_v0 }
 0x21a   :  { %6648 = vmatprep.subr.bf16.mxu1 %v8386_v28  ;;  %v3524_v28 = vld [vmem:[#allocation9 + $0x460] sm:$0xff]  ;;  %v3557_v11 = vld [vmem:[#allocation9 + $0x568] sm:$0xff] }
 0x21b   :  { %v8439_v42 = vcombine.low %v3520_v27, %v3524_v28  ;;  %v3561_v18 = vld [vmem:[#allocation9 + $0x588] sm:$0xff]  ;;  %v8473_v22 = vcombine.low %v3553_v9, %v3557_v11 }
 0x21c   :  { %6477 = vmatpush1.bf16.msra.mxu0 %v8383_v32  ;;  %v8440_v32 = vcombine.high %v3520_v27, %v3524_v28  ;;  %v3565_v19 = vld [vmem:[#allocation9 + $0x5a8] sm:$0xff] }
 0x21d   :  { %6649 = vmatpush1.bf16.msra.mxu1 %v8385_v33  ;;  %6478 = vmatprep.subr.bf16.mxu0 %v8392_v34  ;;  %v3528_v33 = vld [vmem:[#allocation9 + $0x480] sm:$0xff]  ;;  %v3569_v27 = vld [vmem:[#allocation9 + $0x5c8] sm:$0xff] }
 0x21e   :  { %6650 = vmatprep.subr.bf16.mxu1 %v8394_v36  ;;  %v3532_v34 = vld [vmem:[#allocation9 + $0x4a0] sm:$0xff]  ;;  %v8442_v36 = vcombine.high %v3521_v20, %v3525_v30  ;;  %v3573_v28 = vld [vmem:[#allocation9 + $0x5e8] sm:$0xff]  ;;  %v8481_v20 = vcombine.low %v3561_v18, %v3565_v19 }
 0x21f   :  { %v8447_v52 = vcombine.low %v3528_v33, %v3532_v34 }
 0x220   :  { %6479 = vmatpush1.bf16.msra.mxu0 %v8391_v45  ;;  %v8448_v45 = vcombine.high %v3528_v33, %v3532_v34  ;;  %v3580_v33 = vld [vmem:[#allocation9 + $0x620] sm:$0xff]  ;;  %v3577_v34 = vld [vmem:[#allocation9 + $0x608] sm:$0xff] }
 0x221   :  { %6651 = vmatpush1.bf16.msra.mxu1 %v8393_v46  ;;  %6480 = vmatprep.subr.bf16.mxu0 %v8400_v47  ;;  %v8450_v46 = vcombine.high %v3529_v39, %v3533_v41  ;;  %v3536_v47 = vld [vmem:[#allocation9 + $0x4c0] sm:$0xff]  ;;  %v8489_v41 = vcombine.low %v3569_v27, %v3573_v28 }
 0x222   :  { %6652 = vmatprep.subr.bf16.mxu1 %v8402_v48  ;;  %v3540_v48 = vld [vmem:[#allocation9 + $0x4e0] sm:$0xff] }
 0x223   :  { %v8455_v1 = vcombine.low %v3536_v47, %v3540_v48 }
 0x224   :  { %6481 = vmatpush1.bf16.msra.mxu0 %v8399_v55  ;;  %v8456_v55 = vcombine.high %v3536_v47, %v3540_v48  ;;  %v3585_v47 = vld [vmem:[#allocation9 + $0x648] sm:$0xff] }
 0x225   :  { %6653 = vmatpush1.bf16.msra.mxu1 %v8401_v57  ;;  %6482 = vmatprep.subr.bf16.mxu0 %v8408_v59  ;;  %v8458_v57 = vcombine.high %v3537_v50, %v3541_v51  ;;  %v3544_v59 = vld [vmem:[#allocation9 + $0x500] sm:$0xff]  ;;  %v3589_v48 = vld [vmem:[#allocation9 + $0x668] sm:$0xff] }
 0x226   :  { %6654 = vmatprep.subr.bf16.mxu1 %v8410_v60  ;;  %v3548_v60 = vld [vmem:[#allocation9 + $0x520] sm:$0xff] }
 0x227   :  { %v8463_v12 = vcombine.low %v3544_v59, %v3548_v60 }
 0x228   :  { %6483 = vmatpush1.bf16.msra.mxu0 %v8407_v4  ;;  %v8464_v4 = vcombine.high %v3544_v59, %v3548_v60  ;;  %v3593_v59 = vld [vmem:[#allocation9 + $0x688] sm:$0xff] }
 0x229   :  { %6655 = vmatpush1.bf16.msra.mxu1 %v8409_v6  ;;  %6484 = vmatprep.subr.bf16.mxu0 %v8416_v7  ;;  %v8466_v6 = vcombine.high %v3545_v63, %v3549_v0  ;;  %v3552_v7 = vld [vmem:[#allocation9 + $0x540] sm:$0xff]  ;;  %v3597_v60 = vld [vmem:[#allocation9 + $0x6a8] sm:$0xff]  ;;  %v8505_v0 = vcombine.low %v3585_v47, %v3589_v48 }
 0x22a   :  { %6656 = vmatprep.subr.bf16.mxu1 %v8418_v8  ;;  %v3556_v8 = vld [vmem:[#allocation9 + $0x560] sm:$0xff] }
 0x22b   :  { %v8471_v21 = vcombine.low %v3552_v7, %v3556_v8 }
 0x22c   :  { %6485 = vmatpush1.bf16.msra.mxu0 %v8415_v14  ;;  %v8472_v14 = vcombine.high %v3552_v7, %v3556_v8  ;;  %v3601_v7 = vld [vmem:[#allocation9 + $0x6c8] sm:$0xff] }
 0x22d   :  { %6657 = vmatpush1.bf16.msra.mxu1 %v8417_v15  ;;  %6486 = vmatprep.subr.bf16.mxu0 %v8424_v16  ;;  %v8474_v15 = vcombine.high %v3553_v9, %v3557_v11  ;;  %v3560_v16 = vld [vmem:[#allocation9 + $0x580] sm:$0xff]  ;;  %v3605_v8 = vld [vmem:[#allocation9 + $0x6e8] sm:$0xff]  ;;  %v8513_v11 = vcombine.low %v3593_v59, %v3597_v60 }
 0x22e   :  { %6658 = vmatprep.subr.bf16.mxu1 %v8426_v17  ;;  %v3564_v17 = vld [vmem:[#allocation9 + $0x5a0] sm:$0xff] }
 0x230   :  { %6487 = vmatpush1.bf16.msra.mxu0 %v8423_v23  ;;  %v8480_v23 = vcombine.high %v3560_v16, %v3564_v17 }
 0x231   :  { %6659 = vmatpush1.bf16.msra.mxu1 %v8425_v24  ;;  %6499 = vmatprep.subr.bf16.mxu0 %v8432_v25  ;;  %v8482_v24 = vcombine.high %v3561_v18, %v3565_v19  ;;  %v3568_v25 = vld [vmem:[#allocation9 + $0x5c0] sm:$0xff]  ;;  %v8521_v19 = vcombine.low %v3601_v7, %v3605_v8 }
 0x232   :  { %6671 = vmatprep.subr.bf16.mxu1 %v8434_v26  ;;  %v3572_v26 = vld [vmem:[#allocation9 + $0x5e0] sm:$0xff] }
 0x233   :  { %6489 = vmatmul.mubr.bf16.vlgmr.msra.gmra.mrb[8].mxu0 %v9513_v35  ;;  %v8488_v30 = vcombine.high %v3568_v25, %v3572_v26  ;;  %v8487_v39 = vcombine.low %v3568_v25, %v3572_v26  ;;  %v3617_v25 = vld [vmem:[#allocation9 + $0x748] sm:$0xff] }
 0x234   :  { %6661 = vmatmul.mubr.bf16.vlgmr.msra.gmra.mrb[8].mxu1 %v9513_v35  ;;  %6500 = vmatpush1.bf16.msra.mxu0 %v8431_v29  ;;  %v8479_v29 = vcombine.low %v3560_v16, %v3564_v17  ;;  %v3609_v16 = vld [vmem:[#allocation9 + $0x708] sm:$0xff] }
 0x235   :  { %6531 = vmatprep.mubr.bf16.mxu0 %v9519_v44  ;;  %6672 = vmatpush1.bf16.msra.mxu1 %v8433_v31  ;;  %v8490_v31 = vcombine.high %v3569_v27, %v3573_v28  ;;  %v3613_v17 = vld [vmem:[#allocation9 + $0x728] sm:$0xff] }
 0x236   :  { %6703 = vmatprep.mubr.bf16.mxu1 %v9519_v44  ;;  %6501 = vmatprep.subr.bf16.mxu0 %v8440_v32  ;;  %v3576_v32 = vld [vmem:[#allocation9 + $0x600] sm:$0xff]  ;;  %v3621_v26 = vld [vmem:[#allocation9 + $0x768] sm:$0xff]  ;;  %v8529_v28 = vcombine.low %v3609_v16, %v3613_v17 }
 0x237   :  { %6673 = vmatprep.subr.bf16.mxu1 %v8442_v36  ;;  %v3581_v36 = vld [vmem:[#allocation9 + $0x628] sm:$0xff]  ;;  %v8495_v50 = vcombine.low %v3576_v32, %v3580_v33 }
 0x238   :  { %6502 = vmatpush1.bf16.msra.mxu0 %v8439_v42  ;;  %v8496_v42 = vcombine.high %v3576_v32, %v3580_v33  ;;  %v8497_v51 = vcombine.low %v3577_v34, %v3581_v36  ;;  %v3625_v32 = vld [vmem:[#allocation9 + $0x788] sm:$0xff] }
 0x239   :  { %6674 = vmatpush1.bf16.msra.mxu1 %v8441_v43  ;;  %6503 = vmatprep.subr.bf16.mxu0 %v8448_v45  ;;  %v8498_v43 = vcombine.high %v3577_v34, %v3581_v36  ;;  %v3584_v45 = vld [vmem:[#allocation9 + $0x640] sm:$0xff]  ;;  %v3629_v33 = vld [vmem:[#allocation9 + $0x7a8] sm:$0xff]  ;;  %v8537_v36 = vcombine.low %v3617_v25, %v3621_v26 }
 0x23a   :  { %6675 = vmatprep.subr.bf16.mxu1 %v8450_v46  ;;  %v3588_v46 = vld [vmem:[#allocation9 + $0x660] sm:$0xff] }
 0x23b   :  { %v8503_v63 = vcombine.low %v3584_v45, %v3588_v46 }
 0x23c   :  { %6504 = vmatpush1.bf16.msra.mxu0 %v8447_v52  ;;  %v8504_v52 = vcombine.high %v3584_v45, %v3588_v46  ;;  %v3633_v45 = vld [vmem:[#allocation9 + $0x7c8] sm:$0xff] }
 0x23d   :  { %6676 = vmatpush1.bf16.msra.mxu1 %v8449_v54  ;;  %6505 = vmatprep.subr.bf16.mxu0 %v8456_v55  ;;  %v8506_v54 = vcombine.high %v3585_v47, %v3589_v48  ;;  %v3592_v55 = vld [vmem:[#allocation9 + $0x680] sm:$0xff]  ;;  %v3637_v46 = vld [vmem:[#allocation9 + $0x7e8] sm:$0xff]  ;;  %v8545_v48 = vcombine.low %v3625_v32, %v3629_v33 }
 0x23e   :  { %6677 = vmatprep.subr.bf16.mxu1 %v8458_v57  ;;  %v3596_v57 = vld [vmem:[#allocation9 + $0x6a0] sm:$0xff] }
 0x23f   :  { %v8511_v9 = vcombine.low %v3592_v55, %v3596_v57 }
 0x240   :  { %6506 = vmatpush1.bf16.msra.mxu0 %v8455_v1  ;;  %v8512_v1 = vcombine.high %v3592_v55, %v3596_v57  ;;  %v3641_v55 = vld [vmem:[#allocation9 + $0x808] sm:$0xff] }
 0x241   :  { %6678 = vmatpush1.bf16.msra.mxu1 %v8457_v3  ;;  %6507 = vmatprep.subr.bf16.mxu0 %v8464_v4  ;;  %v8514_v3 = vcombine.high %v3593_v59, %v3597_v60  ;;  %v3600_v4 = vld [vmem:[#allocation9 + $0x6c0] sm:$0xff]  ;;  %v3645_v57 = vld [vmem:[#allocation9 + $0x828] sm:$0xff]  ;;  %v8553_v60 = vcombine.low %v3633_v45, %v3637_v46 }
 0x242   :  { %6679 = vmatprep.subr.bf16.mxu1 %v8466_v6  ;;  %v3604_v6 = vld [vmem:[#allocation9 + $0x6e0] sm:$0xff] }
 0x243   :  { %v8519_v18 = vcombine.low %v3600_v4, %v3604_v6 }
 0x244   :  { %6508 = vmatpush1.bf16.msra.mxu0 %v8463_v12  ;;  %v8520_v12 = vcombine.high %v3600_v4, %v3604_v6  ;;  %v3649_v4 = vld [vmem:[#allocation9 + $0x848] sm:$0xff] }
 0x245   :  { %6680 = vmatpush1.bf16.msra.mxu1 %v8465_v13  ;;  %6509 = vmatprep.subr.bf16.mxu0 %v8472_v14  ;;  %v8522_v13 = vcombine.high %v3601_v7, %v3605_v8  ;;  %v3608_v14 = vld [vmem:[#allocation9 + $0x700] sm:$0xff]  ;;  %v3653_v6 = vld [vmem:[#allocation9 + $0x868] sm:$0xff]  ;;  %v8561_v8 = vcombine.low %v3641_v55, %v3645_v57 }
 0x246   :  { %6681 = vmatprep.subr.bf16.mxu1 %v8474_v15  ;;  %v3612_v15 = vld [vmem:[#allocation9 + $0x720] sm:$0xff] }
 0x247   :  { %v8527_v27 = vcombine.low %v3608_v14, %v3612_v15 }
 0x248   :  { %6510 = vmatpush1.bf16.msra.mxu0 %v8471_v21  ;;  %v8528_v21 = vcombine.high %v3608_v14, %v3612_v15  ;;  %v3657_v14 = vld [vmem:[#allocation9 + $0x888] sm:$0xff] }
 0x249   :  { %6682 = vmatpush1.bf16.msra.mxu1 %v8473_v22  ;;  %6511 = vmatprep.subr.bf16.mxu0 %v8480_v23  ;;  %v8530_v22 = vcombine.high %v3609_v16, %v3613_v17  ;;  %v3616_v23 = vld [vmem:[#allocation9 + $0x740] sm:$0xff]  ;;  %v3661_v15 = vld [vmem:[#allocation9 + $0x8a8] sm:$0xff]  ;;  %v8569_v17 = vcombine.low %v3649_v4, %v3653_v6 }
 0x24a   :  { %6683 = vmatprep.subr.bf16.mxu1 %v8482_v24  ;;  %v3620_v24 = vld [vmem:[#allocation9 + $0x760] sm:$0xff] }
 0x24b   :  { %v8535_v34 = vcombine.low %v3616_v23, %v3620_v24 }
 0x24c   :  { %6512 = vmatpush1.bf16.msra.mxu0 %v8479_v29  ;;  %v8536_v29 = vcombine.high %v3616_v23, %v3620_v24  ;;  %v3665_v23 = vld [vmem:[#allocation9 + $0x8c8] sm:$0xff] }
 0x24d   :  { %6684 = vmatpush1.bf16.msra.mxu1 %v8481_v20  ;;  %6513 = vmatprep.subr.bf16.mxu0 %v8488_v30  ;;  %v8538_v20 = vcombine.high %v3617_v25, %v3621_v26  ;;  %v3624_v30 = vld [vmem:[#allocation9 + $0x780] sm:$0xff]  ;;  %v3669_v24 = vld [vmem:[#allocation9 + $0x8e8] sm:$0xff]  ;;  %v8577_v26 = vcombine.low %v3657_v14, %v3661_v15 }
 0x24e   :  { %6685 = vmatprep.subr.bf16.mxu1 %v8490_v31  ;;  %v3628_v31 = vld [vmem:[#allocation9 + $0x7a0] sm:$0xff] }
 0x24f   :  { %v8543_v47 = vcombine.low %v3624_v30, %v3628_v31 }
 0x250   :  { %6514 = vmatpush1.bf16.msra.mxu0 %v8487_v39  ;;  %v8544_v39 = vcombine.high %v3624_v30, %v3628_v31  ;;  %v3673_v30 = vld [vmem:[#allocation9 + $0x908] sm:$0xff] }
 0x251   :  { %6686 = vmatpush1.bf16.msra.mxu1 %v8489_v41  ;;  %6515 = vmatprep.subr.bf16.mxu0 %v8496_v42  ;;  %v8546_v41 = vcombine.high %v3625_v32, %v3629_v33  ;;  %v3632_v42 = vld [vmem:[#allocation9 + $0x7c0] sm:$0xff]  ;;  %v3677_v31 = vld [vmem:[#allocation9 + $0x928] sm:$0xff]  ;;  %v8585_v33 = vcombine.low %v3665_v23, %v3669_v24 }
 0x252   :  { %6687 = vmatprep.subr.bf16.mxu1 %v8498_v43  ;;  %v3636_v43 = vld [vmem:[#allocation9 + $0x7e0] sm:$0xff] }
 0x253   :  { %v8551_v59 = vcombine.low %v3632_v42, %v3636_v43 }
 0x254   :  { %6516 = vmatpush1.bf16.msra.mxu0 %v8495_v50  ;;  %v8552_v50 = vcombine.high %v3632_v42, %v3636_v43  ;;  %v3681_v42 = vld [vmem:[#allocation9 + $0x948] sm:$0xff] }
 0x255   :  { %6688 = vmatpush1.bf16.msra.mxu1 %v8497_v51  ;;  %6517 = vmatprep.subr.bf16.mxu0 %v8504_v52  ;;  %v8554_v51 = vcombine.high %v3633_v45, %v3637_v46  ;;  %v3640_v52 = vld [vmem:[#allocation9 + $0x800] sm:$0xff]  ;;  %v3685_v43 = vld [vmem:[#allocation9 + $0x968] sm:$0xff]  ;;  %v8593_v46 = vcombine.low %v3673_v30, %v3677_v31 }
 0x256   :  { %6689 = vmatprep.subr.bf16.mxu1 %v8506_v54  ;;  %v3644_v54 = vld [vmem:[#allocation9 + $0x820] sm:$0xff] }
 0x257   :  { %v8559_v7 = vcombine.low %v3640_v52, %v3644_v54 }
 0x258   :  { %6518 = vmatpush1.bf16.msra.mxu0 %v8503_v63  ;;  %v8560_v63 = vcombine.high %v3640_v52, %v3644_v54  ;;  %v3689_v52 = vld [vmem:[#allocation9 + $0x988] sm:$0xff] }
 0x259   :  { %6690 = vmatpush1.bf16.msra.mxu1 %v8505_v0  ;;  %6519 = vmatprep.subr.bf16.mxu0 %v8512_v1  ;;  %v8562_v0 = vcombine.high %v3641_v55, %v3645_v57  ;;  %v3648_v1 = vld [vmem:[#allocation9 + $0x840] sm:$0xff]  ;;  %v3693_v54 = vld [vmem:[#allocation9 + $0x9a8] sm:$0xff]  ;;  %v8601_v57 = vcombine.low %v3681_v42, %v3685_v43 }
 0x25a   :  { %6691 = vmatprep.subr.bf16.mxu1 %v8514_v3  ;;  %v3652_v3 = vld [vmem:[#allocation9 + $0x860] sm:$0xff] }
 0x25b   :  { %v8567_v16 = vcombine.low %v3648_v1, %v3652_v3 }
 0x25c   :  { %6520 = vmatpush1.bf16.msra.mxu0 %v8511_v9  ;;  %v8568_v9 = vcombine.high %v3648_v1, %v3652_v3  ;;  %v3697_v1 = vld [vmem:[#allocation9 + $0x9c8] sm:$0xff] }
 0x25d   :  { %6692 = vmatpush1.bf16.msra.mxu1 %v8513_v11  ;;  %6521 = vmatprep.subr.bf16.mxu0 %v8520_v12  ;;  %v8570_v11 = vcombine.high %v3649_v4, %v3653_v6  ;;  %v3656_v12 = vld [vmem:[#allocation9 + $0x880] sm:$0xff]  ;;  %v3701_v3 = vld [vmem:[#allocation9 + $0x9e8] sm:$0xff]  ;;  %v8609_v6 = vcombine.low %v3689_v52, %v3693_v54 }
 0x25e   :  { %6693 = vmatprep.subr.bf16.mxu1 %v8522_v13  ;;  %v3660_v13 = vld [vmem:[#allocation9 + $0x8a0] sm:$0xff] }
 0x25f   :  { %v8575_v25 = vcombine.low %v3656_v12, %v3660_v13 }
 0x260   :  { %6522 = vmatpush1.bf16.msra.mxu0 %v8519_v18  ;;  %v8576_v18 = vcombine.high %v3656_v12, %v3660_v13  ;;  %v3705_v12 = vld [vmem:[#allocation9 + $0xa08] sm:$0xff] }
 0x261   :  { %6694 = vmatpush1.bf16.msra.mxu1 %v8521_v19  ;;  %6523 = vmatprep.subr.bf16.mxu0 %v8528_v21  ;;  %v8578_v19 = vcombine.high %v3657_v14, %v3661_v15  ;;  %v3664_v21 = vld [vmem:[#allocation9 + $0x8c0] sm:$0xff]  ;;  %v3709_v13 = vld [vmem:[#allocation9 + $0xa28] sm:$0xff]  ;;  %v8617_v15 = vcombine.low %v3697_v1, %v3701_v3 }
 0x262   :  { %6695 = vmatprep.subr.bf16.mxu1 %v8530_v22  ;;  %v3668_v22 = vld [vmem:[#allocation9 + $0x8e0] sm:$0xff] }
 0x263   :  { %v8583_v32 = vcombine.low %v3664_v21, %v3668_v22 }
 0x264   :  { %6524 = vmatpush1.bf16.msra.mxu0 %v8527_v27  ;;  %v8584_v27 = vcombine.high %v3664_v21, %v3668_v22  ;;  %v3713_v21 = vld [vmem:[#allocation9 + $0xa48] sm:$0xff] }
 0x265   :  { %6696 = vmatpush1.bf16.msra.mxu1 %v8529_v28  ;;  %6525 = vmatprep.subr.bf16.mxu0 %v8536_v29  ;;  %v8586_v28 = vcombine.high %v3665_v23, %v3669_v24  ;;  %v3672_v29 = vld [vmem:[#allocation9 + $0x900] sm:$0xff]  ;;  %v3717_v22 = vld [vmem:[#allocation9 + $0xa68] sm:$0xff]  ;;  %v8625_v24 = vcombine.low %v3705_v12, %v3709_v13 }
 0x266   :  { %6697 = vmatprep.subr.bf16.mxu1 %v8538_v20  ;;  %v3676_v20 = vld [vmem:[#allocation9 + $0x920] sm:$0xff] }
 0x267   :  { %v8591_v45 = vcombine.low %v3672_v29, %v3676_v20 }
 0x268   :  { %6526 = vmatpush1.bf16.msra.mxu0 %v8535_v34  ;;  %v8592_v34 = vcombine.high %v3672_v29, %v3676_v20  ;;  %v3721_v29 = vld [vmem:[#allocation9 + $0xa88] sm:$0xff] }
 0x269   :  { %6698 = vmatpush1.bf16.msra.mxu1 %v8537_v36  ;;  %6527 = vmatprep.subr.bf16.mxu0 %v8544_v39  ;;  %v8594_v36 = vcombine.high %v3673_v30, %v3677_v31  ;;  %v3680_v39 = vld [vmem:[#allocation9 + $0x940] sm:$0xff]  ;;  %v3725_v20 = vld [vmem:[#allocation9 + $0xaa8] sm:$0xff]  ;;  %v9530_v31 = vadd.s32 512, %v9470_v40 }
 0x26a   :  { %6699 = vmatprep.subr.bf16.mxu1 %v8546_v41  ;;  %v3684_v41 = vld [vmem:[#allocation9 + $0x960] sm:$0xff] }
 0x26b   :  { %v8599_v55 = vcombine.low %v3680_v39, %v3684_v41 }
 0x26c   :  { %6528 = vmatpush1.bf16.msra.mxu0 %v8543_v47  ;;  %v8600_v47 = vcombine.high %v3680_v39, %v3684_v41  ;;  %v3728_v39 = vld [vmem:[#allocation9 + $0xac0] sm:$0xff] }
 0x26d   :  { %6700 = vmatpush1.bf16.msra.mxu1 %v8545_v48  ;;  %6529 = vmatprep.subr.bf16.mxu0 %v8552_v50  ;;  %v8602_v48 = vcombine.high %v3681_v42, %v3685_v43  ;;  %v3688_v50 = vld [vmem:[#allocation9 + $0x980] sm:$0xff]  ;;  %v9536_v42 = vadd.s32 640, %v9470_v40  ;;  %v3729_v43 = vld [vmem:[#allocation9 + $0xac8] sm:$0xff] }
 0x26e   :  { %6701 = vmatprep.subr.bf16.mxu1 %v8554_v51  ;;  %v3692_v51 = vld [vmem:[#allocation9 + $0x9a0] sm:$0xff] }
 0x26f   :  { %v8607_v4 = vcombine.low %v3688_v50, %v3692_v51  ;;  %v3732_v41 = vld [vmem:[#allocation9 + $0xae0] sm:$0xff] }
 0x270   :  { %6530 = vmatpush1.bf16.msra.mxu0 %v8551_v59  ;;  %v8608_v59 = vcombine.high %v3688_v50, %v3692_v51  ;;  %v8641_v50 = vcombine.low %v3721_v29, %v3725_v20  ;;  %v8648_v51 = vcombine.high %v3728_v39, %v3732_v41 }
 0x271   :  { %6702 = vmatpush1.bf16.msra.mxu1 %v8553_v60  ;;  %6542 = vmatprep.subr.bf16.mxu0 %v8560_v63  ;;  %v8610_v60 = vcombine.high %v3689_v52, %v3693_v54  ;;  %v3696_v63 = vld [vmem:[#allocation9 + $0x9c0] sm:$0xff] }
 0x272   :  { %6714 = vmatprep.subr.bf16.mxu1 %v8562_v0  ;;  %v3700_v0 = vld [vmem:[#allocation9 + $0x9e0] sm:$0xff] }
 0x273   :  { %6532 = vmatmul.mubr.bf16.vlgmr.msra.gmra.mrb[8].mxu0 %v9515_v37  ;;  %v8615_v14 = vcombine.low %v3696_v63, %v3700_v0 }
 0x274   :  { %6704 = vmatmul.mubr.bf16.vlgmr.msra.gmra.mrb[8].mxu1 %v9515_v37  ;;  %6543 = vmatpush1.bf16.msra.mxu0 %v8559_v7  ;;  %v8616_v7 = vcombine.high %v3696_v63, %v3700_v0  ;;  %v3741_v63 = vld [vmem:[#allocation9 + $0xb28] sm:$0xff] }
 0x275   :  { %6715 = vmatpush1.bf16.msra.mxu1 %v8561_v8  ;;  %6544 = vmatprep.subr.bf16.mxu0 %v8568_v9  ;;  %v8618_v8 = vcombine.high %v3697_v1, %v3701_v3  ;;  %v3704_v9 = vld [vmem:[#allocation9 + $0xa00] sm:$0xff]  ;;  %v8647_v1 = vcombine.low %v3728_v39, %v3732_v41 }
 0x276   :  { %6716 = vmatprep.subr.bf16.mxu1 %v8570_v11  ;;  %v3708_v11 = vld [vmem:[#allocation9 + $0xa20] sm:$0xff] }
 0x277   :  { %v8623_v23 = vcombine.low %v3704_v9, %v3708_v11  ;;  %v3760_v39 = vld [vmem:[#allocation9 + $0xbc0] sm:$0xff] }
 0x278   :  { %6545 = vmatpush1.bf16.msra.mxu0 %v8567_v16  ;;  %v8624_v16 = vcombine.high %v3704_v9, %v3708_v11  ;;  %v3744_v9 = vld [vmem:[#allocation9 + $0xb40] sm:$0xff] }
 0x279   :  { %6717 = vmatpush1.bf16.msra.mxu1 %v8569_v17  ;;  %6546 = vmatprep.subr.bf16.mxu0 %v8576_v18  ;;  %v8626_v17 = vcombine.high %v3705_v12, %v3709_v13  ;;  %v3712_v18 = vld [vmem:[#allocation9 + $0xa40] sm:$0xff]  ;;  %v3745_v13 = vld [vmem:[#allocation9 + $0xb48] sm:$0xff] }
 0x27a   :  { %6718 = vmatprep.subr.bf16.mxu1 %v8578_v19  ;;  %v3716_v19 = vld [vmem:[#allocation9 + $0xa60] sm:$0xff] }
 0x27b   :  { %v8631_v30 = vcombine.low %v3712_v18, %v3716_v19  ;;  %v3748_v11 = vld [vmem:[#allocation9 + $0xb60] sm:$0xff] }
 0x27c   :  { %6547 = vmatpush1.bf16.msra.mxu0 %v8575_v25  ;;  %v8632_v25 = vcombine.high %v3712_v18, %v3716_v19  ;;  %v8664_v19 = vcombine.high %v3744_v9, %v3748_v11  ;;  %v3764_v41 = vld [vmem:[#allocation9 + $0xbe0] sm:$0xff] }
 0x27d   :  { %6719 = vmatpush1.bf16.msra.mxu1 %v8577_v26  ;;  %6548 = vmatprep.subr.bf16.mxu0 %v8584_v27  ;;  %v8634_v26 = vcombine.high %v3713_v21, %v3717_v22  ;;  %v3720_v27 = vld [vmem:[#allocation9 + $0xa80] sm:$0xff] }
 0x27e   :  { %6720 = vmatprep.subr.bf16.mxu1 %v8586_v28  ;;  %v3724_v28 = vld [vmem:[#allocation9 + $0xaa0] sm:$0xff] }
 0x280   :  { %6549 = vmatpush1.bf16.msra.mxu0 %v8583_v32  ;;  %v8633_v32 = vcombine.low %v3713_v21, %v3717_v22 }
 0x281   :  { %6721 = vmatpush1.bf16.msra.mxu1 %v8585_v33  ;;  %6550 = vmatprep.subr.bf16.mxu0 %v8592_v34  ;;  %v8640_v33 = vcombine.high %v3720_v27, %v3724_v28  ;;  %v9533_v34 = vadd.s32 768, %v9470_v40 }
 0x282   :  { %6722 = vmatprep.subr.bf16.mxu1 %v8594_v36  ;;  %v8642_v36 = vcombine.high %v3721_v29, %v3725_v20 }
 0x283   :  { %v106_v52 = vcvt.s32.f32 %v9533_v34 }
 0x284   :  { %6551 = vmatpush1.bf16.msra.mxu0 %v8591_v45  ;;  %v3733_v45 = vld [vmem:[#allocation9 + $0xae8] sm:$0xff] }
 0x285   :  { %6723 = vmatpush1.bf16.msra.mxu1 %v8593_v46  ;;  %6552 = vmatprep.subr.bf16.mxu0 %v8600_v47  ;;  %v9539_v46 = vadd.s32 896, %v9470_v40  ;;  %v8639_v47 = vcombine.low %v3720_v27, %v3724_v28  ;;  %v8650_v54 = vcombine.high %v3729_v43, %v3733_v45  ;;  %v3753_v27 = vld [vmem:[#allocation9 + $0xb88] sm:$0xff]  ;;  %v8663_v28 = vcombine.low %v3744_v9, %v3748_v11 }
 0x286   :  { %6724 = vmatprep.subr.bf16.mxu1 %v8602_v48  ;;  %v104_v48 = vcvt.s32.f32 %v9530_v31 }
 0x287   :  { %v107_v0 = vcvt.s32.f32 %v9539_v46 }
 0x288   :  { %6553 = vmatpush1.bf16.msra.mxu0 %v8599_v55  ;;  %v3736_v55 = vld [vmem:[#allocation9 + $0xb00] sm:$0xff]  ;;  %v114_v3 = vsub.f32 %v104_v48, %v9485_v61 }
 0x289   :  { %6725 = vmatpush1.bf16.msra.mxu1 %v8601_v57  ;;  %6554 = vmatprep.subr.bf16.mxu0 %v8608_v59  ;;  %v3740_v57 = vld [vmem:[#allocation9 + $0xb20] sm:$0xff]  ;;  %v105_v59 = vcvt.s32.f32 %v9536_v42 }
 0x28a   :  { %6726 = vmatprep.subr.bf16.mxu1 %v8610_v60  ;;  %v3737_v60 = vld [vmem:[#allocation9 + $0xb08] sm:$0xff] }
 0x28b   :  { %v115_v12 = vsub.f32 %v105_v59, %v9485_v61  ;;  %v8657_v18 = vcombine.low %v3737_v60, %v3741_v63 }
 0x28c   :  { %6555 = vmatpush1.bf16.msra.mxu0 %v8607_v4  ;;  %v8649_v4 = vcombine.low %v3729_v43, %v3733_v45  ;;  %v3761_v45 = vld [vmem:[#allocation9 + $0xbc8] sm:$0xff] }
 0x28d   :  { %6727 = vmatpush1.bf16.msra.mxu1 %v8609_v6  ;;  %6556 = vmatprep.subr.bf16.mxu0 %v8616_v7  ;;  %v8656_v6 = vcombine.high %v3736_v55, %v3740_v57  ;;  %v116_v7 = vsub.f32 %v106_v52, %v9485_v61 }
 0x28e   :  { %6728 = vmatprep.subr.bf16.mxu1 %v8618_v8  ;;  %v8658_v8 = vcombine.high %v3737_v60, %v3741_v63  ;;  %v9563_v60 = vld [vmem:[#allocation9 + $0xc20] sm:$0xff]  ;;  %v9565_v63 = vld [vmem:[#allocation9 + $0xc08] sm:$0xff] }
 0x28f   :  { %v125_v21 = vmul.f32 %v9494_v10, %v116_v7 }
 0x290   :  { %6557 = vmatpush1.bf16.msra.mxu0 %v8615_v14  ;;  %v3749_v14 = vld [vmem:[#allocation9 + $0xb68] sm:$0xff] }
 0x291   :  { %6729 = vmatpush1.bf16.msra.mxu1 %v8617_v15  ;;  %6558 = vmatprep.subr.bf16.mxu0 %v8624_v16  ;;  %v117_v15 = vsub.f32 %v107_v0, %v9485_v61  ;;  %v8655_v16 = vcombine.low %v3736_v55, %v3740_v57  ;;  %v8666_v22 = vcombine.high %v3745_v13, %v3749_v14  ;;  %v3757_v61 = vld [vmem:[#allocation9 + $0xba8] sm:$0xff]  ;;  %v9561_v57 = vld [vmem:[#allocation9 + $0xc00] sm:$0xff] }
 0x292   :  { %6730 = vmatprep.subr.bf16.mxu1 %v8626_v17  ;;  %v123_v17 = vmul.f32 %v9494_v10, %v114_v3  ;;  %v8665_v20 = vcombine.low %v3745_v13, %v3749_v14  ;;  %v8679_v3 = vcombine.low %v3760_v39, %v3764_v41 }
 0x294   :  { %6559 = vmatpush1.bf16.msra.mxu0 %v8623_v23  ;;  %v124_v23 = vmul.f32 %v9494_v10, %v115_v12  ;;  %v7888_v29 = vmul.f32 -1.442695, %v123_v17 }
 0x295   :  { %6731 = vmatpush1.bf16.msra.mxu1 %v8625_v24  ;;  %6560 = vmatprep.subr.bf16.mxu0 %v8632_v25  ;;  %v3752_v24 = vld [vmem:[#allocation9 + $0xb80] sm:$0xff] }
 0x296   :  { %6732 = vmatprep.subr.bf16.mxu1 %v8634_v26  ;;  %v3756_v25 = vld [vmem:[#allocation9 + $0xba0] sm:$0xff]  ;;  %v126_v26 = vmul.f32 %v9494_v10, %v117_v15  ;;  %9168 = vpow2.f32 %v7888_v29 }
 0x298   :  { %6561 = vmatpush1.bf16.msra.mxu0 %v8631_v30  ;;  %v7890_v30 = vmul.f32 -1.442695, %v125_v21  ;;  %v7891_v43 = vmul.f32 -1.442695, %v126_v26 }
 0x299   :  { %6733 = vmatpush1.bf16.msra.mxu1 %v8633_v32  ;;  %6562 = vmatprep.subr.bf16.mxu0 %v8640_v33  ;;  %v8672_v32 = vcombine.high %v3752_v24, %v3756_v25  ;;  %v7889_v33 = vmul.f32 -1.442695, %v124_v23 }
 0x29a   :  { %6734 = vmatprep.subr.bf16.mxu1 %v8642_v36  ;;  %v8674_v36 = vcombine.high %v3753_v27, %v3757_v61  ;;  %9170 = vpow2.f32 %v7890_v30 }
 0x29b   :  { %9172 = vpow2.f32 %v7889_v33 }
 0x29c   :  { %6563 = vmatpush1.bf16.msra.mxu0 %v8639_v47  ;;  %v3765_v47 = vld [vmem:[#allocation9 + $0xbe8] sm:$0xff]  ;;  %9174 = vpow2.f32 %v7891_v43 }
 0x29d   :  { %6735 = vmatpush1.bf16.msra.mxu1 %v8641_v50  ;;  %6564 = vmatprep.subr.bf16.mxu0 %v8648_v51  ;;  %v8671_v50 = vcombine.low %v3752_v24, %v3756_v25  ;;  %v8673_v51 = vcombine.low %v3753_v27, %v3757_v61  ;;  %v8682_v55 = vcombine.high %v3761_v45, %v3765_v47 }
 0x29e   :  { %6736 = vmatprep.subr.bf16.mxu1 %v8650_v54  ;;  %v8680_v54 = vcombine.high %v3760_v39, %v3764_v41 }
 0x2a0   :  { %6565 = vmatpush1.bf16.msra.mxu0 %v8647_v1  ;;  %v9567_v1 = vld [vmem:[#allocation9 + $0xc28] sm:$0xff] }
 0x2a1   :  { %6737 = vmatpush1.bf16.msra.mxu1 %v8649_v4  ;;  %6566 = vmatprep.subr.bf16.mxu0 %v8656_v6  ;;  %v8681_v4 = vcombine.low %v3761_v45, %v3765_v47  ;;  %v8688_v6 = vcombine.high %v9561_v57, %v9563_v60  ;;  %v8690_v7 = vcombine.high %v9565_v63, %v9567_v1 }
 0x2a2   :  { %6738 = vmatprep.subr.bf16.mxu1 %v8658_v8  ;;  %v9169_v8 = vpop.eup %9168 }
 0x2a3   :  { %v155_v13 = vadd.f32 1.0, %v9169_v8 }
 0x2a4   :  { %6567 = vmatpush1.bf16.msra.mxu0 %v8655_v16  ;;  %v9171_v9 = vpop.eup %9170 }
 0x2a5   :  { %6739 = vmatpush1.bf16.msra.mxu1 %v8657_v18  ;;  %6568 = vmatprep.subr.bf16.mxu0 %v8664_v19  ;;  %v9173_v11 = vpop.eup %9172  ;;  %v157_v14 = vadd.f32 1.0, %v9171_v9  ;;  %9176 = vrcp.f32 %v155_v13  ;;  %v3777_v13 = vld [vmem:[#allocation9 + $0xc48] sm:$0xff] }
 0x2a6   :  { %6740 = vmatprep.subr.bf16.mxu1 %v8666_v22  ;;  %v9175_v12 = vpop.eup %9174  ;;  %v156_v15 = vadd.f32 1.0, %v9173_v11 }
 0x2a7   :  { %v158_v16 = vadd.f32 1.0, %v9175_v12  ;;  %9178 = vrcp.f32 %v157_v14  ;;  %v3780_v12 = vld [vmem:[#allocation9 + $0xc60] sm:$0xff]  ;;  %v3781_v14 = vld [vmem:[#allocation9 + $0xc68] sm:$0xff] }
 0x2a8   :  { %6569 = vmatpush1.bf16.msra.mxu0 %v8663_v28  ;;  %9180 = vrcp.f32 %v156_v15 }
 0x2a9   :  { %6741 = vmatpush1.bf16.msra.mxu1 %v8665_v20  ;;  %6570 = vmatprep.subr.bf16.mxu0 %v8672_v32  ;;  %9182 = vrcp.f32 %v158_v16 }
 0x2aa   :  { %6742 = vmatprep.subr.bf16.mxu1 %v8674_v36 }
 0x2ac   :  { %6571 = vmatpush1.bf16.msra.mxu0 %v8671_v50 }
 0x2ad   :  { %6743 = vmatpush1.bf16.msra.mxu1 %v8673_v51  ;;  %6572 = vmatprep.subr.bf16.mxu0 %v8680_v54 }
 0x2ae   :  { %6744 = vmatprep.subr.bf16.mxu1 %v8682_v55 }
 0x2af   :  { %v9177_v17 = vpop.eup %9176 }
 0x2b0   :  { %6573 = vmatpush1.bf16.msra.mxu0 %v8679_v3  ;;  %v179_v23 = vsub.f32 1.0, %v9177_v17  ;;  %v8687_v17 = vcombine.low %v9561_v57, %v9563_v60  ;;  %v8697_v60 = vcombine.low %v3777_v13, %v3781_v14 }
 0x2b1   :  { %6745 = vmatpush1.bf16.msra.mxu1 %v8681_v4  ;;  %6585 = vmatprep.subr.bf16.mxu0 %v8688_v6  ;;  %v9179_v18 = vpop.eup %9178 }
 0x2b2   :  { %6757 = vmatprep.subr.bf16.mxu1 %v8690_v7  ;;  %v9181_v19 = vpop.eup %9180  ;;  %v181_v27 = vsub.f32 1.0, %v9179_v18  ;;  %v3776_v7 = vld [vmem:[#allocation9 + $0xc40] sm:$0xff]  ;;  %v8689_v18 = vcombine.low %v9565_v63, %v9567_v1 }
 0x2b3   :  { %v9183_v21 = vpop.eup %9182  ;;  %v180_v28 = vsub.f32 1.0, %v9181_v19  ;;  %v8695_v57 = vcombine.low %v3776_v7, %v3780_v12 }
 0x2b4   :  { %v182_v32 = vsub.f32 1.0, %v9183_v21  ;;  %v3784_v21 = vld [vmem:[#allocation9 + $0xc80] sm:$0xff] }
 0x2c6   :  { %v3163_v22 = vpop.f32.mrb[4].mxu0  ;;  %v3335_v25 = vpop.f32.mrb[4].mxu1 }
 0x2c7   :  { %v3348_v24 = vmax.f32 %v3163_v22, 0.0  ;;  %v3165_v26 = vpop.f32.mrb[5].mxu0  ;;  %v3350_v61 = vmax.f32 %v3335_v25, 0.0  ;;  %v3337_v20 = vpop.f32.mrb[5].mxu1  ;;  %v8696_v22 = vcombine.high %v3776_v7, %v3780_v12  ;;  %v3785_v25 = vld [vmem:[#allocation9 + $0xc88] sm:$0xff]  ;;  %v3816_v12 = vld [vmem:[#allocation9 + $0xd80] sm:$0xff] }
 0x2c8   :  { %v3349_v29 = vmax.f32 %v3165_v26, 0.0  ;;  %v3167_v30 = vpop.f32.mrb[6].mxu0  ;;  %v3351_v33 = vmax.f32 %v3337_v20, 0.0  ;;  %v3339_v39 = vpop.f32.mrb[6].mxu1  ;;  %v3789_v26 = vld [vmem:[#allocation9 + $0xca8] sm:$0xff] }
 0x2c9   :  { %v3356_v36 = vmax.f32 %v3167_v30, 0.0  ;;  %v3169_v41 = vpop.f32.mrb[7].mxu0  ;;  %v3358_v43 = vmax.f32 %v3339_v39, 0.0  ;;  %v3341_v47 = vpop.f32.mrb[7].mxu1  ;;  %v3364_v50 = vmul.f32 %v3348_v24, %v179_v23  ;;  %v3366_v55 = vmul.f32 %v3350_v61, %v181_v27  ;;  %v3788_v24 = vld [vmem:[#allocation9 + $0xca0] sm:$0xff] }
 0x2ca   :  { %v3357_v45 = vmax.f32 %v3169_v41, 0.0  ;;  %v3359_v54 = vmax.f32 %v3341_v47, 0.0  ;;  %v3365_v3 = vmul.f32 %v3349_v29, %v180_v28  ;;  %v3367_v8 = vmul.f32 %v3351_v33, %v182_v32  ;;  %v3796_v61 = vld [vmem:[#allocation9 + $0xce0] sm:$0xff]  ;;  %v3797_v29 = vld [vmem:[#allocation9 + $0xce8] sm:$0xff] }
 0x2cb   :  { %v3372_v51 = vmul.f32 %v3356_v36, %v179_v23  ;;  %v3374_v4 = vmul.f32 %v3358_v43, %v181_v27  ;;  %v8698_v23 = vcombine.high %v3777_v13, %v3781_v14  ;;  %v8704_v63 = vcombine.high %v3784_v21, %v3788_v24  ;;  %v3792_v27 = vld [vmem:[#allocation9 + $0xcc0] sm:$0xff]  ;;  %v3801_v41 = vld [vmem:[#allocation9 + $0xd08] sm:$0xff] }
 0x2cc   :  { %v3373_v6 = vmul.f32 %v3357_v45, %v180_v28  ;;  %v3375_v11 = vmul.f32 %v3359_v54, %v182_v32  ;;  %v8706_v1 = vcombine.high %v3785_v25, %v3789_v26  ;;  %v3793_v28 = vld [vmem:[#allocation9 + $0xcc8] sm:$0xff]  ;;  %v8703_v20 = vcombine.low %v3784_v21, %v3788_v24  ;;  %v3800_v36 = vld [vmem:[#allocation9 + $0xd00] sm:$0xff] }
 0x2cd   :  { %v9573_v9 = vpack.c.bf16 %v3372_v51, %v3364_v50  ;;  %v9575_v15 = vpack.c.bf16 %v3374_v4, %v3366_v55  ;;  %v8705_v30 = vcombine.low %v3785_v25, %v3789_v26  ;;  %v8712_v32 = vcombine.high %v3792_v27, %v3796_v61  ;;  %v3804_v39 = vld [vmem:[#allocation9 + $0xd20] sm:$0xff]  ;;  %v3805_v43 = vld [vmem:[#allocation9 + $0xd28] sm:$0xff] }
 0x2ce   :  { %v9577_v16 = vpack.c.bf16 %v3373_v6, %v3365_v3  ;;  %v9583_v19 = vpack.c.bf16 %v3375_v11, %v3367_v8  ;;  %v8714_v33 = vcombine.high %v3793_v28, %v3797_v29  ;;  %v8711_v45 = vcombine.low %v3792_v27, %v3796_v61  ;;  %v3808_v54 = vld [vmem:[#allocation9 + $0xd40] sm:$0xff]  ;;  %v3809_v3 = vld [vmem:[#allocation9 + $0xd48] sm:$0xff] }
 0x2cf   :  { %v8713_v47 = vcombine.low %v3793_v28, %v3797_v29  ;;  %v8720_v50 = vcombine.high %v3800_v36, %v3804_v39  ;;  %v8722_v51 = vcombine.high %v3801_v41, %v3805_v43  ;;  %v3812_v55 = vld [vmem:[#allocation9 + $0xd60] sm:$0xff]  ;;  %v3813_v4 = vld [vmem:[#allocation9 + $0xd68] sm:$0xff]  ;;  %v8719_v6 = vcombine.low %v3800_v36, %v3804_v39 }
 0x2d0   :  { %6574 = vmatprep.mubr.bf16.mxu0 %v9577_v16  ;;  %6746 = vmatprep.mubr.bf16.mxu1 %v9577_v16  ;;  %v8721_v7 = vcombine.low %v3801_v41, %v3805_v43  ;;  %v8728_v8 = vcombine.high %v3808_v54, %v3812_v55  ;;  %v8730_v11 = vcombine.high %v3809_v3, %v3813_v4  ;;  %v3820_v13 = vld [vmem:[#allocation9 + $0xda0] sm:$0xff]  ;;  %v3817_v14 = vld [vmem:[#allocation9 + $0xd88] sm:$0xff] }
 0x2d1   :  { %6575 = vmatmul.mubr.bf16.vlgmr.msra.gmra.mrb[8].mxu0 %v9573_v9  ;;  %6747 = vmatmul.mubr.bf16.vlgmr.msra.gmra.mrb[8].mxu1 %v9573_v9  ;;  %v8729_v21 = vcombine.low %v3809_v3, %v3813_v4  ;;  %v3824_v24 = vld [vmem:[#allocation9 + $0xdc0] sm:$0xff]  ;;  %v3825_v26 = vld [vmem:[#allocation9 + $0xdc8] sm:$0xff] }
 0x2d2   :  { %6586 = vmatpush1.bf16.msra.mxu0 %v8687_v17  ;;  %6758 = vmatpush1.bf16.msra.mxu1 %v8689_v18  ;;  %v3821_v17 = vld [vmem:[#allocation9 + $0xda8] sm:$0xff]  ;;  %v8727_v18 = vcombine.low %v3808_v54, %v3812_v55  ;;  %v3828_v25 = vld [vmem:[#allocation9 + $0xde0] sm:$0xff] }
 0x2d3   :  { %6617 = vmatprep.mubr.bf16.mxu0 %v9583_v19  ;;  %6789 = vmatprep.mubr.bf16.mxu1 %v9583_v19  ;;  %v3832_v61 = vld [vmem:[#allocation9 + $0xe00] sm:$0xff]  ;;  %v3833_v29 = vld [vmem:[#allocation9 + $0xe08] sm:$0xff] }
 0x2d4   :  { %6587 = vmatprep.subr.bf16.mxu0 %v8696_v22  ;;  %6759 = vmatprep.subr.bf16.mxu1 %v8698_v23  ;;  %v8736_v22 = vcombine.high %v3816_v12, %v3820_v13  ;;  %v8738_v23 = vcombine.high %v3817_v14, %v3821_v17  ;;  %v3836_v28 = vld [vmem:[#allocation9 + $0xe20] sm:$0xff]  ;;  %v3841_v43 = vld [vmem:[#allocation9 + $0xe48] sm:$0xff] }
 0x2d5   :  { %v3840_v39 = vld [vmem:[#allocation9 + $0xe40] sm:$0xff]  ;;  %v3849_v4 = vld [vmem:[#allocation9 + $0xe88] sm:$0xff] }
 0x2d6   :  { %6588 = vmatpush1.bf16.msra.mxu0 %v8695_v57  ;;  %6760 = vmatpush1.bf16.msra.mxu1 %v8697_v60  ;;  %v3829_v57 = vld [vmem:[#allocation9 + $0xde8] sm:$0xff]  ;;  %v8735_v60 = vcombine.low %v3816_v12, %v3820_v13  ;;  %v3844_v41 = vld [vmem:[#allocation9 + $0xe60] sm:$0xff] }
 0x2d7   :  { %6589 = vmatprep.subr.bf16.mxu0 %v8704_v63  ;;  %6761 = vmatprep.subr.bf16.mxu1 %v8706_v1  ;;  %v8737_v63 = vcombine.low %v3817_v14, %v3821_v17  ;;  %v8744_v1 = vcombine.high %v3824_v24, %v3828_v25  ;;  %v8746_v27 = vcombine.high %v3825_v26, %v3829_v57  ;;  %v3848_v55 = vld [vmem:[#allocation9 + $0xe80] sm:$0xff]  ;;  %v3857_v17 = vld [vmem:[#allocation9 + $0xec8] sm:$0xff] }
 0x2d8   :  { %v3852_v3 = vld [vmem:[#allocation9 + $0xea0] sm:$0xff] }
 0x2d9   :  { %v3856_v13 = vld [vmem:[#allocation9 + $0xec0] sm:$0xff] }
 0x2da   :  { %6590 = vmatpush1.bf16.msra.mxu0 %v8703_v20  ;;  %6762 = vmatpush1.bf16.msra.mxu1 %v8705_v30  ;;  %v3837_v20 = vld [vmem:[#allocation9 + $0xe28] sm:$0xff]  ;;  %v8743_v30 = vcombine.low %v3824_v24, %v3828_v25  ;;  %v3860_v14 = vld [vmem:[#allocation9 + $0xee0] sm:$0xff] }
 0x2db   :  { %6591 = vmatprep.subr.bf16.mxu0 %v8712_v32  ;;  %6763 = vmatprep.subr.bf16.mxu1 %v8714_v33  ;;  %v8745_v32 = vcombine.low %v3825_v26, %v3829_v57  ;;  %v8752_v33 = vcombine.high %v3832_v61, %v3836_v28  ;;  %v8754_v36 = vcombine.high %v3833_v29, %v3837_v20  ;;  %v3864_v25 = vld [vmem:[#allocation9 + $0xf00] sm:$0xff]  ;;  %v3865_v57 = vld [vmem:[#allocation9 + $0xf08] sm:$0xff] }
 0x2dc   :  { %v3868_v26 = vld [vmem:[#allocation9 + $0xf20] sm:$0xff] }
 0x2de   :  { %6592 = vmatpush1.bf16.msra.mxu0 %v8711_v45  ;;  %6764 = vmatpush1.bf16.msra.mxu1 %v8713_v47  ;;  %v3845_v45 = vld [vmem:[#allocation9 + $0xe68] sm:$0xff]  ;;  %v8751_v47 = vcombine.low %v3832_v61, %v3836_v28  ;;  %v3872_v28 = vld [vmem:[#allocation9 + $0xf40] sm:$0xff] }
 0x2df   :  { %6593 = vmatprep.subr.bf16.mxu0 %v8720_v50  ;;  %6765 = vmatprep.subr.bf16.mxu1 %v8722_v51  ;;  %v8753_v50 = vcombine.low %v3833_v29, %v3837_v20  ;;  %v8760_v51 = vcombine.high %v3840_v39, %v3844_v41  ;;  %v8762_v54 = vcombine.high %v3841_v43, %v3845_v45  ;;  %v3876_v29 = vld [vmem:[#allocation9 + $0xf60] sm:$0xff]  ;;  %v3873_v20 = vld [vmem:[#allocation9 + $0xf48] sm:$0xff] }
 0x2e2   :  { %6594 = vmatpush1.bf16.msra.mxu0 %v8719_v6  ;;  %6766 = vmatpush1.bf16.msra.mxu1 %v8721_v7  ;;  %v3853_v6 = vld [vmem:[#allocation9 + $0xea8] sm:$0xff]  ;;  %v8759_v7 = vcombine.low %v3840_v39, %v3844_v41  ;;  %v3880_v41 = vld [vmem:[#allocation9 + $0xf80] sm:$0xff] }
 0x2e3   :  { %6595 = vmatprep.subr.bf16.mxu0 %v8728_v8  ;;  %6767 = vmatprep.subr.bf16.mxu1 %v8730_v11  ;;  %v8761_v8 = vcombine.low %v3841_v43, %v3845_v45  ;;  %v8768_v11 = vcombine.high %v3848_v55, %v3852_v3  ;;  %v8770_v12 = vcombine.high %v3849_v4, %v3853_v6  ;;  %v3884_v43 = vld [vmem:[#allocation9 + $0xfa0] sm:$0xff]  ;;  %v3881_v45 = vld [vmem:[#allocation9 + $0xf88] sm:$0xff] }
 0x2e6   :  { %6596 = vmatpush1.bf16.msra.mxu0 %v8727_v18  ;;  %6768 = vmatpush1.bf16.msra.mxu1 %v8729_v21  ;;  %v3861_v18 = vld [vmem:[#allocation9 + $0xee8] sm:$0xff]  ;;  %v8767_v21 = vcombine.low %v3848_v55, %v3852_v3  ;;  %v3888_v3 = vld [vmem:[#allocation9 + $0xfc0] sm:$0xff] }
 0x2e7   :  { %6597 = vmatprep.subr.bf16.mxu0 %v8736_v22  ;;  %6769 = vmatprep.subr.bf16.mxu1 %v8738_v23  ;;  %v8769_v22 = vcombine.low %v3849_v4, %v3853_v6  ;;  %v8776_v23 = vcombine.high %v3856_v13, %v3860_v14  ;;  %v8778_v24 = vcombine.high %v3857_v17, %v3861_v18  ;;  %v3892_v4 = vld [vmem:[#allocation9 + $0xfe0] sm:$0xff]  ;;  %v3889_v6 = vld [vmem:[#allocation9 + $0xfc8] sm:$0xff] }
 0x2ea   :  { %6598 = vmatpush1.bf16.msra.mxu0 %v8735_v60  ;;  %6770 = vmatpush1.bf16.msra.mxu1 %v8737_v63  ;;  %v3869_v60 = vld [vmem:[#allocation9 + $0xf28] sm:$0xff]  ;;  %v8775_v63 = vcombine.low %v3856_v13, %v3860_v14  ;;  %v3386_v14 = vld [vmem:[#allocation9 + $0x10] sm:$0xff] }
 0x2eb   :  { %6599 = vmatprep.subr.bf16.mxu0 %v8744_v1  ;;  %6771 = vmatprep.subr.bf16.mxu1 %v8746_v27  ;;  %v8777_v1 = vcombine.low %v3857_v17, %v3861_v18  ;;  %v8784_v27 = vcombine.high %v3864_v25, %v3868_v26  ;;  %v8786_v61 = vcombine.high %v3865_v57, %v3869_v60  ;;  %v3390_v17 = vld [vmem:[#allocation9 + $0x30] sm:$0xff]  ;;  %v3387_v18 = vld [vmem:[#allocation9 + $0x18] sm:$0xff] }
 0x2ee   :  { %6600 = vmatpush1.bf16.msra.mxu0 %v8743_v30  ;;  %6772 = vmatpush1.bf16.msra.mxu1 %v8745_v32  ;;  %v3877_v30 = vld [vmem:[#allocation9 + $0xf68] sm:$0xff]  ;;  %v8783_v32 = vcombine.low %v3864_v25, %v3868_v26  ;;  %v3394_v26 = vld [vmem:[#allocation9 + $0x50] sm:$0xff] }
 0x2ef   :  { %6601 = vmatprep.subr.bf16.mxu0 %v8752_v33  ;;  %6773 = vmatprep.subr.bf16.mxu1 %v8754_v36  ;;  %v8785_v33 = vcombine.low %v3865_v57, %v3869_v60  ;;  %v8792_v36 = vcombine.high %v3872_v28, %v3876_v29  ;;  %v8794_v39 = vcombine.high %v3873_v20, %v3877_v30  ;;  %v3398_v57 = vld [vmem:[#allocation9 + $0x70] sm:$0xff]  ;;  %v3395_v60 = vld [vmem:[#allocation9 + $0x58] sm:$0xff] }
 0x2f2   :  { %6602 = vmatpush1.bf16.msra.mxu0 %v8751_v47  ;;  %6774 = vmatpush1.bf16.msra.mxu1 %v8753_v50  ;;  %v3885_v47 = vld [vmem:[#allocation9 + $0xfa8] sm:$0xff]  ;;  %v8791_v50 = vcombine.low %v3872_v28, %v3876_v29  ;;  %v3402_v29 = vld [vmem:[#allocation9 + $0x90] sm:$0xff] }
 0x2f3   :  { %6603 = vmatprep.subr.bf16.mxu0 %v8760_v51  ;;  %6775 = vmatprep.subr.bf16.mxu1 %v8762_v54  ;;  %v8793_v51 = vcombine.low %v3873_v20, %v3877_v30  ;;  %v8800_v54 = vcombine.high %v3880_v41, %v3884_v43  ;;  %v8802_v55 = vcombine.high %v3881_v45, %v3885_v47  ;;  %v3406_v20 = vld [vmem:[#allocation9 + $0xb0] sm:$0xff]  ;;  %v3403_v30 = vld [vmem:[#allocation9 + $0x98] sm:$0xff] }
 0x2f6   :  { %6604 = vmatpush1.bf16.msra.mxu0 %v8759_v7  ;;  %6776 = vmatpush1.bf16.msra.mxu1 %v8761_v8  ;;  %v3893_v7 = vld [vmem:[#allocation9 + $0xfe8] sm:$0xff]  ;;  %v8799_v8 = vcombine.low %v3880_v41, %v3884_v43  ;;  %v3410_v43 = vld [vmem:[#allocation9 + $0xd0] sm:$0xff] }
 0x2f7   :  { %6605 = vmatprep.subr.bf16.mxu0 %v8768_v11  ;;  %6777 = vmatprep.subr.bf16.mxu1 %v8770_v12  ;;  %v8801_v11 = vcombine.low %v3881_v45, %v3885_v47  ;;  %v8808_v12 = vcombine.high %v3888_v3, %v3892_v4  ;;  %v8810_v13 = vcombine.high %v3889_v6, %v3893_v7  ;;  %v3414_v45 = vld [vmem:[#allocation9 + $0xf0] sm:$0xff]  ;;  %v3411_v47 = vld [vmem:[#allocation9 + $0xd8] sm:$0xff] }
 0x2fa   :  { %6606 = vmatpush1.bf16.msra.mxu0 %v8767_v21  ;;  %6778 = vmatpush1.bf16.msra.mxu1 %v8769_v22  ;;  %v3391_v21 = vld [vmem:[#allocation9 + $0x38] sm:$0xff]  ;;  %v8807_v22 = vcombine.low %v3888_v3, %v3892_v4  ;;  %v3418_v4 = vld [vmem:[#allocation9 + $0x110] sm:$0xff] }
 0x2fb   :  { %6607 = vmatprep.subr.bf16.mxu0 %v8776_v23  ;;  %6779 = vmatprep.subr.bf16.mxu1 %v8778_v24  ;;  %v8809_v23 = vcombine.low %v3889_v6, %v3893_v7  ;;  %v8308_v24 = vcombine.high %v3386_v14, %v3390_v17  ;;  %v8310_v25 = vcombine.high %v3387_v18, %v3391_v21  ;;  %v3422_v6 = vld [vmem:[#allocation9 + $0x130] sm:$0xff]  ;;  %v3423_v7 = vld [vmem:[#allocation9 + $0x138] sm:$0xff] }
 0x2fe   :  { %6608 = vmatpush1.bf16.msra.mxu0 %v8775_v63  ;;  %6780 = vmatpush1.bf16.msra.mxu1 %v8777_v1  ;;  %v3399_v63 = vld [vmem:[#allocation9 + $0x78] sm:$0xff]  ;;  %v8307_v1 = vcombine.low %v3386_v14, %v3390_v17  ;;  %v3426_v14 = vld [vmem:[#allocation9 + $0x150] sm:$0xff] }
 0x2ff   :  { %6609 = vmatprep.subr.bf16.mxu0 %v8784_v27  ;;  %6781 = vmatprep.subr.bf16.mxu1 %v8786_v61  ;;  %v8309_v27 = vcombine.low %v3387_v18, %v3391_v21  ;;  %v8316_v61 = vcombine.high %v3394_v26, %v3398_v57  ;;  %v8318_v28 = vcombine.high %v3395_v60, %v3399_v63  ;;  %v3430_v17 = vld [vmem:[#allocation9 + $0x170] sm:$0xff]  ;;  %v3427_v18 = vld [vmem:[#allocation9 + $0x158] sm:$0xff] }
 0x300   :  { %v3431_v21 = vld [vmem:[#allocation9 + $0x178] sm:$0xff] }
 0x302   :  { %6610 = vmatpush1.bf16.msra.mxu0 %v8783_v32  ;;  %6782 = vmatpush1.bf16.msra.mxu1 %v8785_v33  ;;  %v3407_v32 = vld [vmem:[#allocation9 + $0xb8] sm:$0xff]  ;;  %v8315_v33 = vcombine.low %v3394_v26, %v3398_v57  ;;  %v3434_v26 = vld [vmem:[#allocation9 + $0x190] sm:$0xff] }
 0x303   :  { %6611 = vmatprep.subr.bf16.mxu0 %v8792_v36  ;;  %6783 = vmatprep.subr.bf16.mxu1 %v8794_v39  ;;  %v8317_v36 = vcombine.low %v3395_v60, %v3399_v63  ;;  %v8324_v39 = vcombine.high %v3402_v29, %v3406_v20  ;;  %v8326_v41 = vcombine.high %v3403_v30, %v3407_v32  ;;  %v3438_v57 = vld [vmem:[#allocation9 + $0x1b0] sm:$0xff]  ;;  %v3435_v60 = vld [vmem:[#allocation9 + $0x198] sm:$0xff] }
 0x304   :  { %v3439_v63 = vld [vmem:[#allocation9 + $0x1b8] sm:$0xff] }
 0x306   :  { %6612 = vmatpush1.bf16.msra.mxu0 %v8791_v50  ;;  %6784 = vmatpush1.bf16.msra.mxu1 %v8793_v51  ;;  %v3415_v50 = vld [vmem:[#allocation9 + $0xf8] sm:$0xff]  ;;  %v8323_v51 = vcombine.low %v3402_v29, %v3406_v20  ;;  %v3442_v29 = vld [vmem:[#allocation9 + $0x1d0] sm:$0xff] }
 0x307   :  { %6613 = vmatprep.subr.bf16.mxu0 %v8800_v54  ;;  %6785 = vmatprep.subr.bf16.mxu1 %v8802_v55  ;;  %v8325_v54 = vcombine.low %v3403_v30, %v3407_v32  ;;  %v8332_v55 = vcombine.high %v3410_v43, %v3414_v45  ;;  %v8334_v3 = vcombine.high %v3411_v47, %v3415_v50  ;;  %v3446_v20 = vld [vmem:[#allocation9 + $0x1f0] sm:$0xff]  ;;  %v3443_v30 = vld [vmem:[#allocation9 + $0x1d8] sm:$0xff] }
 0x308   :  { %v3447_v32 = vld [vmem:[#allocation9 + $0x1f8] sm:$0xff] }
 0x30a   :  { %6614 = vmatpush1.bf16.msra.mxu0 %v8799_v8  ;;  %6786 = vmatpush1.bf16.msra.mxu1 %v8801_v11  ;;  %v8331_v8 = vcombine.low %v3410_v43, %v3414_v45  ;;  %v8333_v11 = vcombine.low %v3411_v47, %v3415_v50  ;;  %v3450_v43 = vld [vmem:[#allocation9 + $0x210] sm:$0xff]  ;;  %v3451_v47 = vld [vmem:[#allocation9 + $0x218] sm:$0xff] }
 0x30b   :  { %6615 = vmatprep.subr.bf16.mxu0 %v8808_v12  ;;  %6787 = vmatprep.subr.bf16.mxu1 %v8810_v13  ;;  %v8340_v12 = vcombine.high %v3418_v4, %v3422_v6  ;;  %v3454_v45 = vld [vmem:[#allocation9 + $0x230] sm:$0xff]  ;;  %v3455_v50 = vld [vmem:[#allocation9 + $0x238] sm:$0xff] }
 0x30e   :  { %6616 = vmatpush1.bf16.msra.mxu0 %v8807_v22  ;;  %6788 = vmatpush1.bf16.msra.mxu1 %v8809_v23  ;;  %v8339_v22 = vcombine.low %v3418_v4, %v3422_v6  ;;  %v3458_v4 = vld [vmem:[#allocation9 + $0x250] sm:$0xff] }
 0x30f   :  { %6800 = vmatprep.subr.bf16.mxu0 %v8308_v24  ;;  %6972 = vmatprep.subr.bf16.mxu1 %v8310_v25  ;;  %v8348_v24 = vcombine.high %v3426_v14, %v3430_v17  ;;  %v8350_v25 = vcombine.high %v3427_v18, %v3431_v21  ;;  %v3462_v6 = vld [vmem:[#allocation9 + $0x270] sm:$0xff] }
 0x311   :  { %6618 = vmatmul.mubr.bf16.vlgmr.msra.gmra.mrb[8].mxu0 %v9575_v15  ;;  %6790 = vmatmul.mubr.bf16.vlgmr.msra.gmra.mrb[8].mxu1 %v9575_v15 }
 0x312   :  { %6801 = vmatpush1.bf16.msra.mxu0 %v8307_v1  ;;  %6832 = vmatprep.mubr.bf16.mxu0 %v9517_v38  ;;  %v8347_v1 = vcombine.low %v3426_v14, %v3430_v17  ;;  %v3466_v14 = vld [vmem:[#allocation9 + $0x290] sm:$0xff] }
 0x313   :  { %6973 = vmatpush1.bf16.msra.mxu1 %v8309_v27  ;;  %7004 = vmatprep.mubr.bf16.mxu1 %v9517_v38  ;;  %v3419_v38 = vld [vmem:[#allocation9 + $0x118] sm:$0xff]  ;;  %v8349_v27 = vcombine.low %v3427_v18, %v3431_v21  ;;  %v3470_v17 = vld [vmem:[#allocation9 + $0x2b0] sm:$0xff] }
 0x314   :  { %6802 = vmatprep.subr.bf16.mxu0 %v8316_v61  ;;  %6974 = vmatprep.subr.bf16.mxu1 %v8318_v28  ;;  %v8342_v13 = vcombine.high %v3419_v38, %v3423_v7  ;;  %v8341_v23 = vcombine.low %v3419_v38, %v3423_v7  ;;  %v8356_v61 = vcombine.high %v3434_v26, %v3438_v57  ;;  %v3459_v38 = vld [vmem:[#allocation9 + $0x258] sm:$0xff] }
 0x315   :  { %v8358_v28 = vcombine.high %v3435_v60, %v3439_v63  ;;  %v3463_v7 = vld [vmem:[#allocation9 + $0x278] sm:$0xff] }
 0x316   :  { %6803 = vmatpush1.bf16.msra.mxu0 %v8315_v33  ;;  %v8355_v33 = vcombine.low %v3434_v26, %v3438_v57  ;;  %v3467_v18 = vld [vmem:[#allocation9 + $0x298] sm:$0xff]  ;;  %v3474_v26 = vld [vmem:[#allocation9 + $0x2d0] sm:$0xff] }
 0x317   :  { %6975 = vmatpush1.bf16.msra.mxu1 %v8317_v36  ;;  %6804 = vmatprep.subr.bf16.mxu0 %v8324_v39  ;;  %v8357_v36 = vcombine.low %v3435_v60, %v3439_v63  ;;  %v8364_v39 = vcombine.high %v3442_v29, %v3446_v20  ;;  %v3471_v21 = vld [vmem:[#allocation9 + $0x2b8] sm:$0xff]  ;;  %v3478_v57 = vld [vmem:[#allocation9 + $0x2f0] sm:$0xff] }
 0x318   :  { %6976 = vmatprep.subr.bf16.mxu1 %v8326_v41  ;;  %v8366_v41 = vcombine.high %v3443_v30, %v3447_v32  ;;  %v3475_v60 = vld [vmem:[#allocation9 + $0x2d8] sm:$0xff] }
 0x319   :  { %v3479_v63 = vld [vmem:[#allocation9 + $0x2f8] sm:$0xff] }
 0x31a   :  { %6805 = vmatpush1.bf16.msra.mxu0 %v8323_v51  ;;  %v8363_v51 = vcombine.low %v3442_v29, %v3446_v20  ;;  %v3482_v29 = vld [vmem:[#allocation9 + $0x310] sm:$0xff] }
 0x31b   :  { %6977 = vmatpush1.bf16.msra.mxu1 %v8325_v54  ;;  %6806 = vmatprep.subr.bf16.mxu0 %v8332_v55  ;;  %v8365_v54 = vcombine.low %v3443_v30, %v3447_v32  ;;  %v8372_v55 = vcombine.high %v3450_v43, %v3454_v45  ;;  %v3486_v20 = vld [vmem:[#allocation9 + $0x330] sm:$0xff]  ;;  %v3483_v30 = vld [vmem:[#allocation9 + $0x318] sm:$0xff] }
 0x31c   :  { %6978 = vmatprep.subr.bf16.mxu1 %v8334_v3  ;;  %v8374_v3 = vcombine.high %v3451_v47, %v3455_v50  ;;  %v3487_v32 = vld [vmem:[#allocation9 + $0x338] sm:$0xff] }
 0x31e   :  { %6807 = vmatpush1.bf16.msra.mxu0 %v8331_v8  ;;  %v8371_v8 = vcombine.low %v3450_v43, %v3454_v45  ;;  %v3490_v43 = vld [vmem:[#allocation9 + $0x350] sm:$0xff] }
 0x31f   :  { %6979 = vmatpush1.bf16.msra.mxu1 %v8333_v11  ;;  %6808 = vmatprep.subr.bf16.mxu0 %v8340_v12  ;;  %v8373_v11 = vcombine.low %v3451_v47, %v3455_v50  ;;  %v8380_v12 = vcombine.high %v3458_v4, %v3462_v6  ;;  %v3494_v45 = vld [vmem:[#allocation9 + $0x370] sm:$0xff]  ;;  %v3491_v47 = vld [vmem:[#allocation9 + $0x358] sm:$0xff] }
 0x320   :  { %6980 = vmatprep.subr.bf16.mxu1 %v8342_v13  ;;  %v8382_v13 = vcombine.high %v3459_v38, %v3463_v7  ;;  %v3495_v50 = vld [vmem:[#allocation9 + $0x378] sm:$0xff] }
 0x322   :  { %6809 = vmatpush1.bf16.msra.mxu0 %v8339_v22  ;;  %v8379_v22 = vcombine.low %v3458_v4, %v3462_v6  ;;  %v3498_v4 = vld [vmem:[#allocation9 + $0x390] sm:$0xff] }
 0x323   :  { %6981 = vmatpush1.bf16.msra.mxu1 %v8341_v23  ;;  %6810 = vmatprep.subr.bf16.mxu0 %v8348_v24  ;;  %v8381_v23 = vcombine.low %v3459_v38, %v3463_v7  ;;  %v8388_v24 = vcombine.high %v3466_v14, %v3470_v17  ;;  %v3502_v6 = vld [vmem:[#allocation9 + $0x3b0] sm:$0xff]  ;;  %v3499_v38 = vld [vmem:[#allocation9 + $0x398] sm:$0xff] }
 0x324   :  { %6982 = vmatprep.subr.bf16.mxu1 %v8350_v25  ;;  %v8390_v25 = vcombine.high %v3467_v18, %v3471_v21  ;;  %v3503_v7 = vld [vmem:[#allocation9 + $0x3b8] sm:$0xff] }
 0x326   :  { %6811 = vmatpush1.bf16.msra.mxu0 %v8347_v1  ;;  %v8387_v1 = vcombine.low %v3466_v14, %v3470_v17  ;;  %v3506_v14 = vld [vmem:[#allocation9 + $0x3d0] sm:$0xff] }
 0x327   :  { %6983 = vmatpush1.bf16.msra.mxu1 %v8349_v27  ;;  %6812 = vmatprep.subr.bf16.mxu0 %v8356_v61  ;;  %v8389_v27 = vcombine.low %v3467_v18, %v3471_v21  ;;  %v8396_v61 = vcombine.high %v3474_v26, %v3478_v57  ;;  %v3510_v17 = vld [vmem:[#allocation9 + $0x3f0] sm:$0xff]  ;;  %v3507_v18 = vld [vmem:[#allocation9 + $0x3d8] sm:$0xff] }
 0x328   :  { %6984 = vmatprep.subr.bf16.mxu1 %v8358_v28  ;;  %v8398_v28 = vcombine.high %v3475_v60, %v3479_v63  ;;  %v3511_v21 = vld [vmem:[#allocation9 + $0x3f8] sm:$0xff] }
 0x32a   :  { %6813 = vmatpush1.bf16.msra.mxu0 %v8355_v33  ;;  %v8395_v33 = vcombine.low %v3474_v26, %v3478_v57  ;;  %v3514_v26 = vld [vmem:[#allocation9 + $0x410] sm:$0xff] }
 0x32b   :  { %6985 = vmatpush1.bf16.msra.mxu1 %v8357_v36  ;;  %6814 = vmatprep.subr.bf16.mxu0 %v8364_v39  ;;  %v8397_v36 = vcombine.low %v3475_v60, %v3479_v63  ;;  %v8404_v39 = vcombine.high %v3482_v29, %v3486_v20  ;;  %v3518_v57 = vld [vmem:[#allocation9 + $0x430] sm:$0xff]  ;;  %v3515_v60 = vld [vmem:[#allocation9 + $0x418] sm:$0xff] }
 0x32c   :  { %6986 = vmatprep.subr.bf16.mxu1 %v8366_v41  ;;  %v8406_v41 = vcombine.high %v3483_v30, %v3487_v32  ;;  %v3519_v63 = vld [vmem:[#allocation9 + $0x438] sm:$0xff] }
 0x32e   :  { %6815 = vmatpush1.bf16.msra.mxu0 %v8363_v51  ;;  %v8403_v51 = vcombine.low %v3482_v29, %v3486_v20  ;;  %v3522_v29 = vld [vmem:[#allocation9 + $0x450] sm:$0xff] }
 0x32f   :  { %6987 = vmatpush1.bf16.msra.mxu1 %v8365_v54  ;;  %6816 = vmatprep.subr.bf16.mxu0 %v8372_v55  ;;  %v8405_v54 = vcombine.low %v3483_v30, %v3487_v32  ;;  %v8412_v55 = vcombine.high %v3490_v43, %v3494_v45  ;;  %v3526_v20 = vld [vmem:[#allocation9 + $0x470] sm:$0xff]  ;;  %v8435_v30 = vcombine.low %v3514_v26, %v3518_v57  ;;  %v3523_v32 = vld [vmem:[#allocation9 + $0x458] sm:$0xff] }
 0x330   :  { %6988 = vmatprep.subr.bf16.mxu1 %v8374_v3  ;;  %v8414_v3 = vcombine.high %v3491_v47, %v3495_v50 }
 0x332   :  { %6817 = vmatpush1.bf16.msra.mxu0 %v8371_v8  ;;  %v8411_v8 = vcombine.low %v3490_v43, %v3494_v45  ;;  %v3534_v43 = vld [vmem:[#allocation9 + $0x4b0] sm:$0xff] }
 0x333   :  { %6989 = vmatpush1.bf16.msra.mxu1 %v8373_v11  ;;  %6818 = vmatprep.subr.bf16.mxu0 %v8380_v12  ;;  %v8413_v11 = vcombine.low %v3491_v47, %v3495_v50  ;;  %v8420_v12 = vcombine.high %v3498_v4, %v3502_v6  ;;  %v3531_v47 = vld [vmem:[#allocation9 + $0x498] sm:$0xff] }
 0x334   :  { %6990 = vmatprep.subr.bf16.mxu1 %v8382_v13  ;;  %v8422_v13 = vcombine.high %v3499_v38, %v3503_v7  ;;  %v3535_v50 = vld [vmem:[#allocation9 + $0x4b8] sm:$0xff] }
 0x336   :  { %6819 = vmatpush1.bf16.msra.mxu0 %v8379_v22  ;;  %v8419_v22 = vcombine.low %v3498_v4, %v3502_v6  ;;  %v3538_v4 = vld [vmem:[#allocation9 + $0x4d0] sm:$0xff] }
 0x337   :  { %6991 = vmatpush1.bf16.msra.mxu1 %v8381_v23  ;;  %6820 = vmatprep.subr.bf16.mxu0 %v8388_v24  ;;  %v8421_v23 = vcombine.low %v3499_v38, %v3503_v7  ;;  %v8428_v24 = vcombine.high %v3506_v14, %v3510_v17  ;;  %v3542_v6 = vld [vmem:[#allocation9 + $0x4f0] sm:$0xff]  ;;  %v3539_v38 = vld [vmem:[#allocation9 + $0x4d8] sm:$0xff] }
 0x338   :  { %6992 = vmatprep.subr.bf16.mxu1 %v8390_v25  ;;  %v8430_v25 = vcombine.high %v3507_v18, %v3511_v21  ;;  %v3543_v7 = vld [vmem:[#allocation9 + $0x4f8] sm:$0xff] }
 0x33a   :  { %6821 = vmatpush1.bf16.msra.mxu0 %v8387_v1  ;;  %v8427_v1 = vcombine.low %v3506_v14, %v3510_v17  ;;  %v3550_v14 = vld [vmem:[#allocation9 + $0x530] sm:$0xff]  ;;  %v3547_v17 = vld [vmem:[#allocation9 + $0x518] sm:$0xff] }
 0x33b   :  { %6993 = vmatpush1.bf16.msra.mxu1 %v8389_v27  ;;  %6822 = vmatprep.subr.bf16.mxu0 %v8396_v61  ;;  %v8429_v27 = vcombine.low %v3507_v18, %v3511_v21  ;;  %v8436_v61 = vcombine.high %v3514_v26, %v3518_v57  ;;  %v3551_v18 = vld [vmem:[#allocation9 + $0x538] sm:$0xff]  ;;  %v8461_v21 = vcombine.low %v3539_v38, %v3543_v7 }
 0x33c   :  { %6994 = vmatprep.subr.bf16.mxu1 %v8398_v28  ;;  %v8438_v28 = vcombine.high %v3515_v60, %v3519_v63  ;;  %v3555_v26 = vld [vmem:[#allocation9 + $0x558] sm:$0xff] }
 0x33d   :  { %v3559_v57 = vld [vmem:[#allocation9 + $0x578] sm:$0xff] }
 0x33e   :  { %6823 = vmatpush1.bf16.msra.mxu0 %v8395_v33  ;;  %v3527_v33 = vld [vmem:[#allocation9 + $0x478] sm:$0xff] }
 0x33f   :  { %6995 = vmatpush1.bf16.msra.mxu1 %v8397_v36  ;;  %6824 = vmatprep.subr.bf16.mxu0 %v8404_v39  ;;  %v8437_v36 = vcombine.low %v3515_v60, %v3519_v63  ;;  %v8444_v39 = vcombine.high %v3522_v29, %v3526_v20  ;;  %v8446_v45 = vcombine.high %v3523_v32, %v3527_v33 }
 0x340   :  { %6996 = vmatprep.subr.bf16.mxu1 %v8406_v41  ;;  %v3530_v41 = vld [vmem:[#allocation9 + $0x490] sm:$0xff]  ;;  %v8469_v63 = vcombine.low %v3547_v17, %v3551_v18 }
 0x342   :  { %6825 = vmatpush1.bf16.msra.mxu0 %v8403_v51  ;;  %v8443_v51 = vcombine.low %v3522_v29, %v3526_v20  ;;  %v3563_v29 = vld [vmem:[#allocation9 + $0x598] sm:$0xff] }
 0x343   :  { %6997 = vmatpush1.bf16.msra.mxu1 %v8405_v54  ;;  %6826 = vmatprep.subr.bf16.mxu0 %v8412_v55  ;;  %v8445_v54 = vcombine.low %v3523_v32, %v3527_v33  ;;  %v8452_v55 = vcombine.high %v3530_v41, %v3534_v43  ;;  %v3567_v20 = vld [vmem:[#allocation9 + $0x5b8] sm:$0xff]  ;;  %v8477_v32 = vcombine.low %v3555_v26, %v3559_v57 }
 0x344   :  { %6998 = vmatprep.subr.bf16.mxu1 %v8414_v3  ;;  %v8454_v3 = vcombine.high %v3531_v47, %v3535_v50 }
 0x346   :  { %6827 = vmatpush1.bf16.msra.mxu0 %v8411_v8  ;;  %v8451_v8 = vcombine.low %v3530_v41, %v3534_v43  ;;  %v3574_v41 = vld [vmem:[#allocation9 + $0x5f0] sm:$0xff]  ;;  %v3571_v43 = vld [vmem:[#allocation9 + $0x5d8] sm:$0xff] }
 0x347   :  { %6999 = vmatpush1.bf16.msra.mxu1 %v8413_v11  ;;  %6828 = vmatprep.subr.bf16.mxu0 %v8420_v12  ;;  %v8460_v11 = vcombine.high %v3538_v4, %v3542_v6  ;;  %v8462_v12 = vcombine.high %v3539_v38, %v3543_v7 }
 0x348   :  { %7000 = vmatprep.subr.bf16.mxu1 %v8422_v13  ;;  %v3546_v13 = vld [vmem:[#allocation9 + $0x510] sm:$0xff] }
 0x349   :  { %v8467_v60 = vcombine.low %v3546_v13, %v3550_v14 }
 0x34a   :  { %6829 = vmatpush1.bf16.msra.mxu0 %v8419_v22  ;;  %v8468_v22 = vcombine.high %v3546_v13, %v3550_v14  ;;  %v3587_v13 = vld [vmem:[#allocation9 + $0x658] sm:$0xff] }
 0x34b   :  { %7001 = vmatpush1.bf16.msra.mxu1 %v8421_v23  ;;  %6830 = vmatprep.subr.bf16.mxu0 %v8428_v24  ;;  %v8470_v23 = vcombine.high %v3547_v17, %v3551_v18  ;;  %v3554_v24 = vld [vmem:[#allocation9 + $0x550] sm:$0xff]  ;;  %v3591_v14 = vld [vmem:[#allocation9 + $0x678] sm:$0xff] }
 0x34c   :  { %7002 = vmatprep.subr.bf16.mxu1 %v8430_v25  ;;  %v3558_v25 = vld [vmem:[#allocation9 + $0x570] sm:$0xff] }
 0x34e   :  { %6831 = vmatpush1.bf16.msra.mxu0 %v8427_v1  ;;  %v8476_v1 = vcombine.high %v3554_v24, %v3558_v25 }
 0x34f   :  { %7003 = vmatpush1.bf16.msra.mxu1 %v8429_v27  ;;  %6843 = vmatprep.subr.bf16.mxu0 %v8436_v61  ;;  %v8478_v27 = vcombine.high %v3555_v26, %v3559_v57  ;;  %v3562_v61 = vld [vmem:[#allocation9 + $0x590] sm:$0xff]  ;;  %v8509_v57 = vcombine.low %v3587_v13, %v3591_v14 }
 0x350   :  { %7015 = vmatprep.subr.bf16.mxu1 %v8438_v28  ;;  %v3566_v28 = vld [vmem:[#allocation9 + $0x5b0] sm:$0xff] }
 0x351   :  { %6833 = vmatmul.mubr.bf16.vlgmr.msra.gmra.mrb[12].mxu0 %v9513_v35  ;;  %v8484_v33 = vcombine.high %v3562_v61, %v3566_v28 }
 0x352   :  { %7005 = vmatmul.mubr.bf16.vlgmr.msra.gmra.mrb[12].mxu1 %v9513_v35  ;;  %6844 = vmatpush1.bf16.msra.mxu0 %v8435_v30  ;;  %v8453_v35 = vcombine.low %v3531_v47, %v3535_v50  ;;  %v8475_v30 = vcombine.low %v3554_v24, %v3558_v25  ;;  %v8483_v47 = vcombine.low %v3562_v61, %v3566_v28  ;;  %v3595_v24 = vld [vmem:[#allocation9 + $0x698] sm:$0xff] }
 0x353   :  { %6875 = vmatprep.mubr.bf16.mxu0 %v9519_v44  ;;  %7016 = vmatpush1.bf16.msra.mxu1 %v8437_v36  ;;  %v8486_v36 = vcombine.high %v3563_v29, %v3567_v20  ;;  %v8485_v50 = vcombine.low %v3563_v29, %v3567_v20  ;;  %v3599_v25 = vld [vmem:[#allocation9 + $0x6b8] sm:$0xff] }
 0x354   :  { %7047 = vmatprep.mubr.bf16.mxu1 %v9519_v44  ;;  %6845 = vmatprep.subr.bf16.mxu0 %v8444_v39  ;;  %v8459_v44 = vcombine.low %v3538_v4, %v3542_v6  ;;  %v3570_v39 = vld [vmem:[#allocation9 + $0x5d0] sm:$0xff]  ;;  %v3579_v4 = vld [vmem:[#allocation9 + $0x618] sm:$0xff]  ;;  %v8517_v20 = vcombine.low %v3595_v24, %v3599_v25 }
 0x355   :  { %7017 = vmatprep.subr.bf16.mxu1 %v8446_v45  ;;  %v3575_v45 = vld [vmem:[#allocation9 + $0x5f8] sm:$0xff]  ;;  %v8491_v38 = vcombine.low %v3570_v39, %v3574_v41 }
 0x356   :  { %6846 = vmatpush1.bf16.msra.mxu0 %v8443_v51  ;;  %v8492_v51 = vcombine.high %v3570_v39, %v3574_v41  ;;  %v3583_v6 = vld [vmem:[#allocation9 + $0x638] sm:$0xff]  ;;  %v8493_v7 = vcombine.low %v3571_v43, %v3575_v45 }
 0x357   :  { %7018 = vmatpush1.bf16.msra.mxu1 %v8445_v54  ;;  %6847 = vmatprep.subr.bf16.mxu0 %v8452_v55  ;;  %v8494_v54 = vcombine.high %v3571_v43, %v3575_v45  ;;  %v3578_v55 = vld [vmem:[#allocation9 + $0x610] sm:$0xff]  ;;  %v8501_v18 = vcombine.low %v3579_v4, %v3583_v6  ;;  %v3603_v61 = vld [vmem:[#allocation9 + $0x6d8] sm:$0xff] }
 0x358   :  { %7019 = vmatprep.subr.bf16.mxu1 %v8454_v3  ;;  %v3582_v3 = vld [vmem:[#allocation9 + $0x630] sm:$0xff]  ;;  %v3607_v28 = vld [vmem:[#allocation9 + $0x6f8] sm:$0xff] }
 0x359   :  { %v8499_v17 = vcombine.low %v3578_v55, %v3582_v3  ;;  %v3611_v39 = vld [vmem:[#allocation9 + $0x718] sm:$0xff]  ;;  %v8525_v45 = vcombine.low %v3603_v61, %v3607_v28 }
 0x35a   :  { %6848 = vmatpush1.bf16.msra.mxu0 %v8451_v8  ;;  %v8500_v8 = vcombine.high %v3578_v55, %v3582_v3  ;;  %v3615_v41 = vld [vmem:[#allocation9 + $0x738] sm:$0xff] }
 0x35b   :  { %7020 = vmatpush1.bf16.msra.mxu1 %v8453_v35  ;;  %6849 = vmatprep.subr.bf16.mxu0 %v8460_v11  ;;  %v8502_v35 = vcombine.high %v3579_v4, %v3583_v6  ;;  %v3586_v11 = vld [vmem:[#allocation9 + $0x650] sm:$0xff]  ;;  %v3619_v55 = vld [vmem:[#allocation9 + $0x758] sm:$0xff]  ;;  %v8533_v6 = vcombine.low %v3611_v39, %v3615_v41 }
 0x35c   :  { %7021 = vmatprep.subr.bf16.mxu1 %v8462_v12  ;;  %v3590_v12 = vld [vmem:[#allocation9 + $0x670] sm:$0xff]  ;;  %v3623_v3 = vld [vmem:[#allocation9 + $0x778] sm:$0xff] }
 0x35d   :  { %v8507_v26 = vcombine.low %v3586_v11, %v3590_v12 }
 0x35e   :  { %6850 = vmatpush1.bf16.msra.mxu0 %v8459_v44  ;;  %v8508_v44 = vcombine.high %v3586_v11, %v3590_v12  ;;  %v3627_v11 = vld [vmem:[#allocation9 + $0x798] sm:$0xff] }
 0x35f   :  { %7022 = vmatpush1.bf16.msra.mxu1 %v8461_v21  ;;  %6851 = vmatprep.subr.bf16.mxu0 %v8468_v22  ;;  %v8510_v21 = vcombine.high %v3587_v13, %v3591_v14  ;;  %v3594_v22 = vld [vmem:[#allocation9 + $0x690] sm:$0xff]  ;;  %v3631_v12 = vld [vmem:[#allocation9 + $0x7b8] sm:$0xff]  ;;  %v8541_v14 = vcombine.low %v3619_v55, %v3623_v3 }
 0x360   :  { %7023 = vmatprep.subr.bf16.mxu1 %v8470_v23  ;;  %v3598_v23 = vld [vmem:[#allocation9 + $0x6b0] sm:$0xff] }
 0x361   :  { %v8515_v29 = vcombine.low %v3594_v22, %v3598_v23 }
 0x362   :  { %6852 = vmatpush1.bf16.msra.mxu0 %v8467_v60  ;;  %v8516_v60 = vcombine.high %v3594_v22, %v3598_v23  ;;  %v3635_v22 = vld [vmem:[#allocation9 + $0x7d8] sm:$0xff] }
 0x363   :  { %7024 = vmatpush1.bf16.msra.mxu1 %v8469_v63  ;;  %6853 = vmatprep.subr.bf16.mxu0 %v8476_v1  ;;  %v8518_v63 = vcombine.high %v3595_v24, %v3599_v25  ;;  %v3602_v1 = vld [vmem:[#allocation9 + $0x6d0] sm:$0xff]  ;;  %v3639_v23 = vld [vmem:[#allocation9 + $0x7f8] sm:$0xff]  ;;  %v8549_v25 = vcombine.low %v3627_v11, %v3631_v12 }
 0x364   :  { %7025 = vmatprep.subr.bf16.mxu1 %v8478_v27  ;;  %v3606_v27 = vld [vmem:[#allocation9 + $0x6f0] sm:$0xff] }
 0x365   :  { %v8523_v43 = vcombine.low %v3602_v1, %v3606_v27 }
 0x366   :  { %6854 = vmatpush1.bf16.msra.mxu0 %v8475_v30  ;;  %v8524_v30 = vcombine.high %v3602_v1, %v3606_v27  ;;  %v3643_v1 = vld [vmem:[#allocation9 + $0x818] sm:$0xff] }
 0x367   :  { %7026 = vmatpush1.bf16.msra.mxu1 %v8477_v32  ;;  %6855 = vmatprep.subr.bf16.mxu0 %v8484_v33  ;;  %v8526_v32 = vcombine.high %v3603_v61, %v3607_v28  ;;  %v3610_v33 = vld [vmem:[#allocation9 + $0x710] sm:$0xff]  ;;  %v3647_v27 = vld [vmem:[#allocation9 + $0x838] sm:$0xff]  ;;  %v8557_v28 = vcombine.low %v3635_v22, %v3639_v23 }
 0x368   :  { %7027 = vmatprep.subr.bf16.mxu1 %v8486_v36  ;;  %v3614_v36 = vld [vmem:[#allocation9 + $0x730] sm:$0xff] }
 0x369   :  { %v8531_v4 = vcombine.low %v3610_v33, %v3614_v36 }
 0x36a   :  { %6856 = vmatpush1.bf16.msra.mxu0 %v8483_v47  ;;  %v8532_v47 = vcombine.high %v3610_v33, %v3614_v36  ;;  %v3651_v36 = vld [vmem:[#allocation9 + $0x858] sm:$0xff] }
 0x36b   :  { %7028 = vmatpush1.bf16.msra.mxu1 %v8485_v50  ;;  %6857 = vmatprep.subr.bf16.mxu0 %v8492_v51  ;;  %v8534_v50 = vcombine.high %v3611_v39, %v3615_v41  ;;  %v3618_v51 = vld [vmem:[#allocation9 + $0x750] sm:$0xff]  ;;  %v3655_v39 = vld [vmem:[#allocation9 + $0x878] sm:$0xff]  ;;  %v8565_v41 = vcombine.low %v3643_v1, %v3647_v27 }
 0x36c   :  { %7029 = vmatprep.subr.bf16.mxu1 %v8494_v54  ;;  %v3622_v54 = vld [vmem:[#allocation9 + $0x770] sm:$0xff] }
 0x36d   :  { %v8539_v13 = vcombine.low %v3618_v51, %v3622_v54 }
 0x36e   :  { %6858 = vmatpush1.bf16.msra.mxu0 %v8491_v38  ;;  %v8540_v38 = vcombine.high %v3618_v51, %v3622_v54  ;;  %v3659_v51 = vld [vmem:[#allocation9 + $0x898] sm:$0xff] }
 0x36f   :  { %7030 = vmatpush1.bf16.msra.mxu1 %v8493_v7  ;;  %6859 = vmatprep.subr.bf16.mxu0 %v8500_v8  ;;  %v8542_v7 = vcombine.high %v3619_v55, %v3623_v3  ;;  %v3626_v8 = vld [vmem:[#allocation9 + $0x790] sm:$0xff]  ;;  %v3663_v54 = vld [vmem:[#allocation9 + $0x8b8] sm:$0xff]  ;;  %v8573_v3 = vcombine.low %v3651_v36, %v3655_v39 }
 0x370   :  { %7031 = vmatprep.subr.bf16.mxu1 %v8502_v35  ;;  %v3630_v35 = vld [vmem:[#allocation9 + $0x7b0] sm:$0xff] }
 0x371   :  { %v8547_v24 = vcombine.low %v3626_v8, %v3630_v35 }
 0x372   :  { %6860 = vmatpush1.bf16.msra.mxu0 %v8499_v17  ;;  %v8548_v17 = vcombine.high %v3626_v8, %v3630_v35  ;;  %v3667_v8 = vld [vmem:[#allocation9 + $0x8d8] sm:$0xff] }
 0x373   :  { %7032 = vmatpush1.bf16.msra.mxu1 %v8501_v18  ;;  %6861 = vmatprep.subr.bf16.mxu0 %v8508_v44  ;;  %v8550_v18 = vcombine.high %v3627_v11, %v3631_v12  ;;  %v3634_v44 = vld [vmem:[#allocation9 + $0x7d0] sm:$0xff]  ;;  %v3671_v35 = vld [vmem:[#allocation9 + $0x8f8] sm:$0xff] }
 0x374   :  { %7033 = vmatprep.subr.bf16.mxu1 %v8510_v21  ;;  %v3638_v21 = vld [vmem:[#allocation9 + $0x7f0] sm:$0xff] }
 0x375   :  { %v8555_v61 = vcombine.low %v3634_v44, %v3638_v21 }
 0x376   :  { %6862 = vmatpush1.bf16.msra.mxu0 %v8507_v26  ;;  %v8556_v26 = vcombine.high %v3634_v44, %v3638_v21  ;;  %v3679_v44 = vld [vmem:[#allocation9 + $0x938] sm:$0xff]  ;;  %v8589_v21 = vcombine.low %v3667_v8, %v3671_v35 }
 0x377   :  { %7034 = vmatpush1.bf16.msra.mxu1 %v8509_v57  ;;  %6863 = vmatprep.subr.bf16.mxu0 %v8516_v60  ;;  %v8558_v57 = vcombine.high %v3635_v22, %v3639_v23  ;;  %v3642_v60 = vld [vmem:[#allocation9 + $0x810] sm:$0xff] }
 0x378   :  { %7035 = vmatprep.subr.bf16.mxu1 %v8518_v63  ;;  %v3646_v63 = vld [vmem:[#allocation9 + $0x830] sm:$0xff] }
 0x379   :  { %v8563_v33 = vcombine.low %v3642_v60, %v3646_v63 }
 0x37a   :  { %6864 = vmatpush1.bf16.msra.mxu0 %v8515_v29  ;;  %v8564_v29 = vcombine.high %v3642_v60, %v3646_v63 }
 0x37b   :  { %7036 = vmatpush1.bf16.msra.mxu1 %v8517_v20  ;;  %6865 = vmatprep.subr.bf16.mxu0 %v8524_v30  ;;  %v8566_v20 = vcombine.high %v3643_v1, %v3647_v27  ;;  %v3650_v30 = vld [vmem:[#allocation9 + $0x850] sm:$0xff] }
 0x37c   :  { %7037 = vmatprep.subr.bf16.mxu1 %v8526_v32  ;;  %v3654_v32 = vld [vmem:[#allocation9 + $0x870] sm:$0xff] }
 0x37d   :  { %v8571_v55 = vcombine.low %v3650_v30, %v3654_v32 }
 0x37e   :  { %6866 = vmatpush1.bf16.msra.mxu0 %v8523_v43  ;;  %v8572_v43 = vcombine.high %v3650_v30, %v3654_v32 }
 0x37f   :  { %7038 = vmatpush1.bf16.msra.mxu1 %v8525_v45  ;;  %6867 = vmatprep.subr.bf16.mxu0 %v8532_v47  ;;  %v3658_v45 = vld [vmem:[#allocation9 + $0x890] sm:$0xff] }
 0x380   :  { %7039 = vmatprep.subr.bf16.mxu1 %v8534_v50  ;;  %v3662_v47 = vld [vmem:[#allocation9 + $0x8b0] sm:$0xff]  ;;  %v8574_v50 = vcombine.high %v3651_v36, %v3655_v39 }
 0x381   :  { %v8579_v11 = vcombine.low %v3658_v45, %v3662_v47  ;;  %v3698_v39 = vld [vmem:[#allocation9 + $0x9d0] sm:$0xff] }
 0x382   :  { %6868 = vmatpush1.bf16.msra.mxu0 %v8531_v4  ;;  %v8580_v4 = vcombine.high %v3658_v45, %v3662_v47  ;;  %v3703_v45 = vld [vmem:[#allocation9 + $0x9f8] sm:$0xff] }
 0x383   :  { %7040 = vmatpush1.bf16.msra.mxu1 %v8533_v6  ;;  %6869 = vmatprep.subr.bf16.mxu0 %v8540_v38  ;;  %v8582_v6 = vcombine.high %v3659_v51, %v3663_v54  ;;  %v3666_v38 = vld [vmem:[#allocation9 + $0x8d0] sm:$0xff] }
 0x384   :  { %7041 = vmatprep.subr.bf16.mxu1 %v8542_v7  ;;  %v3670_v7 = vld [vmem:[#allocation9 + $0x8f0] sm:$0xff] }
 0x385   :  { %v8588_v12 = vcombine.high %v3666_v38, %v3670_v7 }
 0x386   :  { %6870 = vmatpush1.bf16.msra.mxu0 %v8539_v13  ;;  %v8590_v13 = vcombine.high %v3667_v8, %v3671_v35 }
 0x387   :  { %7042 = vmatpush1.bf16.msra.mxu1 %v8541_v14  ;;  %6871 = vmatprep.subr.bf16.mxu0 %v8548_v17  ;;  %v3674_v14 = vld [vmem:[#allocation9 + $0x910] sm:$0xff] }
 0x388   :  { %7043 = vmatprep.subr.bf16.mxu1 %v8550_v18  ;;  %v3678_v17 = vld [vmem:[#allocation9 + $0x930] sm:$0xff]  ;;  %v3675_v18 = vld [vmem:[#allocation9 + $0x918] sm:$0xff] }
 0x389   :  { %v8596_v22 = vcombine.high %v3674_v14, %v3678_v17  ;;  %v8598_v23 = vcombine.high %v3675_v18, %v3679_v44  ;;  %v8595_v60 = vcombine.low %v3674_v14, %v3678_v17  ;;  %v8597_v63 = vcombine.low %v3675_v18, %v3679_v44 }
 0x38a   :  { %6872 = vmatpush1.bf16.msra.mxu0 %v8547_v24  ;;  %v3682_v24 = vld [vmem:[#allocation9 + $0x950] sm:$0xff] }
 0x38b   :  { %7044 = vmatpush1.bf16.msra.mxu1 %v8549_v25  ;;  %6873 = vmatprep.subr.bf16.mxu0 %v8556_v26  ;;  %v3686_v25 = vld [vmem:[#allocation9 + $0x970] sm:$0xff]  ;;  %v3683_v26 = vld [vmem:[#allocation9 + $0x958] sm:$0xff] }
 0x38c   :  { %7045 = vmatprep.subr.bf16.mxu1 %v8558_v57  ;;  %v3687_v57 = vld [vmem:[#allocation9 + $0x978] sm:$0xff]  ;;  %v8604_v1 = vcombine.high %v3682_v24, %v3686_v25  ;;  %v8603_v30 = vcombine.low %v3682_v24, %v3686_v25 }
 0x38d   :  { %v8606_v27 = vcombine.high %v3683_v26, %v3687_v57  ;;  %v8605_v32 = vcombine.low %v3683_v26, %v3687_v57 }
 0x38e   :  { %6874 = vmatpush1.bf16.msra.mxu0 %v8555_v61  ;;  %v3690_v61 = vld [vmem:[#allocation9 + $0x990] sm:$0xff] }
 0x38f   :  { %7046 = vmatpush1.bf16.msra.mxu1 %v8557_v28  ;;  %6886 = vmatprep.subr.bf16.mxu0 %v8564_v29  ;;  %v3694_v28 = vld [vmem:[#allocation9 + $0x9b0] sm:$0xff]  ;;  %v3691_v29 = vld [vmem:[#allocation9 + $0x998] sm:$0xff] }
 0x390   :  { %7058 = vmatprep.subr.bf16.mxu1 %v8566_v20  ;;  %v3695_v20 = vld [vmem:[#allocation9 + $0x9b8] sm:$0xff]  ;;  %v8611_v47 = vcombine.low %v3690_v61, %v3694_v28 }
 0x391   :  { %6876 = vmatmul.mubr.bf16.vlgmr.msra.gmra.mrb[12].mxu0 %v9515_v37  ;;  %v8614_v36 = vcombine.high %v3691_v29, %v3695_v20 }
 0x392   :  { %7048 = vmatmul.mubr.bf16.vlgmr.msra.gmra.mrb[12].mxu1 %v9515_v37  ;;  %6887 = vmatpush1.bf16.msra.mxu0 %v8563_v33  ;;  %v8581_v37 = vcombine.low %v3659_v51, %v3663_v54  ;;  %v8612_v33 = vcombine.high %v3690_v61, %v3694_v28  ;;  %v3735_v61 = vld [vmem:[#allocation9 + $0xaf8] sm:$0xff] }
 0x393   :  { %6918 = vmatprep.mubr.bf16.mxu0 %v9577_v16  ;;  %7059 = vmatpush1.bf16.msra.mxu1 %v8565_v41  ;;  %v3702_v41 = vld [vmem:[#allocation9 + $0x9f0] sm:$0xff] }
 0x394   :  { %7090 = vmatprep.mubr.bf16.mxu1 %v9577_v16  ;;  %6888 = vmatprep.subr.bf16.mxu0 %v8572_v43  ;;  %v8587_v16 = vcombine.low %v3666_v38, %v3670_v7  ;;  %v3699_v43 = vld [vmem:[#allocation9 + $0x9d8] sm:$0xff]  ;;  %v8620_v51 = vcombine.high %v3698_v39, %v3702_v41  ;;  %v8619_v38 = vcombine.low %v3698_v39, %v3702_v41 }
 0x395   :  { %7060 = vmatprep.subr.bf16.mxu1 %v8574_v50  ;;  %v8613_v50 = vcombine.low %v3691_v29, %v3695_v20  ;;  %v8622_v54 = vcombine.high %v3699_v43, %v3703_v45  ;;  %v8621_v7 = vcombine.low %v3699_v43, %v3703_v45  ;;  %v3739_v41 = vld [vmem:[#allocation9 + $0xb18] sm:$0xff] }
 0x396   :  { %6889 = vmatpush1.bf16.msra.mxu0 %v8571_v55  ;;  %v3706_v55 = vld [vmem:[#allocation9 + $0xa10] sm:$0xff]  ;;  %v3743_v43 = vld [vmem:[#allocation9 + $0xb38] sm:$0xff] }
 0x397   :  { %7061 = vmatpush1.bf16.msra.mxu1 %v8573_v3  ;;  %6890 = vmatprep.subr.bf16.mxu0 %v8580_v4  ;;  %v3710_v3 = vld [vmem:[#allocation9 + $0xa30] sm:$0xff]  ;;  %v3707_v4 = vld [vmem:[#allocation9 + $0xa18] sm:$0xff]  ;;  %v8662_v49 = vcombine.high %v3739_v41, %v3743_v43 }
 0x398   :  { %7062 = vmatprep.subr.bf16.mxu1 %v8582_v6  ;;  %v3711_v6 = vld [vmem:[#allocation9 + $0xa38] sm:$0xff]  ;;  %v8628_v8 = vcombine.high %v3706_v55, %v3710_v3  ;;  %v8627_v14 = vcombine.low %v3706_v55, %v3710_v3 }
 0x399   :  { %v8630_v35 = vcombine.high %v3707_v4, %v3711_v6  ;;  %v8629_v17 = vcombine.low %v3707_v4, %v3711_v6 }
 0x39a   :  { %6891 = vmatpush1.bf16.msra.mxu0 %v8579_v11  ;;  %v3714_v11 = vld [vmem:[#allocation9 + $0xa50] sm:$0xff] }
 0x39b   :  { %7063 = vmatpush1.bf16.msra.mxu1 %v8581_v37  ;;  %6892 = vmatprep.subr.bf16.mxu0 %v8588_v12  ;;  %v3718_v37 = vld [vmem:[#allocation9 + $0xa70] sm:$0xff]  ;;  %v3715_v12 = vld [vmem:[#allocation9 + $0xa58] sm:$0xff] }
 0x39c   :  { %7064 = vmatprep.subr.bf16.mxu1 %v8590_v13  ;;  %v3719_v13 = vld [vmem:[#allocation9 + $0xa78] sm:$0xff]  ;;  %v8636_v18 = vcombine.high %v3714_v11, %v3718_v37  ;;  %v8635_v24 = vcombine.low %v3714_v11, %v3718_v37 }
 0x39d   :  { %v8638_v44 = vcombine.high %v3715_v12, %v3719_v13  ;;  %v8637_v25 = vcombine.low %v3715_v12, %v3719_v13  ;;  %v3755_v37 = vld [vmem:[#allocation9 + $0xb98] sm:$0xff] }
 0x39e   :  { %6893 = vmatpush1.bf16.msra.mxu0 %v8587_v16  ;;  %v3722_v16 = vld [vmem:[#allocation9 + $0xa90] sm:$0xff]  ;;  %v3759_v12 = vld [vmem:[#allocation9 + $0xbb8] sm:$0xff] }
 0x39f   :  { %7065 = vmatpush1.bf16.msra.mxu1 %v8589_v21  ;;  %6894 = vmatprep.subr.bf16.mxu0 %v8596_v22  ;;  %v3726_v21 = vld [vmem:[#allocation9 + $0xab0] sm:$0xff]  ;;  %v3723_v22 = vld [vmem:[#allocation9 + $0xa98] sm:$0xff] }
 0x3a0   :  { %7066 = vmatprep.subr.bf16.mxu1 %v8598_v23  ;;  %v3727_v23 = vld [vmem:[#allocation9 + $0xab8] sm:$0xff]  ;;  %v8644_v26 = vcombine.high %v3722_v16, %v3726_v21  ;;  %v8643_v28 = vcombine.low %v3722_v16, %v3726_v21  ;;  %v8678_v16 = vcombine.high %v3755_v37, %v3759_v12  ;;  %v3762_v21 = vld [vmem:[#allocation9 + $0xbd0] sm:$0xff] }
 0x3a1   :  { %v8646_v57 = vcombine.high %v3723_v22, %v3727_v23  ;;  %v8645_v29 = vcombine.low %v3723_v22, %v3727_v23  ;;  %v3766_v22 = vld [vmem:[#allocation9 + $0xbf0] sm:$0xff]  ;;  %v3763_v23 = vld [vmem:[#allocation9 + $0xbd8] sm:$0xff] }
 0x3a2   :  { %6895 = vmatpush1.bf16.msra.mxu0 %v8595_v60  ;;  %v3730_v60 = vld [vmem:[#allocation9 + $0xad0] sm:$0xff] }
 0x3a3   :  { %7067 = vmatpush1.bf16.msra.mxu1 %v8597_v63  ;;  %6896 = vmatprep.subr.bf16.mxu0 %v8604_v1  ;;  %v3734_v63 = vld [vmem:[#allocation9 + $0xaf0] sm:$0xff]  ;;  %v9606_v1 = vstv %s183_s6 }
 0x3a4   :  { %7068 = vmatprep.subr.bf16.mxu1 %v8606_v27  ;;  %v3731_v27 = vld [vmem:[#allocation9 + $0xad8] sm:$0xff]  ;;  %v8652_v20 = vcombine.high %v3730_v60, %v3734_v63  ;;  %v187_v39 = vsub.f32 %v102_v62, %v9606_v1  ;;  %v186_v45 = vsub.f32 %v101_v2, %v9606_v1  ;;  %v188_v40 = vsub.f32 %v103_v5, %v9606_v1  ;;  %v3746_v62 = vld [vmem:[#allocation9 + $0xb50] sm:$0xff] }
 0x3a5   :  { %v3751_v2 = vld [vmem:[#allocation9 + $0xb78] sm:$0xff]  ;;  %v8661_v5 = vcombine.low %v3739_v41, %v3743_v43 }
 0x3a6   :  { %6897 = vmatpush1.bf16.msra.mxu0 %v8603_v30  ;;  %v185_v30 = vsub.f32 %v100_v58, %v9606_v1  ;;  %v8653_v58 = vcombine.low %v3731_v27, %v3735_v61  ;;  %v195_v55 = vmul.f32 %v187_v39, %v9494_v10  ;;  %v194_v3 = vmul.f32 %v186_v45, %v9494_v10  ;;  %v3782_v39 = vld [vmem:[#allocation9 + $0xc70] sm:$0xff]  ;;  %v3779_v45 = vld [vmem:[#allocation9 + $0xc58] sm:$0xff] }
 0x3a7   :  { %7069 = vmatpush1.bf16.msra.mxu1 %v8605_v32  ;;  %6898 = vmatprep.subr.bf16.mxu0 %v8612_v33  ;;  %v8654_v32 = vcombine.high %v3731_v27, %v3735_v61  ;;  %v3738_v33 = vld [vmem:[#allocation9 + $0xb10] sm:$0xff]  ;;  %v196_v56 = vmul.f32 %v188_v40, %v9494_v10  ;;  %v3771_v61 = vld [vmem:[#allocation9 + $0xc18] sm:$0xff] }
 0x3a8   :  { %7070 = vmatprep.subr.bf16.mxu1 %v8614_v36  ;;  %v3742_v36 = vld [vmem:[#allocation9 + $0xb30] sm:$0xff]  ;;  %v7894_v11 = vmul.f32 -1.442695, %v195_v55  ;;  %v7893_v13 = vmul.f32 -1.442695, %v194_v3 }
 0x3a9   :  { %v8659_v4 = vcombine.low %v3738_v33, %v3742_v36  ;;  %v3774_v27 = vld [vmem:[#allocation9 + $0xc30] sm:$0xff] }
 0x3aa   :  { %6899 = vmatpush1.bf16.msra.mxu0 %v8611_v47  ;;  %v8651_v47 = vcombine.low %v3730_v60, %v3734_v63  ;;  %v3770_v63 = vld [vmem:[#allocation9 + $0xc10] sm:$0xff] }
 0x3ab   :  { %7071 = vmatpush1.bf16.msra.mxu1 %v8613_v50  ;;  %6900 = vmatprep.subr.bf16.mxu0 %v8620_v51  ;;  %v8660_v50 = vcombine.high %v3738_v33, %v3742_v36  ;;  %v193_v51 = vmul.f32 %v185_v30, %v9494_v10  ;;  %v8692_v30 = vcombine.high %v3770_v63, %v3774_v27  ;;  %v3778_v36 = vld [vmem:[#allocation9 + $0xc50] sm:$0xff] }
 0x3ac   :  { %7072 = vmatprep.subr.bf16.mxu1 %v8622_v54  ;;  %v3750_v54 = vld [vmem:[#allocation9 + $0xb70] sm:$0xff]  ;;  %v8691_v43 = vcombine.low %v3770_v63, %v3774_v27 }
 0x3ad   :  { %v8668_v6 = vcombine.high %v3746_v62, %v3750_v54 }
 0x3ae   :  { %6901 = vmatpush1.bf16.msra.mxu0 %v8619_v38  ;;  %v7892_v38 = vmul.f32 -1.442695, %v193_v51  ;;  %v8700_v51 = vcombine.high %v3778_v36, %v3782_v39 }
 0x3af   :  { %7073 = vmatpush1.bf16.msra.mxu1 %v8621_v7  ;;  %6902 = vmatprep.subr.bf16.mxu0 %v8628_v8  ;;  %v8670_v7 = vcombine.high %v3747_v53, %v3751_v2  ;;  %v3754_v8 = vld [vmem:[#allocation9 + $0xb90] sm:$0xff] }
 0x3b0   :  { %7074 = vmatprep.subr.bf16.mxu1 %v8630_v35  ;;  %v3758_v35 = vld [vmem:[#allocation9 + $0xbb0] sm:$0xff]  ;;  %9184 = vpow2.f32 %v7892_v38 }
 0x3b1   :  { %9186 = vpow2.f32 %v7894_v11  ;;  %v3795_v11 = vld [vmem:[#allocation9 + $0xcd8] sm:$0xff] }
 0x3b2   :  { %6903 = vmatpush1.bf16.msra.mxu0 %v8627_v14  ;;  %v8667_v14 = vcombine.low %v3746_v62, %v3750_v54  ;;  %9188 = vpow2.f32 %v7893_v13  ;;  %v3790_v62 = vld [vmem:[#allocation9 + $0xcb0] sm:$0xff] }
 0x3b3   :  { %7075 = vmatpush1.bf16.msra.mxu1 %v8629_v17  ;;  %6904 = vmatprep.subr.bf16.mxu0 %v8636_v18  ;;  %v7895_v17 = vmul.f32 -1.442695, %v196_v56  ;;  %v8669_v18 = vcombine.low %v3747_v53, %v3751_v2  ;;  %v3787_v53 = vld [vmem:[#allocation9 + $0xc98] sm:$0xff] }
 0x3b4   :  { %7076 = vmatprep.subr.bf16.mxu1 %v8638_v44  ;;  %v8676_v44 = vcombine.high %v3754_v8, %v3758_v35  ;;  %v3791_v2 = vld [vmem:[#allocation9 + $0xcb8] sm:$0xff] }
 0x3b5   :  { %9190 = vpow2.f32 %v7895_v17  ;;  %v3806_v17 = vld [vmem:[#allocation9 + $0xd30] sm:$0xff] }
 0x3b6   :  { %6905 = vmatpush1.bf16.msra.mxu0 %v8635_v24  ;;  %v3767_v24 = vld [vmem:[#allocation9 + $0xbf8] sm:$0xff] }
 0x3b7   :  { %7077 = vmatpush1.bf16.msra.mxu1 %v8637_v25  ;;  %6906 = vmatprep.subr.bf16.mxu0 %v8644_v26  ;;  %v8675_v25 = vcombine.low %v3754_v8, %v3758_v35  ;;  %v8677_v26 = vcombine.low %v3755_v37, %v3759_v12  ;;  %v8686_v60 = vcombine.high %v3763_v23, %v3767_v24  ;;  %v3794_v8 = vld [vmem:[#allocation9 + $0xcd0] sm:$0xff]  ;;  %v3799_v37 = vld [vmem:[#allocation9 + $0xcf8] sm:$0xff] }
 0x3b8   :  { %7078 = vmatprep.subr.bf16.mxu1 %v8646_v57  ;;  %v8684_v57 = vcombine.high %v3762_v21, %v3766_v22  ;;  %v3798_v35 = vld [vmem:[#allocation9 + $0xcf0] sm:$0xff]  ;;  %v8709_v12 = vcombine.low %v3787_v53, %v3791_v2 }
 0x3b9   :  { %v8716_v13 = vcombine.high %v3794_v8, %v3798_v35 }
 0x3ba   :  { %6907 = vmatpush1.bf16.msra.mxu0 %v8643_v28  ;;  %v3775_v28 = vld [vmem:[#allocation9 + $0xc38] sm:$0xff]  ;;  %v9185_v33 = vpop.eup %9184 }
 0x3bb   :  { %7079 = vmatpush1.bf16.msra.mxu1 %v8645_v29  ;;  %6908 = vmatprep.subr.bf16.mxu0 %v8652_v20  ;;  %v8683_v29 = vcombine.low %v3762_v21, %v3766_v22  ;;  %v8685_v20 = vcombine.low %v3763_v23, %v3767_v24  ;;  %v9187_v41 = vpop.eup %9186  ;;  %v225_v54 = vadd.f32 1.0, %v9185_v33  ;;  %v8717_v21 = vcombine.low %v3795_v11, %v3799_v37  ;;  %v3810_v24 = vld [vmem:[#allocation9 + $0xd50] sm:$0xff] }
 0x3bc   :  { %7080 = vmatprep.subr.bf16.mxu1 %v8654_v32  ;;  %v8694_v32 = vcombine.high %v3771_v61, %v3775_v28  ;;  %v9189_v40 = vpop.eup %9188  ;;  %v227_v3 = vadd.f32 1.0, %v9187_v41 }
 0x3bd   :  { %v226_v56 = vadd.f32 1.0, %v9189_v40  ;;  %9192 = vrcp.f32 %v225_v54  ;;  %v3826_v54 = vld [vmem:[#allocation9 + $0xdd0] sm:$0xff] }
 0x3be   :  { %6909 = vmatpush1.bf16.msra.mxu0 %v8651_v47  ;;  %v3783_v47 = vld [vmem:[#allocation9 + $0xc78] sm:$0xff]  ;;  %9194 = vrcp.f32 %v227_v3 }
 0x3bf   :  { %7081 = vmatpush1.bf16.msra.mxu1 %v8653_v58  ;;  %6910 = vmatprep.subr.bf16.mxu0 %v8660_v50  ;;  %v8693_v58 = vcombine.low %v3771_v61, %v3775_v28  ;;  %v9191_v50 = vpop.eup %9190  ;;  %v8702_v55 = vcombine.high %v3779_v45, %v3783_v47  ;;  %9196 = vrcp.f32 %v226_v56  ;;  %v3827_v56 = vld [vmem:[#allocation9 + $0xdd8] sm:$0xff] }
 0x3c0   :  { %7082 = vmatprep.subr.bf16.mxu1 %v8662_v49  ;;  %v3786_v49 = vld [vmem:[#allocation9 + $0xc90] sm:$0xff]  ;;  %v228_v38 = vadd.f32 1.0, %v9191_v50 }
 0x3c2   :  { %6911 = vmatpush1.bf16.msra.mxu0 %v8659_v4  ;;  %v8699_v4 = vcombine.low %v3778_v36, %v3782_v39  ;;  %9198 = vrcp.f32 %v228_v38  ;;  %v3819_v36 = vld [vmem:[#allocation9 + $0xd98] sm:$0xff] }
 0x3c3   :  { %7083 = vmatpush1.bf16.msra.mxu1 %v8661_v5  ;;  %6912 = vmatprep.subr.bf16.mxu0 %v8668_v6  ;;  %v8701_v5 = vcombine.low %v3779_v45, %v3783_v47  ;;  %v8708_v6 = vcombine.high %v3786_v49, %v3790_v62  ;;  %v3823_v39 = vld [vmem:[#allocation9 + $0xdb8] sm:$0xff] }
 0x3c4   :  { %7084 = vmatprep.subr.bf16.mxu1 %v8670_v7  ;;  %v8710_v7 = vcombine.high %v3787_v53, %v3791_v2 }
 0x3c6   :  { %6913 = vmatpush1.bf16.msra.mxu0 %v8667_v14  ;;  %v8718_v14 = vcombine.high %v3795_v11, %v3799_v37  ;;  %v8741_v11 = vcombine.low %v3819_v36, %v3823_v39 }
 0x3c7   :  { %7085 = vmatpush1.bf16.msra.mxu1 %v8669_v18  ;;  %6914 = vmatprep.subr.bf16.mxu0 %v8676_v44  ;;  %v3803_v18 = vld [vmem:[#allocation9 + $0xd18] sm:$0xff] }
 0x3c8   :  { %7086 = vmatprep.subr.bf16.mxu1 %v8678_v16  ;;  %v3807_v44 = vld [vmem:[#allocation9 + $0xd38] sm:$0xff]  ;;  %v8715_v16 = vcombine.low %v3794_v8, %v3798_v35 }
 0x3c9   :  { %v8726_v23 = vcombine.high %v3803_v18, %v3807_v44  ;;  %v8725_v61 = vcombine.low %v3803_v18, %v3807_v44 }
 0x3ca   :  { %6915 = vmatpush1.bf16.msra.mxu0 %v8675_v25  ;;  %v3814_v25 = vld [vmem:[#allocation9 + $0xd70] sm:$0xff] }
 0x3cb   :  { %7087 = vmatpush1.bf16.msra.mxu1 %v8677_v26  ;;  %6916 = vmatprep.subr.bf16.mxu0 %v8684_v57  ;;  %v3811_v26 = vld [vmem:[#allocation9 + $0xd58] sm:$0xff]  ;;  %v8732_v28 = vcombine.high %v3810_v24, %v3814_v25  ;;  %v8731_v41 = vcombine.low %v3810_v24, %v3814_v25 }
 0x3cc   :  { %7088 = vmatprep.subr.bf16.mxu1 %v8686_v60  ;;  %v3815_v57 = vld [vmem:[#allocation9 + $0xd78] sm:$0xff]  ;;  %v9628_v60 = vpop.eup %9192 }
 0x3cd   :  { %v9195_v27 = vpop.eup %9194  ;;  %v8733_v47 = vcombine.low %v3811_v26, %v3815_v57 }
 0x3ce   :  { %6917 = vmatpush1.bf16.msra.mxu0 %v8683_v29  ;;  %v9197_v29 = vpop.eup %9196  ;;  %v251_v45 = vsub.f32 1.0, %v9195_v27 }
 0x3cf   :  { %7089 = vmatpush1.bf16.msra.mxu1 %v8685_v20  ;;  %6929 = vmatprep.subr.bf16.mxu0 %v8692_v30  ;;  %v8734_v20 = vcombine.high %v3811_v26, %v3815_v57  ;;  %v3818_v30 = vld [vmem:[#allocation9 + $0xd90] sm:$0xff]  ;;  %v9199_v33 = vpop.eup %9198  ;;  %v3835_v57 = vld [vmem:[#allocation9 + $0xe18] sm:$0xff] }
 0x3d0   :  { %7101 = vmatprep.subr.bf16.mxu1 %v8694_v32  ;;  %v3822_v32 = vld [vmem:[#allocation9 + $0xdb0] sm:$0xff] }
 0x3d1   :  { %6919 = vmatmul.mubr.bf16.vlgmr.msra.gmra.mrb[12].mxu0 %v9573_v9  ;;  %v8740_v40 = vcombine.high %v3818_v30, %v3822_v32  ;;  %v8739_v35 = vcombine.low %v3818_v30, %v3822_v32 }
 0x3d2   :  { %7091 = vmatmul.mubr.bf16.vlgmr.msra.gmra.mrb[12].mxu1 %v9573_v9  ;;  %6930 = vmatpush1.bf16.msra.mxu0 %v8691_v43  ;;  %v8707_v9 = vcombine.low %v3786_v49, %v3790_v62  ;;  %v249_v43 = vsub.f32 1.0, %v9628_v60  ;;  %v252_v49 = vsub.f32 1.0, %v9199_v33  ;;  %v8742_v62 = vcombine.high %v3819_v36, %v3823_v39  ;;  %v3839_v60 = vld [vmem:[#allocation9 + $0xe38] sm:$0xff]  ;;  %v3842_v33 = vld [vmem:[#allocation9 + $0xe50] sm:$0xff] }
 0x3d3   :  { %6961 = vmatprep.mubr.bf16.mxu0 %v9583_v19  ;;  %7102 = vmatpush1.bf16.msra.mxu1 %v8693_v58  ;;  %v8758_v32 = vcombine.high %v3835_v57, %v3839_v60  ;;  %v3846_v36 = vld [vmem:[#allocation9 + $0xe70] sm:$0xff] }
 0x3d4   :  { %7133 = vmatprep.mubr.bf16.mxu1 %v9583_v19  ;;  %6931 = vmatprep.subr.bf16.mxu0 %v8700_v51  ;;  %v3802_v19 = vld [vmem:[#allocation9 + $0xd10] sm:$0xff]  ;;  %v250_v51 = vsub.f32 1.0, %v9197_v29 }
 0x3d5   :  { %7103 = vmatprep.subr.bf16.mxu1 %v8702_v55  ;;  %v8724_v22 = vcombine.high %v3802_v19, %v3806_v17  ;;  %v8723_v63 = vcombine.low %v3802_v19, %v3806_v17  ;;  %v3830_v55 = vld [vmem:[#allocation9 + $0xdf0] sm:$0xff] }
 0x3d6   :  { %6932 = vmatpush1.bf16.msra.mxu0 %v8699_v4  ;;  %v8748_v19 = vcombine.high %v3826_v54, %v3830_v55 }
 0x3d7   :  { %7104 = vmatpush1.bf16.msra.mxu1 %v8701_v5  ;;  %6933 = vmatprep.subr.bf16.mxu0 %v8708_v6  ;;  %v3831_v5 = vld [vmem:[#allocation9 + $0xdf8] sm:$0xff] }
 0x3d8   :  { %7105 = vmatprep.subr.bf16.mxu1 %v8710_v7  ;;  %v8749_v44 = vcombine.low %v3827_v56, %v3831_v5 }
 0x3da   :  { %6934 = vmatpush1.bf16.msra.mxu0 %v8707_v9 }
 0x3db   :  { %7106 = vmatpush1.bf16.msra.mxu1 %v8709_v12  ;;  %6935 = vmatprep.subr.bf16.mxu0 %v8716_v13 }
 0x3dc   :  { %7107 = vmatprep.subr.bf16.mxu1 %v8718_v14  ;;  %v8747_v14 = vcombine.low %v3826_v54, %v3830_v55  ;;  %v3855_v54 = vld [vmem:[#allocation9 + $0xeb8] sm:$0xff]  ;;  %v8763_v55 = vcombine.low %v3842_v33, %v3846_v36 }
 0x3de   :  { %6936 = vmatpush1.bf16.msra.mxu0 %v8715_v16  ;;  %v8750_v16 = vcombine.high %v3827_v56, %v3831_v5  ;;  %v3862_v56 = vld [vmem:[#allocation9 + $0xef0] sm:$0xff]  ;;  %v3859_v5 = vld [vmem:[#allocation9 + $0xed8] sm:$0xff] }
 0x3df   :  { %7108 = vmatpush1.bf16.msra.mxu1 %v8717_v21  ;;  %6937 = vmatprep.subr.bf16.mxu0 %v8724_v22  ;;  %v3834_v21 = vld [vmem:[#allocation9 + $0xe10] sm:$0xff] }
 0x3e0   :  { %7109 = vmatprep.subr.bf16.mxu1 %v8726_v23  ;;  %v3838_v22 = vld [vmem:[#allocation9 + $0xe30] sm:$0xff] }
 0x3e1   :  { %v8756_v30 = vcombine.high %v3834_v21, %v3838_v22 }
 0x3e2   :  { %6938 = vmatpush1.bf16.msra.mxu0 %v8723_v63 }
 0x3e3   :  { %7110 = vmatpush1.bf16.msra.mxu1 %v8725_v61  ;;  %6939 = vmatprep.subr.bf16.mxu0 %v8732_v28 }
 0x3e4   :  { %v6619_v58 = vpop.f32.mrb[8].mxu0  ;;  %v6791_v50 = vpop.f32.mrb[8].mxu1  ;;  %7111 = vmatprep.subr.bf16.mxu1 %v8734_v20 }
 0x3e5   :  { %v7144_v53 = vmax.f32 %v6619_v58, 0.0  ;;  %v7146_v2 = vmax.f32 %v6791_v50, 0.0  ;;  %v6621_v3 = vpop.f32.mrb[9].mxu0  ;;  %v6793_v4 = vpop.f32.mrb[9].mxu1  ;;  %v8764_v58 = vcombine.high %v3842_v33, %v3846_v36  ;;  %v3886_v33 = vld [vmem:[#allocation9 + $0xfb0] sm:$0xff]  ;;  %v3883_v36 = vld [vmem:[#allocation9 + $0xf98] sm:$0xff] }
 0x3e6   :  { %v7145_v6 = vmax.f32 %v6621_v3, 0.0  ;;  %v7147_v38 = vmax.f32 %v6793_v4, 0.0  ;;  %v6623_v7 = vpop.f32.mrb[10].mxu0  ;;  %v6795_v8 = vpop.f32.mrb[10].mxu1  ;;  %6940 = vmatpush1.bf16.msra.mxu0 %v8731_v41  ;;  %v3858_v4 = vld [vmem:[#allocation9 + $0xed0] sm:$0xff] }
 0x3e7   :  { %v7152_v37 = vmax.f32 %v6623_v7, 0.0  ;;  %v7154_v9 = vmax.f32 %v6795_v8, 0.0  ;;  %7112 = vmatpush1.bf16.msra.mxu1 %v8733_v47  ;;  %v6625_v12 = vpop.f32.mrb[11].mxu0  ;;  %v6797_v13 = vpop.f32.mrb[11].mxu1  ;;  %6941 = vmatprep.subr.bf16.mxu0 %v8740_v40  ;;  %v9631_v23 = vmul.f32 %v7144_v53, %v249_v43  ;;  %v9633_v24 = vmul.f32 %v7146_v2, %v251_v45 }
 0x3e8   :  { %v7153_v17 = vmax.f32 %v6625_v12, 0.0  ;;  %v7155_v18 = vmax.f32 %v6797_v13, 0.0  ;;  %7113 = vmatprep.subr.bf16.mxu1 %v8742_v62  ;;  %v9639_v63 = vmul.f32 %v7145_v6, %v250_v51  ;;  %v9641_v27 = vmul.f32 %v7147_v38, %v252_v49  ;;  %v3851_v62 = vld [vmem:[#allocation9 + $0xe98] sm:$0xff] }
 0x3e9   :  { %v9635_v25 = vmul.f32 %v7152_v37, %v249_v43  ;;  %v9637_v26 = vmul.f32 %v7154_v9, %v251_v45  ;;  %v3843_v43 = vld [vmem:[#allocation9 + $0xe58] sm:$0xff]  ;;  %v8755_v47 = vcombine.low %v3834_v21, %v3838_v22  ;;  %v8757_v40 = vcombine.low %v3835_v57, %v3839_v60  ;;  %v3870_v37 = vld [vmem:[#allocation9 + $0xf30] sm:$0xff] }
 0x3ea   :  { %v9643_v61 = vmul.f32 %v7153_v17, %v250_v51  ;;  %v9645_v28 = vmul.f32 %v7155_v18, %v252_v49  ;;  %6942 = vmatpush1.bf16.msra.mxu0 %v8739_v35  ;;  %v3847_v45 = vld [vmem:[#allocation9 + $0xe78] sm:$0xff]  ;;  %v3850_v51 = vld [vmem:[#allocation9 + $0xe90] sm:$0xff]  ;;  %v8774_v3 = vcombine.high %v3851_v62, %v3855_v54  ;;  %v8773_v7 = vcombine.low %v3851_v62, %v3855_v54 }
 0x3eb   :  { %v7176_v29 = vpack.c.bf16 %v9635_v25, %v9631_v23  ;;  %v7178_v20 = vpack.c.bf16 %v9637_v26, %v9633_v24  ;;  %7114 = vmatpush1.bf16.msra.mxu1 %v8741_v11  ;;  %6943 = vmatprep.subr.bf16.mxu0 %v8748_v19  ;;  %v8766_v50 = vcombine.high %v3843_v43, %v3847_v45  ;;  %v3854_v49 = vld [vmem:[#allocation9 + $0xeb0] sm:$0xff]  ;;  %v3863_v6 = vld [vmem:[#allocation9 + $0xef8] sm:$0xff]  ;;  %v9136_v26 = vld [vmem:[#allocation10 + $0x160] sm:$0xff]  }
 0x3ec   :  { %7115 = vmatprep.subr.bf16.mxu1 %v8750_v16  ;;  %v7177_v39 = vpack.c.bf16 %v9643_v61, %v9639_v63  ;;  %v7179_v41 = vpack.c.bf16 %v9645_v28, %v9641_v27  ;;  %v8765_v53 = vcombine.low %v3843_v43, %v3847_v45  ;;  %v8772_v2 = vcombine.high %v3850_v51, %v3854_v49  ;;  %v3866_v11 = vld [vmem:[#allocation9 + $0xf10] sm:$0xff]  ;;  %v3867_v9 = vld [vmem:[#allocation9 + $0xf18] sm:$0xff]  ;;  %v9105_v27 = vld [vmem:[#allocation10 + $0xe0] sm:$0xff]  }
 0x3ed   :  { %v8771_v38 = vcombine.low %v3850_v51, %v3854_v49  ;;  %v8780_v8 = vcombine.high %v3858_v4, %v3862_v56  ;;  %v8782_v35 = vcombine.high %v3859_v5, %v3863_v6  ;;  %v3871_v12 = vld [vmem:[#allocation9 + $0xf38] sm:$0xff]  ;;  %v8779_v13 = vcombine.low %v3858_v4, %v3862_v56  ;;  %v3874_v18 = vld [vmem:[#allocation9 + $0xf50] sm:$0xff]  ;;  %v9088_v56 = vld [vmem:[#allocation10 + $0x40] sm:$0xff]  }
 0x3ee   :  { %6944 = vmatpush1.bf16.msra.mxu0 %v8747_v14  ;;  %v8781_v14 = vcombine.low %v3859_v5, %v3863_v6  ;;  %v8788_v19 = vcombine.high %v3866_v11, %v3870_v37  ;;  %v8790_v17 = vcombine.high %v3867_v9, %v3871_v12  ;;  %v3875_v16 = vld [vmem:[#allocation9 + $0xf58] sm:$0xff]  ;;  %v8787_v22 = vcombine.low %v3866_v11, %v3870_v37  ;;  %v3894_v51 = vld [vmem:[#allocation9 + $0xff0] sm:$0xff]  ;;  %v9089_v5 = vld [vmem:[#allocation10 + $0xc0] sm:$0xff]  }
 0x3ef   :  { %7116 = vmatpush1.bf16.msra.mxu1 %v8749_v44  ;;  %6945 = vmatprep.subr.bf16.mxu0 %v8756_v30  ;;  %v3878_v44 = vld [vmem:[#allocation9 + $0xf70] sm:$0xff]  ;;  %v3879_v21 = vld [vmem:[#allocation9 + $0xf78] sm:$0xff]  ;;  %v8789_v57 = vcombine.low %v3867_v9, %v3871_v12  ;;  %v9090_v6 = vld [vmem:[#allocation10] sm:$0xff]  }
 0x3f0   :  { %7117 = vmatprep.subr.bf16.mxu1 %v8758_v32  ;;  %v8796_v60 = vcombine.high %v3874_v18, %v3878_v44  ;;  %v8798_v30 = vcombine.high %v3875_v16, %v3879_v21  ;;  %v3882_v32 = vld [vmem:[#allocation9 + $0xf90] sm:$0xff]  ;;  %v3887_v43 = vld [vmem:[#allocation9 + $0xfb8] sm:$0xff]  ;;  %v8795_v45 = vcombine.low %v3874_v18, %v3878_v44  ;;  %v9095_v11 = vld [vmem:[#allocation10 + $0x88] sm:$0xff]  }
 0x3f1   :  { %v3891_v49 = vld [vmem:[#allocation9 + $0xfd8] sm:$0xff]  ;;  %v8803_v54 = vcombine.low %v3882_v32, %v3886_v33  ;;  %v9096_v37 = vld [vmem:[#allocation10 + $0x50] sm:$0xff]   ;;  %v9106_v28 = vld [vmem:[#allocation10 + $0x20] sm:$0xff]  }
 0x3f2   :  { %6946 = vmatpush1.bf16.msra.mxu0 %v8755_v47  ;;  %v8797_v47 = vcombine.low %v3875_v16, %v3879_v21  ;;  %v3895_v62 = vld [vmem:[#allocation9 + $0xff8] sm:$0xff]  ;;  %v9097_v9 = vld [vmem:[#allocation10 + $0xd0] sm:$0xff]   ;;  %v9110_v18 = vld [vmem:[#allocation10 + $0x28] sm:$0xff]  }
 0x3f3   :  { %7118 = vmatpush1.bf16.msra.mxu1 %v8757_v40  ;;  %6947 = vmatprep.subr.bf16.mxu0 %v8764_v58  ;;  %v8804_v40 = vcombine.high %v3882_v32, %v3886_v33  ;;  %v8806_v58 = vcombine.high %v3883_v36, %v3887_v43  ;;  %v8813_v4 = vcombine.low %v3891_v49, %v3895_v62  ;;  %v9098_v12 = vld [vmem:[#allocation10 + $0x10] sm:$0xff]   ;;  %v9102_v63 = vld [vmem:[#allocation10 + $0x18] sm:$0xff]   ;;  %v9111_v44 = vld [vmem:[#allocation10 + $0xa8] sm:$0xff]  }
 0x3f4   :  { %7119 = vmatprep.subr.bf16.mxu1 %v8766_v50  ;;  %v3890_v50 = vld [vmem:[#allocation9 + $0xfd0] sm:$0xff]  ;;  %v9103_v61 = vld [vmem:[#allocation10 + $0x98] sm:$0xff]  }
 0x3f5   :  { %v9112_v16 = vld [vmem:[#allocation10 + $0x70] sm:$0xff]   ;;  %v9118_v32 = vld [vmem:[#allocation10 + $0x38] sm:$0xff]  }
 0x3f6   :  { %6948 = vmatpush1.bf16.msra.mxu0 %v8763_v55  ;;  %v8805_v55 = vcombine.low %v3883_v36, %v3887_v43  ;;  %v9113_v21 = vld [vmem:[#allocation10 + $0xf0] sm:$0xff]   ;;  %v9119_v33 = vld [vmem:[#allocation10 + $0xb8] sm:$0xff]   ;;  %v9120_v36 = vld [vmem:[#allocation10 + $0x140] sm:$0xff]  }
 0x3f7   :  { %7120 = vmatpush1.bf16.msra.mxu1 %v8765_v53  ;;  %6949 = vmatprep.subr.bf16.mxu0 %v8772_v2  ;;  %v8812_v53 = vcombine.high %v3890_v50, %v3894_v51  ;;  %v8814_v2 = vcombine.high %v3891_v49, %v3895_v62  ;;  %v9121_v43 = vld [vmem:[#allocation10 + $0x1c0] sm:$0xff]   ;;  %v9128_v49 = vld [vmem:[#allocation10 + $0x150] sm:$0xff]   ;;  %v9133_v23 = vld [vmem:[#allocation10 + $0x1d8] sm:$0xff]  }
 0x3f8   :  { %7121 = vmatprep.subr.bf16.mxu1 %v8774_v3  ;;  %v8811_v3 = vcombine.low %v3890_v50, %v3894_v51  ;;  %v9126_v50 = vld [vmem:[#allocation10 + $0x108] sm:$0xff]   ;;  %v9129_v62 = vld [vmem:[#allocation10 + $0x1d0] sm:$0xff]   ;;  %v9134_v25 = vld [vmem:[#allocation10 + $0x118] sm:$0xff]  }
 0x3f9   :  { %v9127_v51 = vld [vmem:[#allocation10 + $0x188] sm:$0xff]   ;;  %v9135_v24 = vld [vmem:[#allocation10 + $0x198] sm:$0xff]  }
 0x3fa   :  { %6950 = vmatpush1.bf16.msra.mxu0 %v8771_v38  ;;  %v9091_v38 = vld [vmem:[#allocation10 + $0x80] sm:$0xff]  }
 0x3fb   :  { %7122 = vmatpush1.bf16.msra.mxu1 %v8773_v7  ;;  %6951 = vmatprep.subr.bf16.mxu0 %v8780_v8  ;;  %v9092_v7 = vld [vmem:[#allocation10 + $0x48] sm:$0xff]  }
 0x3fc   :  { %7123 = vmatprep.subr.bf16.mxu1 %v8782_v35  ;;  %v9093_v8 = vld [vmem:[#allocation10 + $0xc8] sm:$0xff]  }
 0x3fd   :  { %v9094_v35 = vld [vmem:[#allocation10 + $0x8] sm:$0xff]  }
 0x3fe   :  { %6952 = vmatpush1.bf16.msra.mxu0 %v8779_v13  ;;  %v9100_v13 = vld [vmem:[#allocation10 + $0x58] sm:$0xff]  }
 0x3ff   :  { %7124 = vmatpush1.bf16.msra.mxu1 %v8781_v14  ;;  %6953 = vmatprep.subr.bf16.mxu0 %v8788_v19  ;;  %v9101_v14 = vld [vmem:[#allocation10 + $0xd8] sm:$0xff]   ;;  %v9108_v19 = vld [vmem:[#allocation10 + $0x68] sm:$0xff]  }
 0x400   :  { %7125 = vmatprep.subr.bf16.mxu1 %v8790_v17  ;;  %v9109_v17 = vld [vmem:[#allocation10 + $0xe8] sm:$0xff]  }
 0x402   :  { %6954 = vmatpush1.bf16.msra.mxu0 %v8787_v22  ;;  %v9114_v22 = vld [vmem:[#allocation10 + $0x30] sm:$0xff]  }
 0x403   :  { %7126 = vmatpush1.bf16.msra.mxu1 %v8789_v57  ;;  %6955 = vmatprep.subr.bf16.mxu0 %v8796_v60  ;;  %v9115_v57 = vld [vmem:[#allocation10 + $0xb0] sm:$0xff]   ;;  %v9116_v60 = vld [vmem:[#allocation10 + $0x78] sm:$0xff]  }
 0x404   :  { %7127 = vmatprep.subr.bf16.mxu1 %v8798_v30  ;;  %v9117_v30 = vld [vmem:[#allocation10 + $0xf8] sm:$0xff]  }
 0x406   :  { %6956 = vmatpush1.bf16.msra.mxu0 %v8795_v45  ;;  %v9122_v45 = vld [vmem:[#allocation10 + $0x100] sm:$0xff]  }
 0x407   :  { %7128 = vmatpush1.bf16.msra.mxu1 %v8797_v47  ;;  %6957 = vmatprep.subr.bf16.mxu0 %v8804_v40  ;;  %v9123_v47 = vld [vmem:[#allocation10 + $0x180] sm:$0xff]   ;;  %v9124_v40 = vld [vmem:[#allocation10 + $0x148] sm:$0xff]  }
 0x408   :  { %7129 = vmatprep.subr.bf16.mxu1 %v8806_v58  ;;  %v9125_v58 = vld [vmem:[#allocation10 + $0x1c8] sm:$0xff]  }
 0x40a   :  { %6958 = vmatpush1.bf16.msra.mxu0 %v8803_v54  ;;  %v9130_v54 = vld [vmem:[#allocation10 + $0x110] sm:$0xff]  }
 0x40b   :  { %7130 = vmatpush1.bf16.msra.mxu1 %v8805_v55  ;;  %6959 = vmatprep.subr.bf16.mxu0 %v8812_v53  ;;  %v9131_v55 = vld [vmem:[#allocation10 + $0x190] sm:$0xff]   ;;  %v9132_v53 = vld [vmem:[#allocation10 + $0x158] sm:$0xff]  }
 0x40c   :  { %7131 = vmatprep.subr.bf16.mxu1 %v8814_v2  ;;  %v9139_v2 = vld [vmem:[#allocation10 + $0x1a0] sm:$0xff]  }
 0x40e   :  { %6960 = vmatpush1.bf16.msra.mxu0 %v8811_v3  ;;  %v9140_v3 = vld [vmem:[#allocation10 + $0x168] sm:$0xff]  }
 0x40f   :  { %7132 = vmatpush1.bf16.msra.mxu1 %v8813_v4  ;;  %8879 = vmatprep.subr.bf16.mxu0 %v9088_v56  ;;  %v9141_v4 = vld [vmem:[#allocation10 + $0x1e8] sm:$0xff]  }
 0x410   :  { %8901 = vmatprep.subr.bf16.mxu1 %v9089_v5  ;;  %v9142_v56 = vld [vmem:[#allocation10 + $0x128] sm:$0xff]  }
 0x411   :  { %6962 = vmatmul.mubr.bf16.vlgmr.msra.gmra.mrb[12].mxu0 %v9575_v15  ;;  %v9143_v5 = vld [vmem:[#allocation10 + $0x1a8] sm:$0xff]  }
 0x412   :  { %7134 = vmatmul.mubr.bf16.vlgmr.msra.gmra.mrb[12].mxu1 %v9575_v15  ;;  %8880 = vmatpush3.bf16.msra.mxu0 %v9090_v6  ;;  %v9099_v15 = vld [vmem:[#allocation10 + $0x90] sm:$0xff]  }
 0x413   :  { %7728 = vmatprep.mubr.bf16.mxu0 %v7177_v39  ;;  %8902 = vmatpush3.bf16.msra.mxu1 %v9091_v38  ;;  %v9104_v39 = vld [vmem:[#allocation10 + $0x60] sm:$0xff]   ;;  %v9144_v6 = vld [vmem:[#allocation10 + $0x170] sm:$0xff]  }
 0x414   :  { %7769 = vmatprep.mubr.bf16.mxu1 %v7179_v41  ;;  %8881 = vmatprep.subr.bf16.mxu0 %v9092_v7  ;;  %v9107_v41 = vld [vmem:[#allocation10 + $0xa0] sm:$0xff]   ;;  %v9145_v38 = vld [vmem:[#allocation10 + $0x1f0] sm:$0xff]  }
 0x415   :  { %8903 = vmatprep.subr.bf16.mxu1 %v9093_v8  ;;  %v9146_v7 = vld [vmem:[#allocation10 + $0x130] sm:$0xff]  }
 0x416   :  { %8882 = vmatpush3.bf16.msra.mxu0 %v9094_v35  ;;  %v9147_v8 = vld [vmem:[#allocation10 + $0x1b0] sm:$0xff]   ;;  %v9148_v35 = vld [vmem:[#allocation10 + $0x178] sm:$0xff]  }
 0x417   :  { %8904 = vmatpush3.bf16.msra.mxu1 %v9095_v11  ;;  %8883 = vmatprep.subr.bf16.mxu0 %v9096_v37  ;;  %v9149_v11 = vld [vmem:[#allocation10 + $0x1f8] sm:$0xff]  }
 0x418   :  { %8905 = vmatprep.subr.bf16.mxu1 %v9097_v9  ;;  %v9150_v37 = vld [vmem:[#allocation10 + $0x138] sm:$0xff]  }
 0x419   :  { %v9151_v9 = vld [vmem:[#allocation10 + $0x1b8] sm:$0xff]  }
 0x41a   :  { %8884 = vmatpush3.bf16.msra.mxu0 %v9098_v12  ;;  %v189_v12 = vsub.f32 %v104_v48, %v9606_v1 }
 0x41b   :  { %8906 = vmatpush3.bf16.msra.mxu1 %v9099_v15  ;;  %8885 = vmatprep.subr.bf16.mxu0 %v9100_v13  ;;  %v191_v15 = vsub.f32 %v106_v52, %v9606_v1  ;;  %v190_v13 = vsub.f32 %v105_v59, %v9606_v1 }
 0x41c   :  { %8907 = vmatprep.subr.bf16.mxu1 %v9101_v14  ;;  %v192_v14 = vsub.f32 %v107_v0, %v9606_v1 }
 0x41e   :  { %8886 = vmatpush3.bf16.msra.mxu0 %v9102_v63  ;;  %v197_v63 = vmul.f32 %v189_v12, %v9494_v10  ;;  %v200_v31 = vmul.f32 %v192_v14, %v9494_v10 }
 0x41f   :  { %8908 = vmatpush3.bf16.msra.mxu1 %v9103_v61  ;;  %8887 = vmatprep.subr.bf16.mxu0 %v9104_v39  ;;  %v199_v61 = vmul.f32 %v191_v15, %v9494_v10  ;;  %v198_v39 = vmul.f32 %v190_v13, %v9494_v10 }
 0x420   :  { %8909 = vmatprep.subr.bf16.mxu1 %v9105_v27  ;;  %v7896_v48 = vmul.f32 -1.442695, %v197_v63  ;;  %v7899_v52 = vmul.f32 -1.442695, %v200_v31 }
 0x421   :  { %v7898_v27 = vmul.f32 -1.442695, %v199_v61  ;;  %v7897_v34 = vmul.f32 -1.442695, %v198_v39 }
 0x422   :  { %8888 = vmatpush3.bf16.msra.mxu0 %v9106_v28  ;;  %9200 = vpow2.f32 %v7896_v48 }
 0x423   :  { %8910 = vmatpush3.bf16.msra.mxu1 %v9107_v41  ;;  %8889 = vmatprep.subr.bf16.mxu0 %v9108_v19  ;;  %9202 = vpow2.f32 %v7898_v27 }
 0x424   :  { %8911 = vmatprep.subr.bf16.mxu1 %v9109_v17  ;;  %9204 = vpow2.f32 %v7897_v34 }
 0x425   :  { %9206 = vpow2.f32 %v7899_v52 }
 0x426   :  { %8890 = vmatpush3.bf16.msra.mxu0 %v9110_v18 }
 0x427   :  { %8912 = vmatpush3.bf16.msra.mxu1 %v9111_v44  ;;  %8891 = vmatprep.subr.bf16.mxu0 %v9112_v16 }
 0x428   :  { %8913 = vmatprep.subr.bf16.mxu1 %v9113_v21 }
 0x42a   :  { %8892 = vmatpush3.bf16.msra.mxu0 %v9114_v22 }
 0x42b   :  { %8914 = vmatpush3.bf16.msra.mxu1 %v9115_v57  ;;  %8893 = vmatprep.subr.bf16.mxu0 %v9116_v60 }
 0x42c   :  { %8915 = vmatprep.subr.bf16.mxu1 %v9117_v30  ;;  %v9201_v42 = vpop.eup %9200 }
 0x42d   :  { %v9203_v59 = vpop.eup %9202  ;;  %v229_v1 = vadd.f32 1.0, %v9201_v42 }
 0x42e   :  { %8894 = vmatpush3.bf16.msra.mxu0 %v9118_v32  ;;  %v9205_v46 = vpop.eup %9204  ;;  %v231_v28 = vadd.f32 1.0, %v9203_v59 }
 0x42f   :  { %8916 = vmatpush3.bf16.msra.mxu1 %v9119_v33  ;;  %8923 = vmatprep.subr.bf16.mxu0 %v9120_v36  ;;  %v9207_v0 = vpop.eup %9206  ;;  %v230_v41 = vadd.f32 1.0, %v9205_v46  ;;  %9208 = vrcp.f32 %v229_v1 }
 0x430   :  { %8945 = vmatprep.subr.bf16.mxu1 %v9121_v43  ;;  %v232_v19 = vadd.f32 1.0, %v9207_v0  ;;  %9210 = vrcp.f32 %v231_v28 }
 0x431   :  { %7729 = vmatmul.mubr.bf16.vlgmr.msra.gmra.mrb[16].mxu0 %v7176_v29  ;;  %v9137_v29 = vld [vmem:[#allocation10 + $0x1e0] sm:$0xff]   ;;  %9212 = vrcp.f32 %v230_v41 }
 0x432   :  { %7770 = vmatmul.mubr.bf16.vlgmr.msra.gmra.mrb[16].mxu1 %v7178_v20  ;;  %8924 = vmatpush3.bf16.msra.mxu0 %v9122_v45  ;;  %v9138_v20 = vld [vmem:[#allocation10 + $0x120] sm:$0xff]   ;;  %9214 = vrcp.f32 %v232_v19 }
 0x433   :  { %8946 = vmatpush3.bf16.msra.mxu1 %v9123_v47  ;;  %8925 = vmatprep.subr.bf16.mxu0 %v9124_v40 }
 0x434   :  { %8947 = vmatprep.subr.bf16.mxu1 %v9125_v58 }
 0x436   :  { %8926 = vmatpush3.bf16.msra.mxu0 %v9126_v50 }
 0x437   :  { %8948 = vmatpush3.bf16.msra.mxu1 %v9127_v51  ;;  %8927 = vmatprep.subr.bf16.mxu0 %v9128_v49 }
 0x438   :  { %8949 = vmatprep.subr.bf16.mxu1 %v9129_v62 }
 0x439   :  { %v9209_v10 = vpop.eup %9208 }
 0x43a   :  { %8928 = vmatpush3.bf16.msra.mxu0 %v9130_v54  ;;  %v9211_v17 = vpop.eup %9210  ;;  %v253_v21 = vsub.f32 1.0, %v9209_v10 }
 0x43b   :  { %8950 = vmatpush3.bf16.msra.mxu1 %v9131_v55  ;;  %8929 = vmatprep.subr.bf16.mxu0 %v9132_v53  ;;  %v9213_v18 = vpop.eup %9212  ;;  %v255_v30 = vsub.f32 1.0, %v9211_v17 }
 0x43c   :  { %8951 = vmatprep.subr.bf16.mxu1 %v9133_v23  ;;  %v9215_v44 = vpop.eup %9214  ;;  %v254_v33 = vsub.f32 1.0, %v9213_v18 }
 0x43d   :  { %v256_v47 = vsub.f32 1.0, %v9215_v44 }
 0x43e   :  { %8930 = vmatpush3.bf16.msra.mxu0 %v9134_v25 }
 0x43f   :  { %8952 = vmatpush3.bf16.msra.mxu1 %v9135_v24  ;;  %8931 = vmatprep.subr.bf16.mxu0 %v9136_v26 }
 0x440   :  { %8953 = vmatprep.subr.bf16.mxu1 %v9137_v29 }
 0x442   :  { %8932 = vmatpush3.bf16.msra.mxu0 %v9138_v20 }
 0x443   :  { %8954 = vmatpush3.bf16.msra.mxu1 %v9139_v2  ;;  %8933 = vmatprep.subr.bf16.mxu0 %v9140_v3 }
 0x444   :  { %8955 = vmatprep.subr.bf16.mxu1 %v9141_v4 }
 0x446   :  { %8934 = vmatpush3.bf16.msra.mxu0 %v9142_v56 }
 0x447   :  { %8956 = vmatpush3.bf16.msra.mxu1 %v9143_v5  ;;  %8935 = vmatprep.subr.bf16.mxu0 %v9144_v6 }
 0x448   :  { %8957 = vmatprep.subr.bf16.mxu1 %v9145_v38 }
 0x44a   :  { %8936 = vmatpush3.bf16.msra.mxu0 %v9146_v7 }
 0x44b   :  { %8958 = vmatpush3.bf16.msra.mxu1 %v9147_v8  ;;  %8937 = vmatprep.subr.bf16.mxu0 %v9148_v35 }
 0x44c   :  { %8959 = vmatprep.subr.bf16.mxu1 %v9149_v11 }
 0x44e   :  { %8938 = vmatpush3.bf16.msra.mxu0 %v9150_v37 }
 0x44f   :  { %8960 = vmatpush3.bf16.msra.mxu1 %v9151_v9 }
 0x4e4   :  { %v6963_v16 = vpop.f32.mrb[12].mxu0 }
 0x4e5   :  { %v7148_v22 = vmax.f32 %v6963_v16, 0.0  ;;  %v7135_v57 = vpop.f32.mrb[12].mxu1  ;;  %v6965_v60 = vpop.f32.mrb[13].mxu0 }
 0x4e6   :  { %v7150_v32 = vmax.f32 %v7135_v57, 0.0  ;;  %v7149_v36 = vmax.f32 %v6965_v60, 0.0  ;;  %v7137_v43 = vpop.f32.mrb[13].mxu1  ;;  %v6967_v45 = vpop.f32.mrb[14].mxu0 }
 0x4e7   :  { %v7151_v40 = vmax.f32 %v7137_v43, 0.0  ;;  %v7156_v58 = vmax.f32 %v6967_v45, 0.0  ;;  %v7139_v50 = vpop.f32.mrb[14].mxu1  ;;  %v6969_v51 = vpop.f32.mrb[15].mxu0  ;;  %v7164_v55 = vmul.f32 %v7148_v22, %v253_v21 }
 0x4e8   :  { %v7158_v49 = vmax.f32 %v7139_v50, 0.0  ;;  %v7157_v62 = vmax.f32 %v6969_v51, 0.0  ;;  %v7141_v54 = vpop.f32.mrb[15].mxu1  ;;  %v7166_v25 = vmul.f32 %v7150_v32, %v255_v30  ;;  %v7165_v24 = vmul.f32 %v7149_v36, %v254_v33 }
 0x4e9   :  { %v7172_v53 = vmul.f32 %v7156_v58, %v253_v21  ;;  %v7159_v23 = vmax.f32 %v7141_v54, 0.0  ;;  %v7167_v20 = vmul.f32 %v7151_v40, %v256_v47 }
 0x4ea   :  { %v7174_v26 = vmul.f32 %v7158_v49, %v255_v30  ;;  %v7173_v29 = vmul.f32 %v7157_v62, %v254_v33 }
 0x4eb   :  { %v7180_v2 = vpack.c.bf16 %v7172_v53, %v7164_v55  ;;  %v7175_v3 = vmul.f32 %v7159_v23, %v256_v47 }
 0x4ec   :  { %v7182_v4 = vpack.c.bf16 %v7174_v26, %v7166_v25  ;;  %v7181_v56 = vpack.c.bf16 %v7173_v29, %v7165_v24 }
 0x4ed   :  { %v7183_v5 = vpack.c.bf16 %v7175_v3, %v7167_v20 }
 0x4ee   :  { %7810 = vmatprep.mubr.bf16.mxu0 %v7181_v56 }
 0x4ef   :  { %7851 = vmatprep.mubr.bf16.mxu1 %v7183_v5  ;;  %7811 = vmatmul.mubr.bf16.vlgmr.msra.gmra.mrb[20].mxu0 %v7180_v2 }
 0x4f0   :  { %7852 = vmatmul.mubr.bf16.vlgmr.msra.gmra.mrb[20].mxu1 %v7182_v4 }
 0x504   :  { %v8895_v6 = vpop.f32.mrb[16].mxu0 }
 0x505   :  { %v8917_v38 = vpop.f32.mrb[16].mxu1  ;;  %v8896_v7 = vpop.f32.mrb[17].mxu0 }
 0x506   :  { %v8897_v8 = vadd.f32 %v8896_v7, %v8895_v6  ;;  %v8918_v35 = vpop.f32.mrb[17].mxu1  ;;  %v8898_v11 = vpop.f32.mrb[18].mxu0 }
 0x507   :  { %v8919_v37 = vadd.f32 %v8918_v35, %v8917_v38  ;;  %v8920_v9 = vpop.f32.mrb[18].mxu1  ;;  %v8899_v12 = vpop.f32.mrb[19].mxu0 }
 0x508   :  { %v8900_v15 = vadd.f32 %v8899_v12, %v8898_v11  ;;  %v8921_v13 = vpop.f32.mrb[19].mxu1 }
 0x509   :  { %v7772_v14 = vadd.f32 %v8919_v37, %v8897_v8  ;;  %v8922_v63 = vadd.f32 %v8921_v13, %v8920_v9 }
 0x50b   :  { %v7775_v61 = vadd.f32 %v8922_v63, %v8900_v15 }
 0x5c2   :  { %v8939_v39 = vpop.f32.mrb[20].mxu0 }
 0x5c3   :  { %v8961_v31 = vpop.f32.mrb[20].mxu1  ;;  %v8940_v48 = vpop.f32.mrb[21].mxu0 }
 0x5c4   :  { %v8941_v27 = vadd.f32 %v8940_v48, %v8939_v39  ;;  %v8962_v34 = vpop.f32.mrb[21].mxu1  ;;  %v8942_v52 = vpop.f32.mrb[22].mxu0 }
 0x5c5   :  { %v8963_v42 = vadd.f32 %v8962_v34, %v8961_v31  ;;  %v8964_v59 = vpop.f32.mrb[22].mxu1  ;;  %v8943_v46 = vpop.f32.mrb[23].mxu0 }
 0x5c6   :  { %v7813_v0 = vadd.f32 %v8941_v27, %v7772_v14  ;;  %v8944_v1 = vadd.f32 %v8943_v46, %v8942_v52  ;;  %v8965_v28 = vpop.f32.mrb[23].mxu1 }
 0x5c7   :  { %v8966_v41 = vadd.f32 %v8965_v28, %v8964_v59 }
 0x5c8   :  { %v7854_v19 = vadd.f32 %v8963_v42, %v7813_v0  ;;  %v7816_v10 = vadd.f32 %v8944_v1, %v7775_v61 }
 0x5ca   :  { %7860 = vst [vmem:[#allocation12] sm:$0xff] %v7854_v19  ;;  %v7857_v17 = vadd.f32 %v8966_v41, %v7816_v10 }
 0x5cc   :  { %7861 = vst [vmem:[#allocation12 + $0x8] sm:$0xff] %v7857_v17 }
 0x5cd   :  { %9332 = shalt.err (!%p9329_p11)
}
 0x5ce   :  { %s9333_s12 = scalar_lea.hbm %s9702_s5, 256 }
 0x5cf   :  { %p9334_p12 = scmp.ne.s32.totalorder %s9702_s5, %s9333_s12  ;;  %p9337_p13 = scmp.lt.u32.totalorder %s9333_s12, %s9702_s5 }
 0x5d1   :  { %p9339_p0 = pnand %p9337_p13, %p9334_p12 }
 0x5d3   :  { %9342 = shalt.err (!%p9339_p0)
}
 0x5d4   :  { %s9366_s1 = smov 128   ;;  %s9367_s2 = smov 8  }
 0x5d5   :  { %7873 = dma.vmem_to_hbm [thread:$0]  %s7868_s8, 256, %s9702_s5, [#allocation4], %s9366_s1, %s9366_s1, %s9367_s2  }
 0x5d6   :  { %9351 = dma.done.wait [#allocation4], 256  }
 0x5d7   :  { %9352 = vsyncadd [#allocation4], 4294967040 }
 0x5d8   :  { %7877 = vsyncpa [#allocation3], 1 }
 0x5d9   :  { %7878 = vsyncpa [#allocation8], 1 }
 0x5da   :  { %7879 = vsyncpa [#allocation11], 1 }
 0x5db   :  { %7880 = vsyncpa [#allocation4], 1 }
 0x5dc   :  { %7881 = vsyncpa [#allocation5], 1 }

</bundles_post_ra>
